<compile_context>
chip_gen: v7x
topology: tpu7x:2x2x1
jax: 0.10.0
libtpu: 0.0.40
codegen_flags: <defaults>
</compile_context>

<pallas_src>
import functools

import numpy as np
import jax
import jax.numpy as jnp
from jax import lax
from jax.experimental import pallas as pl
from jax.experimental.pallas import tpu as pltpu


def _compiler_params():
    # Generation-aware VMEM budget: ~3/4 of physical (v5e/v6e: 96 MiB of 128 MiB,
    # v7x: 48 MiB of 64 MiB), capped to leave headroom for Mosaic internals.
    try:
        cap = int(pltpu.get_tpu_info().vmem_capacity_bytes)
    except Exception:
        cap = 64 * 1024 * 1024
    limit = min(cap * 3 // 4, 100 * 1024 * 1024)
    return pltpu.CompilerParams(
        dimension_semantics=("parallel",),
        vmem_limit_bytes=limit,
    )


def _make_gmat(c, g):
    """One-hot channel->group map (C, G) and its transpose (G, C) as host constants."""
    cg = c // g
    gm = (np.arange(c)[:, None] // cg == np.arange(g)[None, :]).astype(np.float32)
    return jnp.asarray(gm), jnp.asarray(np.ascontiguousarray(gm.T))


def _gn_act(y, gn_ref, gm, gmt, *, count, eps, relu):
    """GroupNorm affine (+ReLU) on an (rows, C) f32 value resident in VMEM.

    One-pass statistics: per-channel sum and sum-of-squares are stacked into one
    (2, C) row pair, reduced to groups with a single one-hot matmul when gm is
    given (G != C path), then var = E[x^2] - mean^2 clamped at 0 (f32 throughout).
    gm/gmt are None for per-channel normalization (gn_proj: num_groups == C).
    """
    stats = jnp.concatenate(
        [jnp.sum(y, axis=0, keepdims=True),
         jnp.sum(y * y, axis=0, keepdims=True)], axis=0)                 # (2, C)
    if gm is not None:
        stats = jnp.dot(stats, gm, preferred_element_type=jnp.float32)   # (2, G)
    stats = stats * (1.0 / count)
    mean = stats[0:1]
    var = jnp.maximum(stats[1:2] - mean * mean, 0.0)
    if gm is not None:
        mv = jnp.concatenate([mean, var], axis=0)                        # (2, G)
        mv = jnp.dot(mv, gmt, preferred_element_type=jnp.float32)        # (2, C)
        mean, var = mv[0:1], mv[1:2]
    scale = gn_ref[0:1] * lax.rsqrt(var + eps)
    shift = gn_ref[1:2] - mean * scale
    out = y * scale + shift
    if relu:
        out = jnp.maximum(out, 0.0)
    return out


# -----------------------------------------------------------------------------
# Fully fused PreActBottleneck kernel (one grid step == one sample)
# -----------------------------------------------------------------------------
def _bottleneck_kernel(*refs, s, ho, wo, n_phases, has_down, big_k):
    it = iter(refs)
    x_ref = next(it)        # (1, H*W, Cin) bf16, phase-major row order when s == 2
    w1_ref = next(it)       # (Cin, cmid)    bf16  (standardized)
    w2_ref = next(it)       # (9*cmid, cmid) bf16, tap-major rows
    w3_ref = next(it)       # (cmid, Cout)   bf16
    gn1_ref = next(it)      # (2, cmid) f32, rows = [gamma, beta]
    gn2_ref = next(it)      # (2, cmid) f32
    gn3_ref = next(it)      # (2, Cout) f32
    gm_mid_ref = next(it)   # (cmid, 32) f32 one-hot
    gmt_mid_ref = next(it)  # (32, cmid) f32
    gm_out_ref = next(it)   # (Cout, 32) f32
    gmt_out_ref = next(it)  # (32, Cout) f32
    wd_ref = next(it) if has_down else None    # (Cin, Cout) bf16
    gnp_ref = next(it) if has_down else None   # (2, Cout)   f32
    o_ref = next(it)        # (1, Ho*Wo, Cout) bf16
    pad_ref = next(it)      # VMEM scratch (P, Ho+2, Wo+2, cmid) bf16 (zero halo)
    im2col_ref = next(it) if big_k else None   # VMEM scratch (Ho*Wo, 9*cmid) bf16

    hw_in = x_ref.shape[1]
    cmid = w1_ref.shape[1]
    cout = w3_ref.shape[1]
    n_out = ho * wo

    # Zero the padded scratch each step (only the halo ring really needs it, but a
    # full memset is trivially cheap and stays correct if the batch axis is sharded
    # across TensorCores).  Interior is fully rewritten below.
    pad_ref[...] = jnp.zeros(pad_ref.shape, pad_ref.dtype)

    x_flat = x_ref[0]                                         # (H*W, Cin) bf16

    # ---- conv1 (1x1) + gn1 + relu (stats over the full H*W resolution) ----
    y1 = jnp.dot(x_flat, w1_ref[...], preferred_element_type=jnp.float32)
    y1 = _gn_act(y1, gn1_ref, gm_mid_ref[...], gmt_mid_ref[...],
                 count=float(hw_in * (cmid // 32)), eps=1e-6, relu=True)
    pad_ref[:, 1:1 + ho, 1:1 + wo, :] = (
        y1.astype(jnp.bfloat16).reshape(n_phases, ho, wo, cmid))

    # ---- conv2 (3x3, stride s, pad 1) + gn2 + relu; taps are VMEM windows ----
    taps = []
    for kh in range(3):
        for kw in range(3):
            if s == 1:
                p, rh, rw = 0, kh, kw
            else:  # stride 2: each tap maps to (phase, +0/+1 window) of a phase buffer
                p = ((kh + 1) % 2) * 2 + ((kw + 1) % 2)
                rh, rw = min(kh, 1), min(kw, 1)
            win = pad_ref[p, rh:rh + ho, rw:rw + wo, :]       # (ho, wo, cmid) bf16
            taps.append(win.reshape(n_out, cmid))

    if big_k:
        # Lane-aligned im2col in VMEM -> one K = 9*cmid MXU pass.
        for t in range(9):
            im2col_ref[:, t * cmid:(t + 1) * cmid] = taps[t]
        y2 = jnp.dot(im2col_ref[...], w2_ref[...],
                     preferred_element_type=jnp.float32)
    else:
        # Narrow channels (cmid % 128 != 0): unaligned lane packing costs more than
        # it saves; accumulate nine dots, seeding from tap 0 (no zero-fill pass).
        y2 = jnp.dot(taps[0], w2_ref[0:cmid, :],
                     preferred_element_type=jnp.float32)
        for t in range(1, 9):
            y2 = y2 + jnp.dot(taps[t], w2_ref[t * cmid:(t + 1) * cmid, :],
                              preferred_element_type=jnp.float32)
    y2 = _gn_act(y2, gn2_ref, gm_mid_ref[...], gmt_mid_ref[...],
                 count=float(n_out * (cmid // 32)), eps=1e-6, relu=True)

    # ---- conv3 (1x1) + gn3 (no ReLU yet) ----
    y3 = jnp.dot(y2.astype(jnp.bfloat16), w3_ref[...],
                 preferred_element_type=jnp.float32)
    y3 = _gn_act(y3, gn3_ref, gm_out_ref[...], gmt_out_ref[...],
                 count=float(n_out * (cout // 32)), eps=1e-6, relu=False)

    # ---- residual branch: fused downsample(1x1, stride s) + gn_proj, or identity ----
    if has_down:
        xr = x_flat[0:n_out, :]   # stride-s sample points == leading (phase-0) rows
        r = jnp.dot(xr, wd_ref[...], preferred_element_type=jnp.float32)
        r = _gn_act(r, gnp_ref, None, None, count=float(n_out), eps=1e-5, relu=False)
    else:
        r = x_flat.astype(jnp.float32)   # identity: stride == 1 and Cin == Cout

    o_ref[0] = jnp.maximum(y3 + r, 0.0).astype(o_ref.dtype)


# -----------------------------------------------------------------------------
# StdConv2d weight standardization (parameter-only glue, plain JAX)
# -----------------------------------------------------------------------------
def _std_weight(w_oihw):
    m = jnp.mean(w_oihw, axis=(1, 2, 3), keepdims=True)
    v = jnp.var(w_oihw, axis=(1, 2, 3), keepdims=True)   # unbiased=False
    return (w_oihw - m) / jnp.sqrt(v + 1e-5)


# -----------------------------------------------------------------------------
# PreActBottleneck forward (public API: NCHW f32, PyTorch convention)
# -----------------------------------------------------------------------------
def preact_bottleneck(params, x_nchw, *, stride):
    N, cin, H, W = x_nchw.shape
    s = stride
    assert s in (1, 2), "ResNetV2 PreActBottleneck uses stride 1 or 2"
    x = jnp.transpose(x_nchw, (0, 2, 3, 1)).astype(jnp.bfloat16)   # NHWC bf16

    if s == 1:
        ho, wo, n_ph = H, W, 1
        x_in = x.reshape(N, H * W, cin)
    else:
        assert H % 2 == 0 and W % 2 == 0, "stride-2 block expects even spatial dims"
        ho, wo, n_ph = H // 2, W // 2, 4
        # Space-to-batch phase split (one layout pass over x only, folds into the
        # boundary transpose): every in-kernel 3x3 tap becomes an unstrided VMEM
        # window, and phase 0 is exactly the stride-2 downsample input.
        phases = [x[:, a::2, b::2, :] for a in range(2) for b in range(2)]
        x_in = jnp.stack(phases, axis=1).reshape(N, H * W, cin)

    cmid = params["conv1_w"].shape[0]
    cout = params["conv3_w"].shape[0]
    has_down = "down_w" in params
    big_k = (cmid % 128 == 0)

    w1 = _std_weight(params["conv1_w"]).reshape(cmid, cin).T.astype(jnp.bfloat16)
    w2 = (jnp.transpose(_std_weight(params["conv2_w"]), (2, 3, 1, 0))
          .reshape(9 * cmid, cmid).astype(jnp.bfloat16))
    w3 = _std_weight(params["conv3_w"]).reshape(cout, cmid).T.astype(jnp.bfloat16)
    gn1 = jnp.stack([params["gn1_w"], params["gn1_b"]]).astype(jnp.float32)
    gn2 = jnp.stack([params["gn2_w"], params["gn2_b"]]).astype(jnp.float32)
    gn3 = jnp.stack([params["gn3_w"], params["gn3_b"]]).astype(jnp.float32)
    gm_mid, gmt_mid = _make_gmat(cmid, 32)
    gm_out, gmt_out = _make_gmat(cout, 32)

    args = [x_in, w1, w2, w3, gn1, gn2, gn3, gm_mid, gmt_mid, gm_out, gmt_out]
    in_specs = [
        pl.BlockSpec((1, H * W, cin), lambda n: (n, 0, 0)),
        pl.BlockSpec((cin, cmid), lambda n: (0, 0)),
        pl.BlockSpec((9 * cmid, cmid), lambda n: (0, 0)),
        pl.BlockSpec((cmid, cout), lambda n: (0, 0)),
        pl.BlockSpec((2, cmid), lambda n: (0, 0)),
        pl.BlockSpec((2, cmid), lambda n: (0, 0)),
        pl.BlockSpec((2, cout), lambda n: (0, 0)),
        pl.BlockSpec((cmid, 32), lambda n: (0, 0)),
        pl.BlockSpec((32, cmid), lambda n: (0, 0)),
        pl.BlockSpec((cout, 32), lambda n: (0, 0)),
        pl.BlockSpec((32, cout), lambda n: (0, 0)),
    ]
    if has_down:
        wd = _std_weight(params["down_w"]).reshape(cout, cin).T.astype(jnp.bfloat16)
        gnp = jnp.stack([params["gnp_w"], params["gnp_b"]]).astype(jnp.float32)
        args += [wd, gnp]
        in_specs += [pl.BlockSpec((cin, cout), lambda n: (0, 0)),
                     pl.BlockSpec((2, cout), lambda n: (0, 0))]

    scratch_shapes = [pltpu.VMEM((n_ph, ho + 2, wo + 2, cmid), jnp.bfloat16)]
    if big_k:
        scratch_shapes.append(pltpu.VMEM((ho * wo, 9 * cmid), jnp.bfloat16))

    kernel = functools.partial(_bottleneck_kernel, s=s, ho=ho, wo=wo,
                               n_phases=n_ph, has_down=has_down, big_k=big_k)
    out = pl.pallas_call(
        kernel,
        out_shape=jax.ShapeDtypeStruct((N, ho * wo, cout), jnp.bfloat16),
        grid=(N,),
        in_specs=in_specs,
        out_specs=pl.BlockSpec((1, ho * wo, cout), lambda n: (n, 0, 0)),
        scratch_shapes=scratch_shapes,
        compiler_params=_compiler_params(),
    )(*args)

    out = out.reshape(N, ho, wo, cout)
    return jnp.transpose(out, (0, 3, 1, 2)).astype(jnp.float32)     # NCHW f32


# -----------------------------------------------------------------------------
# Pure-JAX f32 reference for verification
# -----------------------------------------------------------------------------
def _ref_std_conv(x, w, stride, pad):
    ws = _std_weight(w)
    return lax.conv_general_dilated(
        x, ws, (stride, stride), [(pad, pad), (pad, pad)],
        dimension_numbers=("NCHW", "OIHW", "NCHW"),
        precision=lax.Precision.HIGHEST,
    )


def _ref_gn(x, w, b, groups, eps):
    N, C, H, W = x.shape
    xg = x.reshape(N, groups, C // groups, H, W)
    m = xg.mean(axis=(2, 3, 4), keepdims=True)
    v = xg.var(axis=(2, 3, 4), keepdims=True)
    xn = ((xg - m) / jnp.sqrt(v + eps)).reshape(N, C, H, W)
    return xn * w[None, :, None, None] + b[None, :, None, None]


def ref_forward(params, x, *, stride):
    residual = x
    if "down_w" in params:
        cout = params["down_w"].shape[0]
        residual = _ref_gn(_ref_std_conv(x, params["down_w"], stride, 0),
                           params["gnp_w"], params["gnp_b"], cout, 1e-5)
    y = jax.nn.relu(_ref_gn(_ref_std_conv(x, params["conv1_w"], 1, 0),
                            params["gn1_w"], params["gn1_b"], 32, 1e-6))
    y = jax.nn.relu(_ref_gn(_ref_std_conv(y, params["conv2_w"], stride, 1),
                            params["gn2_w"], params["gn2_b"], 32, 1e-6))
    y = _ref_gn(_ref_std_conv(y, params["conv3_w"], 1, 0),
                params["gn3_w"], params["gn3_b"], 32, 1e-6)
    return jax.nn.relu(residual + y)


# -----------------------------------------------------------------------------
# Deterministic parameter init (shapes per PreActBottleneck.__init__)
# -----------------------------------------------------------------------------
def init_params(key, cin, cout, cmid, stride):
    ks = jax.random.split(key, 12)
    p = {
        "conv1_w": 0.05 * jax.random.normal(ks[0], (cmid, cin, 1, 1), jnp.float32),
        "conv2_w": 0.05 * jax.random.normal(ks[1], (cmid, cmid, 3, 3), jnp.float32),
        "conv3_w": 0.05 * jax.random.normal(ks[2], (cout, cmid, 1, 1), jnp.float32),
        "gn1_w": 1.0 + 0.1 * jax.random.normal(ks[3], (cmid,), jnp.float32),
        "gn1_b": 0.1 * jax.random.normal(ks[4], (cmid,), jnp.float32),
        "gn2_w": 1.0 + 0.1 * jax.random.normal(ks[5], (cmid,), jnp.float32),
        "gn2_b": 0.1 * jax.random.normal(ks[6], (cmid,), jnp.float32),
        "gn3_w": 1.0 + 0.1 * jax.random.normal(ks[7], (cout,), jnp.float32),
        "gn3_b": 0.1 * jax.random.normal(ks[8], (cout,), jnp.float32),
    }
    if stride != 1 or cin != cout:
        p["down_w"] = 0.05 * jax.random.normal(ks[9], (cout, cin, 1, 1), jnp.float32)
        p["gnp_w"] = 1.0 + 0.1 * jax.random.normal(ks[10], (cout,), jnp.float32)
        p["gnp_b"] = 0.1 * jax.random.normal(ks[11], (cout,), jnp.float32)
    return p


if __name__ == "__main__":
    key = jax.random.PRNGKey(0)

    configs = [
        # (cin, cout, cmid, stride, N, H, W)
        (64, 128, 32, 2, 2, 16, 16),    # downsample + stride-2 conv2 (phase path)
        (64, 64, 32, 1, 2, 16, 16),     # identity-residual path
        (128, 256, 128, 1, 2, 16, 16),  # wide cmid: big-K im2col matmul path
    ]
    for i, (cin, cout, cmid, stride, N, H, W) in enumerate(configs):
        kx, kp = jax.random.split(jax.random.fold_in(key, i))
        x = jax.random.normal(kx, (N, cin, H, W), jnp.float32)
        params = init_params(kp, cin, cout, cmid, stride)

        fwd = jax.jit(functools.partial(preact_bottleneck, stride=stride))
        out = jax.block_until_ready(fwd(params, x))
        ref = jax.block_until_ready(ref_forward(params, x, stride=stride))

        out_np = np.asarray(out, dtype=np.float32)
        ref_np = np.asarray(ref, dtype=np.float32)
        # Tolerances sized for the bf16 activation/weight datapath vs. the f32 ref.
        assert float(np.mean(np.abs(out_np - ref_np))) < 2e-2
        np.testing.assert_allclose(out_np, ref_np, rtol=5e-2, atol=5e-2)

    print("KERNEL_OK")
</pallas_src>

<mosaic_0001>
module attributes {stable_mosaic.version = 11 : i64} {
  func.func @_bottleneck_kernel(%arg0: i32, %arg1: memref<1x256x64xbf16, #tpu.memory_space<vmem>>, %arg2: memref<64x32xbf16, #tpu.memory_space<vmem>>, %arg3: memref<288x32xbf16, #tpu.memory_space<vmem>>, %arg4: memref<32x128xbf16, #tpu.memory_space<vmem>>, %arg5: memref<2x32xf32, #tpu.memory_space<vmem>>, %arg6: memref<2x32xf32, #tpu.memory_space<vmem>>, %arg7: memref<2x128xf32, #tpu.memory_space<vmem>>, %arg8: memref<32x32xf32, #tpu.memory_space<vmem>>, %arg9: memref<32x32xf32, #tpu.memory_space<vmem>>, %arg10: memref<128x32xf32, #tpu.memory_space<vmem>>, %arg11: memref<32x128xf32, #tpu.memory_space<vmem>>, %arg12: memref<64x128xbf16, #tpu.memory_space<vmem>>, %arg13: memref<2x128xf32, #tpu.memory_space<vmem>>, %arg14: memref<1x64x128xbf16, #tpu.memory_space<vmem>>, %arg15: memref<4x10x10x32xbf16, #tpu.memory_space<vmem>>) attributes {dimension_semantics = [#tpu.dimension_semantics<parallel>], iteration_bounds = array<i64: 2>, scalar_prefetch = 0 : i64, scratch_operands = 1 : i64, tpu.core_type = #tpu.core_type<tc>, window_params = [{transform_indices = @transform_0, window_bounds = array<i64: 1, 256, 64>}, {pipeline_mode = #tpu.pipeline_mode<synchronous>, transform_indices = @transform_1, window_bounds = array<i64: 64, 32>}, {pipeline_mode = #tpu.pipeline_mode<synchronous>, transform_indices = @transform_2, window_bounds = array<i64: 288, 32>}, {pipeline_mode = #tpu.pipeline_mode<synchronous>, transform_indices = @transform_3, window_bounds = array<i64: 32, 128>}, {pipeline_mode = #tpu.pipeline_mode<synchronous>, transform_indices = @transform_4, window_bounds = array<i64: 2, 32>}, {pipeline_mode = #tpu.pipeline_mode<synchronous>, transform_indices = @transform_5, window_bounds = array<i64: 2, 32>}, {pipeline_mode = #tpu.pipeline_mode<synchronous>, transform_indices = @transform_6, window_bounds = array<i64: 2, 128>}, {pipeline_mode = #tpu.pipeline_mode<synchronous>, transform_indices = @transform_7, window_bounds = array<i64: 32, 32>}, {pipeline_mode = #tpu.pipeline_mode<synchronous>, transform_indices = @transform_8, window_bounds = array<i64: 32, 32>}, {pipeline_mode = #tpu.pipeline_mode<synchronous>, transform_indices = @transform_9, window_bounds = array<i64: 128, 32>}, {pipeline_mode = #tpu.pipeline_mode<synchronous>, transform_indices = @transform_10, window_bounds = array<i64: 32, 128>}, {pipeline_mode = #tpu.pipeline_mode<synchronous>, transform_indices = @transform_11, window_bounds = array<i64: 64, 128>}, {pipeline_mode = #tpu.pipeline_mode<synchronous>, transform_indices = @transform_12, window_bounds = array<i64: 2, 128>}, {transform_indices = @transform_13, window_bounds = array<i64: 1, 64, 128>}]} {
    %cst = arith.constant 0.000000e+00 : bf16
    %0 = vector.broadcast %cst : bf16 to vector<4x10x10x32xbf16>
    %c0 = arith.constant 0 : index
    %c0_0 = arith.constant 0 : index
    %c0_1 = arith.constant 0 : index
    %c0_2 = arith.constant 0 : index
    %1 = vector.load %arg15[%c0, %c0_0, %c0_1, %c0_2] : memref<4x10x10x32xbf16, #tpu.memory_space<vmem>>, vector<4x10x10x32xbf16>
    tpu.vector_store %arg15[%c0, %c0_0, %c0_1, %c0_2], %0 {strides = array<i32>} : memref<4x10x10x32xbf16, #tpu.memory_space<vmem>>, vector<4x10x10x32xbf16>,
    %c0_3 = arith.constant 0 : index
    %c0_4 = arith.constant 0 : index
    %c0_5 = arith.constant 0 : index
    %2 = vector.load %arg1[%c0_3, %c0_4, %c0_5] : memref<1x256x64xbf16, #tpu.memory_space<vmem>>, vector<1x256x64xbf16>
    %3 = vector.shape_cast %2 : vector<1x256x64xbf16> to vector<256x64xbf16>
    %c0_6 = arith.constant 0 : index
    %c0_7 = arith.constant 0 : index
    %4 = vector.load %arg2[%c0_6, %c0_7] : memref<64x32xbf16, #tpu.memory_space<vmem>>, vector<64x32xbf16>
    %cst_8 = arith.constant dense<0.000000e+00> : vector<256x32xf32>
    %5 = tpu.matmul %3, %4, %cst_8 {dimension_numbers = #tpu.dot_dimension_numbers<[1], [0], [0], [1], [0, 0, 1, 1], [], []>} : vector<256x64xbf16>, vector<64x32xbf16>, vector<256x32xf32> -> vector<256x32xf32>
    %c0_9 = arith.constant 0 : index
    %c0_10 = arith.constant 0 : index
    %6 = vector.load %arg8[%c0_9, %c0_10] : memref<32x32xf32, #tpu.memory_space<vmem>>, vector<32x32xf32>
    %c0_11 = arith.constant 0 : index
    %c0_12 = arith.constant 0 : index
    %7 = vector.load %arg9[%c0_11, %c0_12] : memref<32x32xf32, #tpu.memory_space<vmem>>, vector<32x32xf32>
    %cst_13 = arith.constant dense<0.000000e+00> : vector<32xf32>
    %8 = vector.multi_reduction <add>, %5, %cst_13 [0] : vector<256x32xf32> to vector<32xf32>
    %9 = vector.shape_cast %8 : vector<32xf32> to vector<1x32xf32>
    %10 = arith.mulf %5, %5 : vector<256x32xf32>
    %cst_14 = arith.constant dense<0.000000e+00> : vector<32xf32>
    %11 = vector.multi_reduction <add>, %10, %cst_14 [0] : vector<256x32xf32> to vector<32xf32>
    %12 = vector.shape_cast %11 : vector<32xf32> to vector<1x32xf32>
    %13 = tpu.concatenate %9, %12 in 0 : vector<1x32xf32>, vector<1x32xf32> -> vector<2x32xf32>
    %cst_15 = arith.constant dense<0.000000e+00> : vector<2x32xf32>
    %14 = tpu.matmul %13, %6, %cst_15 {dimension_numbers = #tpu.dot_dimension_numbers<[1], [0], [0], [1], [0, 0, 1, 1], [], []>} : vector<2x32xf32>, vector<32x32xf32>, vector<2x32xf32> -> vector<2x32xf32>
    %cst_16 = arith.constant 3.906250e-03 : f32
    %15 = vector.broadcast %cst_16 : f32 to vector<2x32xf32>
    %16 = arith.mulf %14, %15 : vector<2x32xf32>
    %17 = vector.extract_strided_slice %16 {offsets = [0, 0], sizes = [1, 32], strides = [1, 1]} : vector<2x32xf32> to vector<1x32xf32>
    %18 = vector.extract_strided_slice %16 {offsets = [1, 0], sizes = [1, 32], strides = [1, 1]} : vector<2x32xf32> to vector<1x32xf32>
    %19 = arith.mulf %17, %17 : vector<1x32xf32>
    %20 = arith.subf %18, %19 : vector<1x32xf32>
    %cst_17 = arith.constant 0.000000e+00 : f32
    %21 = vector.broadcast %cst_17 : f32 to vector<1x32xf32>
    %22 = arith.maximumf %20, %21 : vector<1x32xf32>
    %23 = tpu.concatenate %17, %22 in 0 : vector<1x32xf32>, vector<1x32xf32> -> vector<2x32xf32>
    %cst_18 = arith.constant dense<0.000000e+00> : vector<2x32xf32>
    %24 = tpu.matmul %23, %7, %cst_18 {dimension_numbers = #tpu.dot_dimension_numbers<[1], [0], [0], [1], [0, 0, 1, 1], [], []>} : vector<2x32xf32>, vector<32x32xf32>, vector<2x32xf32> -> vector<2x32xf32>
    %25 = vector.extract_strided_slice %24 {offsets = [0, 0], sizes = [1, 32], strides = [1, 1]} : vector<2x32xf32> to vector<1x32xf32>
    %26 = vector.extract_strided_slice %24 {offsets = [1, 0], sizes = [1, 32], strides = [1, 1]} : vector<2x32xf32> to vector<1x32xf32>
    %c0_19 = arith.constant 0 : index
    %c0_20 = arith.constant 0 : index
    %27 = vector.load %arg5[%c0_19, %c0_20] : memref<2x32xf32, #tpu.memory_space<vmem>>, vector<1x32xf32>
    %cst_21 = arith.constant 9.99999997E-7 : f32
    %28 = vector.broadcast %cst_21 : f32 to vector<1x32xf32>
    %29 = arith.addf %26, %28 : vector<1x32xf32>
    %30 = math.rsqrt %29 : vector<1x32xf32>
    %31 = arith.mulf %27, %30 : vector<1x32xf32>
    %c1 = arith.constant 1 : index
    %c0_22 = arith.constant 0 : index
    %32 = vector.load %arg5[%c1, %c0_22] : memref<2x32xf32, #tpu.memory_space<vmem>>, vector<1x32xf32>
    %33 = arith.mulf %25, %31 : vector<1x32xf32>
    %34 = arith.subf %32, %33 : vector<1x32xf32>
    %35 = vector.broadcast %31 : vector<1x32xf32> to vector<256x32xf32>
    %36 = arith.mulf %5, %35 : vector<256x32xf32>
    %37 = vector.broadcast %34 : vector<1x32xf32> to vector<256x32xf32>
    %38 = arith.addf %36, %37 : vector<256x32xf32>
    %cst_23 = arith.constant 0.000000e+00 : f32
    %39 = vector.broadcast %cst_23 : f32 to vector<256x32xf32>
    %40 = arith.maximumf %38, %39 : vector<256x32xf32>
    %41 = arith.truncf %40 : vector<256x32xf32> to vector<256x32xbf16>
    %42 = vector.shape_cast %41 : vector<256x32xbf16> to vector<4x8x8x32xbf16>
    %c0_24 = arith.constant 0 : index
    %c1_25 = arith.constant 1 : index
    %c1_26 = arith.constant 1 : index
    %c0_27 = arith.constant 0 : index
    %43 = vector.load %arg15[%c0_24, %c1_25, %c1_26, %c0_27] : memref<4x10x10x32xbf16, #tpu.memory_space<vmem>>, vector<4x8x8x32xbf16>
    tpu.vector_store %arg15[%c0_24, %c1_25, %c1_26, %c0_27], %42 {strides = array<i32>} : memref<4x10x10x32xbf16, #tpu.memory_space<vmem>>, vector<4x8x8x32xbf16>,
    %c3 = arith.constant 3 : index
    %c0_28 = arith.constant 0 : index
    %c0_29 = arith.constant 0 : index
    %c0_30 = arith.constant 0 : index
    %44 = vector.load %arg15[%c3, %c0_28, %c0_29, %c0_30] : memref<4x10x10x32xbf16, #tpu.memory_space<vmem>>, vector<1x8x8x32xbf16>
    %45 = vector.shape_cast %44 : vector<1x8x8x32xbf16> to vector<8x8x32xbf16>
    %46 = vector.shape_cast %45 : vector<8x8x32xbf16> to vector<64x32xbf16>
    %c2 = arith.constant 2 : index
    %c0_31 = arith.constant 0 : index
    %c1_32 = arith.constant 1 : index
    %c0_33 = arith.constant 0 : index
    %47 = vector.load %arg15[%c2, %c0_31, %c1_32, %c0_33] : memref<4x10x10x32xbf16, #tpu.memory_space<vmem>>, vector<1x8x8x32xbf16>
    %48 = vector.shape_cast %47 : vector<1x8x8x32xbf16> to vector<8x8x32xbf16>
    %49 = vector.shape_cast %48 : vector<8x8x32xbf16> to vector<64x32xbf16>
    %c3_34 = arith.constant 3 : index
    %c0_35 = arith.constant 0 : index
    %c1_36 = arith.constant 1 : index
    %c0_37 = arith.constant 0 : index
    %50 = vector.load %arg15[%c3_34, %c0_35, %c1_36, %c0_37] : memref<4x10x10x32xbf16, #tpu.memory_space<vmem>>, vector<1x8x8x32xbf16>
    %51 = vector.shape_cast %50 : vector<1x8x8x32xbf16> to vector<8x8x32xbf16>
    %52 = vector.shape_cast %51 : vector<8x8x32xbf16> to vector<64x32xbf16>
    %c1_38 = arith.constant 1 : index
    %c1_39 = arith.constant 1 : index
    %c0_40 = arith.constant 0 : index
    %c0_41 = arith.constant 0 : index
    %53 = vector.load %arg15[%c1_38, %c1_39, %c0_40, %c0_41] : memref<4x10x10x32xbf16, #tpu.memory_space<vmem>>, vector<1x8x8x32xbf16>
    %54 = vector.shape_cast %53 : vector<1x8x8x32xbf16> to vector<8x8x32xbf16>
    %55 = vector.shape_cast %54 : vector<8x8x32xbf16> to vector<64x32xbf16>
    %c0_42 = arith.constant 0 : index
    %c1_43 = arith.constant 1 : index
    %c1_44 = arith.constant 1 : index
    %c0_45 = arith.constant 0 : index
    %56 = vector.load %arg15[%c0_42, %c1_43, %c1_44, %c0_45] : memref<4x10x10x32xbf16, #tpu.memory_space<vmem>>, vector<1x8x8x32xbf16>
    %57 = vector.shape_cast %56 : vector<1x8x8x32xbf16> to vector<8x8x32xbf16>
    %58 = vector.shape_cast %57 : vector<8x8x32xbf16> to vector<64x32xbf16>
    %c1_46 = arith.constant 1 : index
    %c1_47 = arith.constant 1 : index
    %c1_48 = arith.constant 1 : index
    %c0_49 = arith.constant 0 : index
    %59 = vector.load %arg15[%c1_46, %c1_47, %c1_48, %c0_49] : memref<4x10x10x32xbf16, #tpu.memory_space<vmem>>, vector<1x8x8x32xbf16>
    %60 = vector.shape_cast %59 : vector<1x8x8x32xbf16> to vector<8x8x32xbf16>
    %61 = vector.shape_cast %60 : vector<8x8x32xbf16> to vector<64x32xbf16>
    %c3_50 = arith.constant 3 : index
    %c1_51 = arith.constant 1 : index
    %c0_52 = arith.constant 0 : index
    %c0_53 = arith.constant 0 : index
    %62 = vector.load %arg15[%c3_50, %c1_51, %c0_52, %c0_53] : memref<4x10x10x32xbf16, #tpu.memory_space<vmem>>, vector<1x8x8x32xbf16>
    %63 = vector.shape_cast %62 : vector<1x8x8x32xbf16> to vector<8x8x32xbf16>
    %64 = vector.shape_cast %63 : vector<8x8x32xbf16> to vector<64x32xbf16>
    %c2_54 = arith.constant 2 : index
    %c1_55 = arith.constant 1 : index
    %c1_56 = arith.constant 1 : index
    %c0_57 = arith.constant 0 : index
    %65 = vector.load %arg15[%c2_54, %c1_55, %c1_56, %c0_57] : memref<4x10x10x32xbf16, #tpu.memory_space<vmem>>, vector<1x8x8x32xbf16>
    %66 = vector.shape_cast %65 : vector<1x8x8x32xbf16> to vector<8x8x32xbf16>
    %67 = vector.shape_cast %66 : vector<8x8x32xbf16> to vector<64x32xbf16>
    %c3_58 = arith.constant 3 : index
    %c1_59 = arith.constant 1 : index
    %c1_60 = arith.constant 1 : index
    %c0_61 = arith.constant 0 : index
    %68 = vector.load %arg15[%c3_58, %c1_59, %c1_60, %c0_61] : memref<4x10x10x32xbf16, #tpu.memory_space<vmem>>, vector<1x8x8x32xbf16>
    %69 = vector.shape_cast %68 : vector<1x8x8x32xbf16> to vector<8x8x32xbf16>
    %70 = vector.shape_cast %69 : vector<8x8x32xbf16> to vector<64x32xbf16>
    %c0_62 = arith.constant 0 : index
    %c0_63 = arith.constant 0 : index
    %71 = vector.load %arg3[%c0_62, %c0_63] : memref<288x32xbf16, #tpu.memory_space<vmem>>, vector<32x32xbf16>
    %cst_64 = arith.constant dense<0.000000e+00> : vector<64x32xf32>
    %72 = tpu.matmul %46, %71, %cst_64 {dimension_numbers = #tpu.dot_dimension_numbers<[1], [0], [0], [1], [0, 0, 1, 1], [], []>} : vector<64x32xbf16>, vector<32x32xbf16>, vector<64x32xf32> -> vector<64x32xf32>
    %c32 = arith.constant 32 : index
    %c0_65 = arith.constant 0 : index
    %73 = vector.load %arg3[%c32, %c0_65] : memref<288x32xbf16, #tpu.memory_space<vmem>>, vector<32x32xbf16>
    %cst_66 = arith.constant dense<0.000000e+00> : vector<64x32xf32>
    %74 = tpu.matmul %49, %73, %cst_66 {dimension_numbers = #tpu.dot_dimension_numbers<[1], [0], [0], [1], [0, 0, 1, 1], [], []>} : vector<64x32xbf16>, vector<32x32xbf16>, vector<64x32xf32> -> vector<64x32xf32>
    %75 = arith.addf %72, %74 : vector<64x32xf32>
    %c64 = arith.constant 64 : index
    %c0_67 = arith.constant 0 : index
    %76 = vector.load %arg3[%c64, %c0_67] : memref<288x32xbf16, #tpu.memory_space<vmem>>, vector<32x32xbf16>
    %cst_68 = arith.constant dense<0.000000e+00> : vector<64x32xf32>
    %77 = tpu.matmul %52, %76, %cst_68 {dimension_numbers = #tpu.dot_dimension_numbers<[1], [0], [0], [1], [0, 0, 1, 1], [], []>} : vector<64x32xbf16>, vector<32x32xbf16>, vector<64x32xf32> -> vector<64x32xf32>
    %78 = arith.addf %75, %77 : vector<64x32xf32>
    %c96 = arith.constant 96 : index
    %c0_69 = arith.constant 0 : index
    %79 = vector.load %arg3[%c96, %c0_69] : memref<288x32xbf16, #tpu.memory_space<vmem>>, vector<32x32xbf16>
    %cst_70 = arith.constant dense<0.000000e+00> : vector<64x32xf32>
    %80 = tpu.matmul %55, %79, %cst_70 {dimension_numbers = #tpu.dot_dimension_numbers<[1], [0], [0], [1], [0, 0, 1, 1], [], []>} : vector<64x32xbf16>, vector<32x32xbf16>, vector<64x32xf32> -> vector<64x32xf32>
    %81 = arith.addf %78, %80 : vector<64x32xf32>
    %c128 = arith.constant 128 : index
    %c0_71 = arith.constant 0 : index
    %82 = vector.load %arg3[%c128, %c0_71] : memref<288x32xbf16, #tpu.memory_space<vmem>>, vector<32x32xbf16>
    %cst_72 = arith.constant dense<0.000000e+00> : vector<64x32xf32>
    %83 = tpu.matmul %58, %82, %cst_72 {dimension_numbers = #tpu.dot_dimension_numbers<[1], [0], [0], [1], [0, 0, 1, 1], [], []>} : vector<64x32xbf16>, vector<32x32xbf16>, vector<64x32xf32> -> vector<64x32xf32>
    %84 = arith.addf %81, %83 : vector<64x32xf32>
    %c160 = arith.constant 160 : index
    %c0_73 = arith.constant 0 : index
    %85 = vector.load %arg3[%c160, %c0_73] : memref<288x32xbf16, #tpu.memory_space<vmem>>, vector<32x32xbf16>
    %cst_74 = arith.constant dense<0.000000e+00> : vector<64x32xf32>
    %86 = tpu.matmul %61, %85, %cst_74 {dimension_numbers = #tpu.dot_dimension_numbers<[1], [0], [0], [1], [0, 0, 1, 1], [], []>} : vector<64x32xbf16>, vector<32x32xbf16>, vector<64x32xf32> -> vector<64x32xf32>
    %87 = arith.addf %84, %86 : vector<64x32xf32>
    %c192 = arith.constant 192 : index
    %c0_75 = arith.constant 0 : index
    %88 = vector.load %arg3[%c192, %c0_75] : memref<288x32xbf16, #tpu.memory_space<vmem>>, vector<32x32xbf16>
    %cst_76 = arith.constant dense<0.000000e+00> : vector<64x32xf32>
    %89 = tpu.matmul %64, %88, %cst_76 {dimension_numbers = #tpu.dot_dimension_numbers<[1], [0], [0], [1], [0, 0, 1, 1], [], []>} : vector<64x32xbf16>, vector<32x32xbf16>, vector<64x32xf32> -> vector<64x32xf32>
    %90 = arith.addf %87, %89 : vector<64x32xf32>
    %c224 = arith.constant 224 : index
    %c0_77 = arith.constant 0 : index
    %91 = vector.load %arg3[%c224, %c0_77] : memref<288x32xbf16, #tpu.memory_space<vmem>>, vector<32x32xbf16>
    %cst_78 = arith.constant dense<0.000000e+00> : vector<64x32xf32>
    %92 = tpu.matmul %67, %91, %cst_78 {dimension_numbers = #tpu.dot_dimension_numbers<[1], [0], [0], [1], [0, 0, 1, 1], [], []>} : vector<64x32xbf16>, vector<32x32xbf16>, vector<64x32xf32> -> vector<64x32xf32>
    %93 = arith.addf %90, %92 : vector<64x32xf32>
    %c256 = arith.constant 256 : index
    %c0_79 = arith.constant 0 : index
    %94 = vector.load %arg3[%c256, %c0_79] : memref<288x32xbf16, #tpu.memory_space<vmem>>, vector<32x32xbf16>
    %cst_80 = arith.constant dense<0.000000e+00> : vector<64x32xf32>
    %95 = tpu.matmul %70, %94, %cst_80 {dimension_numbers = #tpu.dot_dimension_numbers<[1], [0], [0], [1], [0, 0, 1, 1], [], []>} : vector<64x32xbf16>, vector<32x32xbf16>, vector<64x32xf32> -> vector<64x32xf32>
    %96 = arith.addf %93, %95 : vector<64x32xf32>
    %c0_81 = arith.constant 0 : index
    %c0_82 = arith.constant 0 : index
    %97 = vector.load %arg8[%c0_81, %c0_82] : memref<32x32xf32, #tpu.memory_space<vmem>>, vector<32x32xf32>
    %c0_83 = arith.constant 0 : index
    %c0_84 = arith.constant 0 : index
    %98 = vector.load %arg9[%c0_83, %c0_84] : memref<32x32xf32, #tpu.memory_space<vmem>>, vector<32x32xf32>
    %cst_85 = arith.constant dense<0.000000e+00> : vector<32xf32>
    %99 = vector.multi_reduction <add>, %96, %cst_85 [0] : vector<64x32xf32> to vector<32xf32>
    %100 = vector.shape_cast %99 : vector<32xf32> to vector<1x32xf32>
    %101 = arith.mulf %96, %96 : vector<64x32xf32>
    %cst_86 = arith.constant dense<0.000000e+00> : vector<32xf32>
    %102 = vector.multi_reduction <add>, %101, %cst_86 [0] : vector<64x32xf32> to vector<32xf32>
    %103 = vector.shape_cast %102 : vector<32xf32> to vector<1x32xf32>
    %104 = tpu.concatenate %100, %103 in 0 : vector<1x32xf32>, vector<1x32xf32> -> vector<2x32xf32>
    %cst_87 = arith.constant dense<0.000000e+00> : vector<2x32xf32>
    %105 = tpu.matmul %104, %97, %cst_87 {dimension_numbers = #tpu.dot_dimension_numbers<[1], [0], [0], [1], [0, 0, 1, 1], [], []>} : vector<2x32xf32>, vector<32x32xf32>, vector<2x32xf32> -> vector<2x32xf32>
    %cst_88 = arith.constant 1.562500e-02 : f32
    %106 = vector.broadcast %cst_88 : f32 to vector<2x32xf32>
    %107 = arith.mulf %105, %106 : vector<2x32xf32>
    %108 = vector.extract_strided_slice %107 {offsets = [0, 0], sizes = [1, 32], strides = [1, 1]} : vector<2x32xf32> to vector<1x32xf32>
    %109 = vector.extract_strided_slice %107 {offsets = [1, 0], sizes = [1, 32], strides = [1, 1]} : vector<2x32xf32> to vector<1x32xf32>
    %110 = arith.mulf %108, %108 : vector<1x32xf32>
    %111 = arith.subf %109, %110 : vector<1x32xf32>
    %cst_89 = arith.constant 0.000000e+00 : f32
    %112 = vector.broadcast %cst_89 : f32 to vector<1x32xf32>
    %113 = arith.maximumf %111, %112 : vector<1x32xf32>
    %114 = tpu.concatenate %108, %113 in 0 : vector<1x32xf32>, vector<1x32xf32> -> vector<2x32xf32>
    %cst_90 = arith.constant dense<0.000000e+00> : vector<2x32xf32>
    %115 = tpu.matmul %114, %98, %cst_90 {dimension_numbers = #tpu.dot_dimension_numbers<[1], [0], [0], [1], [0, 0, 1, 1], [], []>} : vector<2x32xf32>, vector<32x32xf32>, vector<2x32xf32> -> vector<2x32xf32>
    %116 = vector.extract_strided_slice %115 {offsets = [0, 0], sizes = [1, 32], strides = [1, 1]} : vector<2x32xf32> to vector<1x32xf32>
    %117 = vector.extract_strided_slice %115 {offsets = [1, 0], sizes = [1, 32], strides = [1, 1]} : vector<2x32xf32> to vector<1x32xf32>
    %c0_91 = arith.constant 0 : index
    %c0_92 = arith.constant 0 : index
    %118 = vector.load %arg6[%c0_91, %c0_92] : memref<2x32xf32, #tpu.memory_space<vmem>>, vector<1x32xf32>
    %cst_93 = arith.constant 9.99999997E-7 : f32
    %119 = vector.broadcast %cst_93 : f32 to vector<1x32xf32>
    %120 = arith.addf %117, %119 : vector<1x32xf32>
    %121 = math.rsqrt %120 : vector<1x32xf32>
    %122 = arith.mulf %118, %121 : vector<1x32xf32>
    %c1_94 = arith.constant 1 : index
    %c0_95 = arith.constant 0 : index
    %123 = vector.load %arg6[%c1_94, %c0_95] : memref<2x32xf32, #tpu.memory_space<vmem>>, vector<1x32xf32>
    %124 = arith.mulf %116, %122 : vector<1x32xf32>
    %125 = arith.subf %123, %124 : vector<1x32xf32>
    %126 = vector.broadcast %122 : vector<1x32xf32> to vector<64x32xf32>
    %127 = arith.mulf %96, %126 : vector<64x32xf32>
    %128 = vector.broadcast %125 : vector<1x32xf32> to vector<64x32xf32>
    %129 = arith.addf %127, %128 : vector<64x32xf32>
    %cst_96 = arith.constant 0.000000e+00 : f32
    %130 = vector.broadcast %cst_96 : f32 to vector<64x32xf32>
    %131 = arith.maximumf %129, %130 : vector<64x32xf32>
    %132 = arith.truncf %131 : vector<64x32xf32> to vector<64x32xbf16>
    %c0_97 = arith.constant 0 : index
    %c0_98 = arith.constant 0 : index
    %133 = vector.load %arg4[%c0_97, %c0_98] : memref<32x128xbf16, #tpu.memory_space<vmem>>, vector<32x128xbf16>
    %cst_99 = arith.constant dense<0.000000e+00> : vector<64x128xf32>
    %134 = tpu.matmul %132, %133, %cst_99 {dimension_numbers = #tpu.dot_dimension_numbers<[1], [0], [0], [1], [0, 0, 1, 1], [], []>} : vector<64x32xbf16>, vector<32x128xbf16>, vector<64x128xf32> -> vector<64x128xf32>
    %c0_100 = arith.constant 0 : index
    %c0_101 = arith.constant 0 : index
    %135 = vector.load %arg10[%c0_100, %c0_101] : memref<128x32xf32, #tpu.memory_space<vmem>>, vector<128x32xf32>
    %c0_102 = arith.constant 0 : index
    %c0_103 = arith.constant 0 : index
    %136 = vector.load %arg11[%c0_102, %c0_103] : memref<32x128xf32, #tpu.memory_space<vmem>>, vector<32x128xf32>
    %cst_104 = arith.constant dense<0.000000e+00> : vector<128xf32>
    %137 = vector.multi_reduction <add>, %134, %cst_104 [0] : vector<64x128xf32> to vector<128xf32>
    %138 = vector.shape_cast %137 : vector<128xf32> to vector<1x128xf32>
    %139 = arith.mulf %134, %134 : vector<64x128xf32>
    %cst_105 = arith.constant dense<0.000000e+00> : vector<128xf32>
    %140 = vector.multi_reduction <add>, %139, %cst_105 [0] : vector<64x128xf32> to vector<128xf32>
    %141 = vector.shape_cast %140 : vector<128xf32> to vector<1x128xf32>
    %142 = tpu.concatenate %138, %141 in 0 : vector<1x128xf32>, vector<1x128xf32> -> vector<2x128xf32>
    %cst_106 = arith.constant dense<0.000000e+00> : vector<2x32xf32>
    %143 = tpu.matmul %142, %135, %cst_106 {dimension_numbers = #tpu.dot_dimension_numbers<[1], [0], [0], [1], [0, 0, 1, 1], [], []>} : vector<2x128xf32>, vector<128x32xf32>, vector<2x32xf32> -> vector<2x32xf32>
    %cst_107 = arith.constant 3.906250e-03 : f32
    %144 = vector.broadcast %cst_107 : f32 to vector<2x32xf32>
    %145 = arith.mulf %143, %144 : vector<2x32xf32>
    %146 = vector.extract_strided_slice %145 {offsets = [0, 0], sizes = [1, 32], strides = [1, 1]} : vector<2x32xf32> to vector<1x32xf32>
    %147 = vector.extract_strided_slice %145 {offsets = [1, 0], sizes = [1, 32], strides = [1, 1]} : vector<2x32xf32> to vector<1x32xf32>
    %148 = arith.mulf %146, %146 : vector<1x32xf32>
    %149 = arith.subf %147, %148 : vector<1x32xf32>
    %cst_108 = arith.constant 0.000000e+00 : f32
    %150 = vector.broadcast %cst_108 : f32 to vector<1x32xf32>
    %151 = arith.maximumf %149, %150 : vector<1x32xf32>
    %152 = tpu.concatenate %146, %151 in 0 : vector<1x32xf32>, vector<1x32xf32> -> vector<2x32xf32>
    %cst_109 = arith.constant dense<0.000000e+00> : vector<2x128xf32>
    %153 = tpu.matmul %152, %136, %cst_109 {dimension_numbers = #tpu.dot_dimension_numbers<[1], [0], [0], [1], [0, 0, 1, 1], [], []>} : vector<2x32xf32>, vector<32x128xf32>, vector<2x128xf32> -> vector<2x128xf32>
    %154 = vector.extract_strided_slice %153 {offsets = [0, 0], sizes = [1, 128], strides = [1, 1]} : vector<2x128xf32> to vector<1x128xf32>
    %155 = vector.extract_strided_slice %153 {offsets = [1, 0], sizes = [1, 128], strides = [1, 1]} : vector<2x128xf32> to vector<1x128xf32>
    %c0_110 = arith.constant 0 : index
    %c0_111 = arith.constant 0 : index
    %156 = vector.load %arg7[%c0_110, %c0_111] : memref<2x128xf32, #tpu.memory_space<vmem>>, vector<1x128xf32>
    %cst_112 = arith.constant 9.99999997E-7 : f32
    %157 = vector.broadcast %cst_112 : f32 to vector<1x128xf32>
    %158 = arith.addf %155, %157 : vector<1x128xf32>
    %159 = math.rsqrt %158 : vector<1x128xf32>
    %160 = arith.mulf %156, %159 : vector<1x128xf32>
    %c1_113 = arith.constant 1 : index
    %c0_114 = arith.constant 0 : index
    %161 = vector.load %arg7[%c1_113, %c0_114] : memref<2x128xf32, #tpu.memory_space<vmem>>, vector<1x128xf32>
    %162 = arith.mulf %154, %160 : vector<1x128xf32>
    %163 = arith.subf %161, %162 : vector<1x128xf32>
    %164 = vector.broadcast %160 : vector<1x128xf32> to vector<64x128xf32>
    %165 = arith.mulf %134, %164 : vector<64x128xf32>
    %166 = vector.broadcast %163 : vector<1x128xf32> to vector<64x128xf32>
    %167 = arith.addf %165, %166 : vector<64x128xf32>
    %168 = vector.extract_strided_slice %3 {offsets = [0, 0], sizes = [64, 64], strides = [1, 1]} : vector<256x64xbf16> to vector<64x64xbf16>
    %c0_115 = arith.constant 0 : index
    %c0_116 = arith.constant 0 : index
    %169 = vector.load %arg12[%c0_115, %c0_116] : memref<64x128xbf16, #tpu.memory_space<vmem>>, vector<64x128xbf16>
    %cst_117 = arith.constant dense<0.000000e+00> : vector<64x128xf32>
    %170 = tpu.matmul %168, %169, %cst_117 {dimension_numbers = #tpu.dot_dimension_numbers<[1], [0], [0], [1], [0, 0, 1, 1], [], []>} : vector<64x64xbf16>, vector<64x128xbf16>, vector<64x128xf32> -> vector<64x128xf32>
    %cst_118 = arith.constant dense<0.000000e+00> : vector<128xf32>
    %171 = vector.multi_reduction <add>, %170, %cst_118 [0] : vector<64x128xf32> to vector<128xf32>
    %172 = vector.shape_cast %171 : vector<128xf32> to vector<1x128xf32>
    %173 = arith.mulf %170, %170 : vector<64x128xf32>
    %cst_119 = arith.constant dense<0.000000e+00> : vector<128xf32>
    %174 = vector.multi_reduction <add>, %173, %cst_119 [0] : vector<64x128xf32> to vector<128xf32>
    %175 = vector.shape_cast %174 : vector<128xf32> to vector<1x128xf32>
    %176 = tpu.concatenate %172, %175 in 0 : vector<1x128xf32>, vector<1x128xf32> -> vector<2x128xf32>
    %cst_120 = arith.constant 1.562500e-02 : f32
    %177 = vector.broadcast %cst_120 : f32 to vector<2x128xf32>
    %178 = arith.mulf %176, %177 : vector<2x128xf32>
    %179 = vector.extract_strided_slice %178 {offsets = [0, 0], sizes = [1, 128], strides = [1, 1]} : vector<2x128xf32> to vector<1x128xf32>
    %180 = vector.extract_strided_slice %178 {offsets = [1, 0], sizes = [1, 128], strides = [1, 1]} : vector<2x128xf32> to vector<1x128xf32>
    %181 = arith.mulf %179, %179 : vector<1x128xf32>
    %182 = arith.subf %180, %181 : vector<1x128xf32>
    %cst_121 = arith.constant 0.000000e+00 : f32
    %183 = vector.broadcast %cst_121 : f32 to vector<1x128xf32>
    %184 = arith.maximumf %182, %183 : vector<1x128xf32>
    %c0_122 = arith.constant 0 : index
    %c0_123 = arith.constant 0 : index
    %185 = vector.load %arg13[%c0_122, %c0_123] : memref<2x128xf32, #tpu.memory_space<vmem>>, vector<1x128xf32>
    %cst_124 = arith.constant 9.99999974E-6 : f32
    %186 = vector.broadcast %cst_124 : f32 to vector<1x128xf32>
    %187 = arith.addf %184, %186 : vector<1x128xf32>
    %188 = math.rsqrt %187 : vector<1x128xf32>
    %189 = arith.mulf %185, %188 : vector<1x128xf32>
    %c1_125 = arith.constant 1 : index
    %c0_126 = arith.constant 0 : index
    %190 = vector.load %arg13[%c1_125, %c0_126] : memref<2x128xf32, #tpu.memory_space<vmem>>, vector<1x128xf32>
    %191 = arith.mulf %179, %189 : vector<1x128xf32>
    %192 = arith.subf %190, %191 : vector<1x128xf32>
    %193 = vector.broadcast %189 : vector<1x128xf32> to vector<64x128xf32>
    %194 = arith.mulf %170, %193 : vector<64x128xf32>
    %195 = vector.broadcast %192 : vector<1x128xf32> to vector<64x128xf32>
    %196 = arith.addf %194, %195 : vector<64x128xf32>
    %197 = arith.addf %167, %196 : vector<64x128xf32>
    %cst_127 = arith.constant 0.000000e+00 : f32
    %198 = vector.broadcast %cst_127 : f32 to vector<64x128xf32>
    %199 = arith.maximumf %197, %198 : vector<64x128xf32>
    %200 = arith.truncf %199 : vector<64x128xf32> to vector<64x128xbf16>
    %c0_128 = arith.constant 0 : index
    %c0_129 = arith.constant 0 : index
    %c0_130 = arith.constant 0 : index
    %201 = vector.load %arg14[%c0_128, %c0_129, %c0_130] : memref<1x64x128xbf16, #tpu.memory_space<vmem>>, vector<1x64x128xbf16>
    %202 = vector.shape_cast %201 : vector<1x64x128xbf16> to vector<64x128xbf16>
    %203 = vector.shape_cast %200 : vector<64x128xbf16> to vector<1x64x128xbf16>
    tpu.vector_store %arg14[%c0_128, %c0_129, %c0_130], %203 {strides = array<i32>} : memref<1x64x128xbf16, #tpu.memory_space<vmem>>, vector<1x64x128xbf16>,
    return
  }
  func.func @transform_0(%arg0: i32) -> (i32, i32, i32) {
    %c0_i32 = arith.constant 0 : i32
    %c0_i32_0 = arith.constant 0 : i32
    %c0_i32_1 = arith.constant 0 : i32
    return %arg0, %c0_i32, %c0_i32_0 : i32, i32, i32
  }
  func.func @transform_1(%arg0: i32) -> (i32, i32) {
    %c0_i32 = arith.constant 0 : i32
    %c0_i32_0 = arith.constant 0 : i32
    %c0_i32_1 = arith.constant 0 : i32
    return %c0_i32, %c0_i32_0 : i32, i32
  }
  func.func @transform_2(%arg0: i32) -> (i32, i32) {
    %c0_i32 = arith.constant 0 : i32
    %c0_i32_0 = arith.constant 0 : i32
    %c0_i32_1 = arith.constant 0 : i32
    return %c0_i32, %c0_i32_0 : i32, i32
  }
  func.func @transform_3(%arg0: i32) -> (i32, i32) {
    %c0_i32 = arith.constant 0 : i32
    %c0_i32_0 = arith.constant 0 : i32
    %c0_i32_1 = arith.constant 0 : i32
    return %c0_i32, %c0_i32_0 : i32, i32
  }
  func.func @transform_4(%arg0: i32) -> (i32, i32) {
    %c0_i32 = arith.constant 0 : i32
    %c0_i32_0 = arith.constant 0 : i32
    %c0_i32_1 = arith.constant 0 : i32
    return %c0_i32, %c0_i32_0 : i32, i32
  }
  func.func @transform_5(%arg0: i32) -> (i32, i32) {
    %c0_i32 = arith.constant 0 : i32
    %c0_i32_0 = arith.constant 0 : i32
    %c0_i32_1 = arith.constant 0 : i32
    return %c0_i32, %c0_i32_0 : i32, i32
  }
  func.func @transform_6(%arg0: i32) -> (i32, i32) {
    %c0_i32 = arith.constant 0 : i32
    %c0_i32_0 = arith.constant 0 : i32
    %c0_i32_1 = arith.constant 0 : i32
    return %c0_i32, %c0_i32_0 : i32, i32
  }
  func.func @transform_7(%arg0: i32) -> (i32, i32) {
    %c0_i32 = arith.constant 0 : i32
    %c0_i32_0 = arith.constant 0 : i32
    %c0_i32_1 = arith.constant 0 : i32
    return %c0_i32, %c0_i32_0 : i32, i32
  }
  func.func @transform_8(%arg0: i32) -> (i32, i32) {
    %c0_i32 = arith.constant 0 : i32
    %c0_i32_0 = arith.constant 0 : i32
    %c0_i32_1 = arith.constant 0 : i32
    return %c0_i32, %c0_i32_0 : i32, i32
  }
  func.func @transform_9(%arg0: i32) -> (i32, i32) {
    %c0_i32 = arith.constant 0 : i32
    %c0_i32_0 = arith.constant 0 : i32
    %c0_i32_1 = arith.constant 0 : i32
    return %c0_i32, %c0_i32_0 : i32, i32
  }
  func.func @transform_10(%arg0: i32) -> (i32, i32) {
    %c0_i32 = arith.constant 0 : i32
    %c0_i32_0 = arith.constant 0 : i32
    %c0_i32_1 = arith.constant 0 : i32
    return %c0_i32, %c0_i32_0 : i32, i32
  }
  func.func @transform_11(%arg0: i32) -> (i32, i32) {
    %c0_i32 = arith.constant 0 : i32
    %c0_i32_0 = arith.constant 0 : i32
    %c0_i32_1 = arith.constant 0 : i32
    return %c0_i32, %c0_i32_0 : i32, i32
  }
  func.func @transform_12(%arg0: i32) -> (i32, i32) {
    %c0_i32 = arith.constant 0 : i32
    %c0_i32_0 = arith.constant 0 : i32
    %c0_i32_1 = arith.constant 0 : i32
    return %c0_i32, %c0_i32_0 : i32, i32
  }
  func.func @transform_13(%arg0: i32) -> (i32, i32, i32) {
    %c0_i32 = arith.constant 0 : i32
    %c0_i32_0 = arith.constant 0 : i32
    %c0_i32_1 = arith.constant 0 : i32
    return %arg0, %c0_i32, %c0_i32_0 : i32, i32, i32
  }
}

</mosaic_0001>

<bundles_post_ra>
// kernel: preact_bottleneck.1
= control target key start
LH: loop header
LB: loop body
LE: loop exit
PB: predicated region body
PF: predicated region fallthrough
CT: control target
= control target key end

     0   :  { %s5557_s25 = smov 0   ;;  %s7422_s0 = inlined_call_operand.vmem [shape: bf16[2,256,64], index: 0, kind: input, shape index: {}]   ;;  %s7423_s1 = inlined_call_operand.vmem [shape: bf16[64,32], index: 1, kind: input, shape index: {}]   ;;  %s7424_s2 = inlined_call_operand.vmem [shape: bf16[288,32], index: 2, kind: input, shape index: {}]   ;;  %s7425_s3 = inlined_call_operand.vmem [shape: bf16[32,128], index: 3, kind: input, shape index: {}]   ;;  %s7426_s4 = inlined_call_operand.vmem [shape: f32[2,32], index: 4, kind: input, shape index: {}]   ;;  %s7427_s5 = inlined_call_operand.vmem [shape: f32[2,32], index: 5, kind: input, shape index: {}]   ;;  %s7428_s6 = inlined_call_operand.vmem [shape: f32[2,128], index: 6, kind: input, shape index: {}]   ;;  %s7429_s7 = inlined_call_operand.vmem [shape: f32[32,32], index: 7, kind: input, shape index: {}, may-alias: {7,8}]   ;;  %s7430_s8 = inlined_call_operand.vmem [shape: f32[32,32], index: 8, kind: input, shape index: {}, may-alias: {7,8}]   ;;  %s7431_s9 = inlined_call_operand.vmem [shape: f32[128,32], index: 9, kind: input, shape index: {}]   ;;  %s7432_s10 = inlined_call_operand.vmem [shape: f32[32,128], index: 10, kind: input, shape index: {}]   ;;  %s7433_s11 = inlined_call_operand.vmem [shape: bf16[64,128], index: 11, kind: input, shape index: {}]   ;;  %s7434_s12 = inlined_call_operand.vmem [shape: f32[2,128], index: 12, kind: input, shape index: {}]   ;;  %s7435_s13 = inlined_call_operand.vmem [shape: bf16[2,64,128], index: 13, kind: output, shape index: {}]  }
   0x1 LB: > { %s4619_s26 = sadd.s32 4294967295, %s5481_s25   ;;  %p4623_p0 = scmp.ge.s32.totalorder %s5481_s25, 1  ;;  %s5481_s25 = sphi %s5557_s25, %s23_s25  }
   0x2   : > { %p387_p1 = scmp.lt.s32.totalorder %s5481_s25, 3 }
   0x4   : > { %p388_p2 = pnand %p4623_p0, %p387_p1 }
   0x6   : > { %391 = sbr.rel (%p388_p2) target bundleno = 2518 (0x9d6), region = 72 }
   0xd   : > { %v5406_v0 = vld [vmem:[%s7423_s1] sm:$0xff]   ;;  %p431_p3 = scmp.lt.s32.totalorder %s4619_s26, 1  ;;  %v5571_v1 = vld [vmem:[%s7423_s1 + $0x8] sm:$0xff]   ;;  %vm668_vm0 = vcmask 523264   ;;  %vm442_vm1 = vcmask 257024   ;;  %v5579_v2 = vld [vmem:[%s7423_s1 + $0x10] sm:$0xff]  }
   0xe   : > { %5010 = vmatprep.subr.bf16.mxu0 %v5406_v0  ;;  %vm444_vm2 = vcmask 253952   ;;  %v5483_v3 = vmov 0   ;;  %v5409_v5 = vld [vmem:[%s7423_s1 + $0x18] sm:$0xff]   ;;  %v878_v21 = vld [vmem:[%s7429_s7] sm:$0xff]  ;;  %v7438_v22 = vmov 0.0|0.0   ;;  %v879_v23 = vld [vmem:[%s7429_s7 + $0x8] sm:$0xff] }
   0xf   : > { %s7562_s26 = smov (!%p431_p3, %s4619_s26), 1  ;;  %5011 = vmatpush3.bf16.msra.mxu0 %v5406_v0  ;;  %450 = vst.msk [vmem:[#allocation2 + $0x18] sm:$0xf] %vm442_vm1, %v5483_v3  ;;  %446 = vst.msk [vmem:[#allocation2 + $0x8] sm:$0xf] %vm442_vm1, %v5483_v3  ;;  %5276 = vmatprep.subr.bf16.mxu1 %v7438_v22  ;;  %v880_v24 = vld [vmem:[%s7429_s7 + $0x10] sm:$0xff]  ;;  %v5277_v26 = vpack.c.bf16 %v879_v23, %v878_v21 }
  0x10   : > { %5012 = vmatprep.subr.bf16.mxu0 %v5571_v1  ;;  %s4815_s16 = sshll.u32 %s7562_s26, 7  ;;  %451 = vst.msk [vmem:[#allocation2 + $0x1c] sm:$0x1] %vm444_vm2, %v5483_v3  ;;  %447 = vst.msk [vmem:[#allocation2 + $0xc] sm:$0x1] %vm444_vm2, %v5483_v3  ;;  %v881_v25 = vld [vmem:[%s7429_s7 + $0x18] sm:$0xff] }
  0x11   : > { %s5585_s19 = scalar_lea.vmem %s7422_s0, %s4815_s16  ;;  %448 = vst.msk [vmem:[#allocation2 + $0x10] sm:$0xf] %vm442_vm1, %v5483_v3  ;;  %452 = vst.msk [vmem:[#allocation2 + $0x20] sm:$0xf] %vm442_vm1, %v5483_v3  ;;  %vm5485_vm3 = vmmov 0   ;;  %v7436_v27 = vmov 0.0   ;;  %5278 = vmatpush3.bf16.msra.mxu1 %v5277_v26  ;;  %v5280_v28 = vpack.c.bf16 %v881_v25, %v880_v24 }
  0x12   : > { %449 = vst.msk [vmem:[#allocation2 + $0x14] sm:$0x1] %vm444_vm2, %v5483_v3  ;;  %453 = vst.msk [vmem:[#allocation2 + $0x24] sm:$0x1] %vm444_vm2, %v5483_v3  ;;  %v5410_v4 = vld [vmem:[%s5585_s19] sm:$0xff]   ;;  %v5411_v6 = vld [vmem:[%s5585_s19 + $0x8] sm:$0xff]   ;;  %5058 = vmatprep.mubr.msk.f32.mxu1 %vm5485_vm3, %v7436_v27  ;;  %5279 = vmatprep.subr.bf16.mxu1 %v7438_v22 }
  0x13   : > { %454 = vst.msk [vmem:[#allocation2 + $0x28] sm:$0xf] %vm442_vm1, %v5483_v3  ;;  %456 = vst.msk [vmem:[#allocation2 + $0x30] sm:$0xf] %vm442_vm1, %v5483_v3  ;;  %5013 = vmatpush3.bf16.msra.mxu0 %v5571_v1  ;;  %5018 = vmatprep.mubr.msk.bf16.mxu0 %vm668_vm0, %v5410_v4  ;;  %v5412_v7 = vld [vmem:[%s5585_s19 + $0x10] sm:$0xff]   ;;  %v5413_v8 = vld [vmem:[%s5585_s19 + $0x18] sm:$0xff]  }
  0x14   : > { %455 = vst.msk [vmem:[#allocation2 + $0x2c] sm:$0x1] %vm444_vm2, %v5483_v3  ;;  %457 = vst.msk [vmem:[#allocation2 + $0x34] sm:$0x1] %vm444_vm2, %v5483_v3  ;;  %5014 = vmatprep.subr.bf16.mxu0 %v5579_v2  ;;  %v5414_v9 = vld [vmem:[%s5585_s19 + $0x20] sm:$0xff]   ;;  %v5415_v10 = vld [vmem:[%s5585_s19 + $0x28] sm:$0xff]  }
  0x15   : > { %458 = vst.msk [vmem:[#allocation2 + $0x38] sm:$0xf] %vm442_vm1, %v5483_v3  ;;  %460 = vst.msk [vmem:[#allocation2 + $0x40] sm:$0xf] %vm442_vm1, %v5483_v3  ;;  %v5416_v11 = vld [vmem:[%s5585_s19 + $0x30] sm:$0xff]   ;;  %v5417_v12 = vld [vmem:[%s5585_s19 + $0x38] sm:$0xff]   ;;  %5281 = vmatpush3.bf16.msra.mxu1 %v5280_v28 }
  0x16   : > { %459 = vst.msk [vmem:[#allocation2 + $0x3c] sm:$0x1] %vm444_vm2, %v5483_v3  ;;  %461 = vst.msk [vmem:[#allocation2 + $0x44] sm:$0x1] %vm444_vm2, %v5483_v3  ;;  %v5418_v13 = vld [vmem:[%s5585_s19 + $0x40] sm:$0xff]   ;;  %v5419_v14 = vld [vmem:[%s5585_s19 + $0x48] sm:$0xff]   ;;  %5282 = vmatprep.subr.bf16.mxu1 %v7438_v22 }
  0x17   : > { %466 = vst.msk [vmem:[#allocation2 + $0x58] sm:$0xf] %vm442_vm1, %v5483_v3  ;;  %468 = vst.msk [vmem:[#allocation2 + $0x60] sm:$0xf] %vm442_vm1, %v5483_v3  ;;  %5015 = vmatpush3.bf16.msra.mxu0 %v5579_v2  ;;  %v5420_v15 = vld [vmem:[%s5585_s19 + $0x50] sm:$0xff]   ;;  %v5421_v16 = vld [vmem:[%s5585_s19 + $0x58] sm:$0xff]  }
  0x18   : > { %467 = vst.msk [vmem:[#allocation2 + $0x5c] sm:$0x1] %vm444_vm2, %v5483_v3  ;;  %469 = vst.msk [vmem:[#allocation2 + $0x64] sm:$0x1] %vm444_vm2, %v5483_v3  ;;  %5016 = vmatprep.subr.bf16.mxu0 %v5409_v5  ;;  %v5422_v17 = vld [vmem:[%s5585_s19 + $0x60] sm:$0xff]   ;;  %v5423_v18 = vld [vmem:[%s5585_s19 + $0x68] sm:$0xff]  }
  0x19   : > { %470 = vst.msk [vmem:[#allocation2 + $0x68] sm:$0xf] %vm442_vm1, %v5483_v3  ;;  %472 = vst.msk [vmem:[#allocation2 + $0x70] sm:$0xf] %vm442_vm1, %v5483_v3  ;;  %v5424_v19 = vld [vmem:[%s5585_s19 + $0x70] sm:$0xff]   ;;  %v5425_v20 = vld [vmem:[%s5585_s19 + $0x78] sm:$0xff]  }
  0x1a   : > { %471 = vst.msk [vmem:[#allocation2 + $0x6c] sm:$0x1] %vm444_vm2, %v5483_v3  ;;  %473 = vst.msk [vmem:[#allocation2 + $0x74] sm:$0x1] %vm444_vm2, %v5483_v3  ;;  %vm886_vm4 = vcmask 261120   ;;  %vm1057_vm5 = vcmask 1040384  }
  0x1b   : > { %474 = vst.msk [vmem:[#allocation2 + $0x78] sm:$0xf] %vm442_vm1, %v5483_v3  ;;  %476 = vst.msk [vmem:[#allocation2 + $0x80] sm:$0xf] %vm442_vm1, %v5483_v3  ;;  %5017 = vmatpush3.bf16.msra.mxu0 %v5409_v5  ;;  %vm1745_vm6 = vsmask.f32 7938 }
  0x1c   : > { %475 = vst.msk [vmem:[#allocation2 + $0x7c] sm:$0x1] %vm444_vm2, %v5483_v3  ;;  %477 = vst.msk [vmem:[#allocation2 + $0x84] sm:$0x1] %vm444_vm2, %v5483_v3  ;;  %5288 = vmatprep.subr.bf16.mxu0 %v7438_v22  ;;  %vm1751_vm7 = vsmask.f32 256 }
  0x1d   : > { %478 = vst.msk [vmem:[#allocation2 + $0x88] sm:$0xf] %vm442_vm1, %v5483_v3  ;;  %480 = vst.msk [vmem:[#allocation2 + $0x90] sm:$0xf] %vm442_vm1, %v5483_v3  ;;  %vm1968_vm10 = vsmask.f32 3328 }
  0x1e   : > { %479 = vst.msk [vmem:[#allocation2 + $0x8c] sm:$0x1] %vm444_vm2, %v5483_v3  ;;  %481 = vst.msk [vmem:[#allocation2 + $0x94] sm:$0x1] %vm444_vm2, %v5483_v3  ;;  %5019 = vmatmul.mubr.msk.bf16.vlgmr.msra.gmra.mrb[0].mxu0 %vm668_vm0, %v5411_v6  ;;  %vm1969_vm11 = vsmask.f32 7440 }
  0x1f   : > { %484 = vst.msk [vmem:[#allocation2 + $0xa0] sm:$0xf] %vm442_vm1, %v5483_v3  ;;  %486 = vst.msk [vmem:[#allocation2 + $0xa8] sm:$0xf] %vm442_vm1, %v5483_v3  ;;  %5022 = vmatprep.mubr.msk.bf16.mxu0 %vm668_vm0, %v5412_v7  ;;  %s4816_s18 = sshll.u32 %s7562_s26, 5 }
  0x20   : > { %485 = vst.msk [vmem:[#allocation2 + $0xa4] sm:$0x1] %vm444_vm2, %v5483_v3  ;;  %487 = vst.msk [vmem:[#allocation2 + $0xac] sm:$0x1] %vm444_vm2, %v5483_v3  ;;  %s440_s21 = scalar_lea.vmem %s7435_s13, %s4816_s18 }
  0x21   : > { %488 = vst.msk [vmem:[#allocation2 + $0xb0] sm:$0xf] %vm442_vm1, %v5483_v3  ;;  %490 = vst.msk [vmem:[#allocation2 + $0xb8] sm:$0xf] %vm442_vm1, %v5483_v3 }
  0x22   : > { %489 = vst.msk [vmem:[#allocation2 + $0xb4] sm:$0x1] %vm444_vm2, %v5483_v3  ;;  %491 = vst.msk [vmem:[#allocation2 + $0xbc] sm:$0x1] %vm444_vm2, %v5483_v3 }
  0x23   : > { %492 = vst.msk [vmem:[#allocation2 + $0xc0] sm:$0xf] %vm442_vm1, %v5483_v3  ;;  %494 = vst.msk [vmem:[#allocation2 + $0xc8] sm:$0xf] %vm442_vm1, %v5483_v3 }
  0x24   : > { %493 = vst.msk [vmem:[#allocation2 + $0xc4] sm:$0x1] %vm444_vm2, %v5483_v3  ;;  %495 = vst.msk [vmem:[#allocation2 + $0xcc] sm:$0x1] %vm444_vm2, %v5483_v3 }
  0x25   : > { %496 = vst.msk [vmem:[#allocation2 + $0xd0] sm:$0xf] %vm442_vm1, %v5483_v3  ;;  %498 = vst.msk [vmem:[#allocation2 + $0xd8] sm:$0xf] %vm442_vm1, %v5483_v3 }
  0x26   : > { %497 = vst.msk [vmem:[#allocation2 + $0xd4] sm:$0x1] %vm444_vm2, %v5483_v3  ;;  %499 = vst.msk [vmem:[#allocation2 + $0xdc] sm:$0x1] %vm444_vm2, %v5483_v3  ;;  %5023 = vmatmul.mubr.msk.bf16.gmra.mrb[4].mxu0 %vm668_vm0, %v5413_v8 }
  0x27   : > { %500 = vst.msk [vmem:[#allocation2 + $0xe0] sm:$0xf] %vm442_vm1, %v5483_v3  ;;  %504 = vst.msk [vmem:[#allocation2 + $0xf0] sm:$0xf] %vm442_vm1, %v5483_v3  ;;  %5026 = vmatprep.mubr.msk.bf16.mxu0 %vm668_vm0, %v5414_v9 }
  0x28   : > { %501 = vst.msk [vmem:[#allocation2 + $0xe4] sm:$0x1] %vm444_vm2, %v5483_v3  ;;  %505 = vst.msk [vmem:[#allocation2 + $0xf4] sm:$0x1] %vm444_vm2, %v5483_v3 }
  0x29   : > { %506 = vst.msk [vmem:[#allocation2 + $0xf8] sm:$0xf] %vm442_vm1, %v5483_v3  ;;  %508 = vst.msk [vmem:[#allocation2 + $0x100] sm:$0xf] %vm442_vm1, %v5483_v3 }
  0x2a   : > { %507 = vst.msk [vmem:[#allocation2 + $0xfc] sm:$0x1] %vm444_vm2, %v5483_v3  ;;  %509 = vst.msk [vmem:[#allocation2 + $0x104] sm:$0x1] %vm444_vm2, %v5483_v3 }
  0x2b   : > { %510 = vst.msk [vmem:[#allocation2 + $0x108] sm:$0xf] %vm442_vm1, %v5483_v3  ;;  %512 = vst.msk [vmem:[#allocation2 + $0x110] sm:$0xf] %vm442_vm1, %v5483_v3 }
  0x2c   : > { %511 = vst.msk [vmem:[#allocation2 + $0x10c] sm:$0x1] %vm444_vm2, %v5483_v3  ;;  %513 = vst.msk [vmem:[#allocation2 + $0x114] sm:$0x1] %vm444_vm2, %v5483_v3 }
  0x2d   : > { %514 = vst.msk [vmem:[#allocation2 + $0x118] sm:$0xf] %vm442_vm1, %v5483_v3  ;;  %516 = vst.msk [vmem:[#allocation2 + $0x120] sm:$0xf] %vm442_vm1, %v5483_v3 }
  0x2e   : > { %515 = vst.msk [vmem:[#allocation2 + $0x11c] sm:$0x1] %vm444_vm2, %v5483_v3  ;;  %517 = vst.msk [vmem:[#allocation2 + $0x124] sm:$0x1] %vm444_vm2, %v5483_v3  ;;  %5027 = vmatmul.mubr.msk.bf16.gmra.mrb[8].mxu0 %vm668_vm0, %v5415_v10 }
  0x2f   : > { %518 = vst.msk [vmem:[#allocation2 + $0x128] sm:$0xf] %vm442_vm1, %v5483_v3  ;;  %520 = vst.msk [vmem:[#allocation2 + $0x130] sm:$0xf] %vm442_vm1, %v5483_v3  ;;  %5030 = vmatprep.mubr.msk.bf16.mxu0 %vm668_vm0, %v5416_v11 }
  0x30   : > { %519 = vst.msk [vmem:[#allocation2 + $0x12c] sm:$0x1] %vm444_vm2, %v5483_v3  ;;  %521 = vst.msk [vmem:[#allocation2 + $0x134] sm:$0x1] %vm444_vm2, %v5483_v3 }
  0x31   : > { %vm6434_vm8 = vmand %vm442_vm1, %vm1745_vm6 }
  0x32   : > { %vm6446_vm9 = vmand %vm444_vm2, %vm1751_vm7 }
  0x33   : > { %vm6779_vm12 = vmor %vm1968_vm10, %vm1969_vm11 }
  0x36   : > { %5031 = vmatmul.mubr.msk.bf16.gmra.mrb[12].mxu0 %vm668_vm0, %v5417_v12 }
  0x37   : > { %5034 = vmatprep.mubr.msk.bf16.mxu0 %vm668_vm0, %v5418_v13 }
  0x3e   : > { %5035 = vmatmul.mubr.msk.bf16.gmra.mrb[16].mxu0 %vm668_vm0, %v5419_v14 }
  0x3f   : > { %5038 = vmatprep.mubr.msk.bf16.mxu0 %vm668_vm0, %v5420_v15 }
  0x46   : > { %5039 = vmatmul.mubr.msk.bf16.gmra.mrb[20].mxu0 %vm668_vm0, %v5421_v16 }
  0x47   : > { %5042 = vmatprep.mubr.msk.bf16.mxu0 %vm668_vm0, %v5422_v17 }
  0x4e   : > { %5043 = vmatmul.mubr.msk.bf16.gmra.mrb[24].mxu0 %vm668_vm0, %v5423_v18 }
  0x4f   : > { %5046 = vmatprep.mubr.msk.bf16.mxu0 %vm668_vm0, %v5424_v19 }
  0x56   : > { %5047 = vmatmul.mubr.msk.bf16.gmra.mrb[28].mxu0 %vm668_vm0, %v5425_v20 }
  0x57   : > { %5188 = vmatprep.mubr.msk.f32.mxu0 %vm5485_vm3, %v7436_v27 }
  0xf1   : > { %v5781_v29 = vpop.f32.mrb[0].mxu0 }
  0xf2   : > { %v5783_v30 = vpop.f32.mrb[1].mxu0  ;;  %v958_v34 = vmul.f32 %v5781_v29, %v5781_v29  ;;  %v890_v39 = vsel %vm886_vm4, %v5781_v29, 0.0 }
  0xf3   : > { %v956_v31 = vmul.f32 %v5783_v30, %v5783_v30  ;;  %v5787_v32 = vpop.f32.mrb[2].mxu0  ;;  %v887_v35 = vsel %vm886_vm4, %v5783_v30, 0.0 }
  0xf4   : > { %v5789_v33 = vpop.f32.mrb[3].mxu0  ;;  %v959_v41 = vmul.f32 %v5787_v32, %v5787_v32  ;;  %v991_v45 = vsel %vm886_vm4, %v958_v34, 0.0  ;;  %v892_v46 = vsel %vm886_vm4, %v5787_v32, 0.0 }
  0xf5   : > { %v888_v36 = vsel %vm886_vm4, %v5789_v33, 0.0  ;;  %v957_v37 = vmul.f32 %v5789_v33, %v5789_v33  ;;  %v988_v40 = vsel %vm886_vm4, %v956_v31, 0.0 }
  0xf6   : > { %v889_v38 = vadd.f32 %v888_v36, %v887_v35  ;;  %v993_v51 = vsel %vm886_vm4, %v959_v41, 0.0 }
  0xf7   : > { %v989_v42 = vsel %vm886_vm4, %v957_v37, 0.0 }
  0xf8   : > { %v891_v43 = vadd.f32 %v890_v39, %v889_v38  ;;  %v990_v44 = vadd.f32 %v989_v42, %v988_v40 }
  0xf9   : > { %v5808_v47 = vpop.f32.mrb[4].mxu0 }
  0xfa   : > { %v992_v48 = vadd.f32 %v991_v45, %v990_v44  ;;  %v5810_v49 = vpop.f32.mrb[5].mxu0  ;;  %v893_v50 = vadd.f32 %v892_v46, %v891_v43  ;;  %v962_v58 = vmul.f32 %v5808_v47, %v5808_v47  ;;  %v898_v0 = vsel %vm886_vm4, %v5808_v47, 0.0 }
  0xfb   : > { %v894_v52 = vsel %vm886_vm4, %v5810_v49, 0.0  ;;  %v960_v53 = vmul.f32 %v5810_v49, %v5810_v49  ;;  %v5817_v54 = vpop.f32.mrb[6].mxu0 }
  0xfc   : > { %v895_v55 = vadd.f32 %v894_v52, %v893_v50  ;;  %v994_v56 = vadd.f32 %v993_v51, %v992_v48  ;;  %v5819_v57 = vpop.f32.mrb[7].mxu0  ;;  %v963_v1 = vmul.f32 %v5817_v54, %v5817_v54  ;;  %v999_v5 = vsel %vm886_vm4, %v962_v58, 0.0 }
  0xfd   : > { %v995_v59 = vsel %vm886_vm4, %v960_v53, 0.0  ;;  %v896_v60 = vsel %vm886_vm4, %v5819_v57, 0.0  ;;  %v961_v61 = vmul.f32 %v5819_v57, %v5819_v57  ;;  %v900_v6 = vsel %vm886_vm4, %v5817_v54, 0.0 }
  0xfe   : > { %v996_v62 = vadd.f32 %v995_v59, %v994_v56  ;;  %v897_v63 = vadd.f32 %v896_v60, %v895_v55  ;;  %v1001_v11 = vsel %vm886_vm4, %v963_v1, 0.0 }
  0xff   : > { %v997_v2 = vsel %vm886_vm4, %v961_v61, 0.0 }
 0x100   : > { %v899_v3 = vadd.f32 %v898_v0, %v897_v63  ;;  %v998_v4 = vadd.f32 %v997_v2, %v996_v62 }
 0x101   : > { %v5836_v7 = vpop.f32.mrb[8].mxu0 }
 0x102   : > { %v1000_v8 = vadd.f32 %v999_v5, %v998_v4  ;;  %v5838_v9 = vpop.f32.mrb[9].mxu0  ;;  %v901_v10 = vadd.f32 %v900_v6, %v899_v3  ;;  %v966_v18 = vmul.f32 %v5836_v7, %v5836_v7  ;;  %v906_v25 = vsel %vm886_vm4, %v5836_v7, 0.0 }
 0x103   : > { %v902_v12 = vsel %vm886_vm4, %v5838_v9, 0.0  ;;  %v964_v13 = vmul.f32 %v5838_v9, %v5838_v9  ;;  %v5845_v14 = vpop.f32.mrb[10].mxu0 }
 0x104   : > { %v903_v15 = vadd.f32 %v902_v12, %v901_v10  ;;  %v1002_v16 = vadd.f32 %v1001_v11, %v1000_v8  ;;  %v5847_v17 = vpop.f32.mrb[11].mxu0  ;;  %v967_v26 = vmul.f32 %v5845_v14, %v5845_v14  ;;  %v1007_v35 = vsel %vm886_vm4, %v966_v18, 0.0 }
 0x105   : > { %v1003_v19 = vsel %vm886_vm4, %v964_v13, 0.0  ;;  %v904_v20 = vsel %vm886_vm4, %v5847_v17, 0.0  ;;  %v965_v21 = vmul.f32 %v5847_v17, %v5847_v17  ;;  %v908_v36 = vsel %vm886_vm4, %v5845_v14, 0.0 }
 0x106   : > { %v1004_v23 = vadd.f32 %v1003_v19, %v1002_v16  ;;  %v905_v24 = vadd.f32 %v904_v20, %v903_v15  ;;  %v1009_v41 = vsel %vm886_vm4, %v967_v26, 0.0 }
 0x107   : > { %v1005_v28 = vsel %vm886_vm4, %v965_v21, 0.0 }
 0x108   : > { %v907_v31 = vadd.f32 %v906_v25, %v905_v24  ;;  %v1006_v34 = vadd.f32 %v1005_v28, %v1004_v23 }
 0x109   : > { %v5864_v37 = vpop.f32.mrb[12].mxu0 }
 0x10a   : > { %v1008_v38 = vadd.f32 %v1007_v35, %v1006_v34  ;;  %v5866_v39 = vpop.f32.mrb[13].mxu0  ;;  %v909_v40 = vadd.f32 %v908_v36, %v907_v31  ;;  %v970_v50 = vmul.f32 %v5864_v37, %v5864_v37  ;;  %v914_v58 = vsel %vm886_vm4, %v5864_v37, 0.0 }
 0x10b   : > { %v910_v42 = vsel %vm886_vm4, %v5866_v39, 0.0  ;;  %v968_v43 = vmul.f32 %v5866_v39, %v5866_v39  ;;  %v5873_v44 = vpop.f32.mrb[14].mxu0 }
 0x10c   : > { %v911_v45 = vadd.f32 %v910_v42, %v909_v40  ;;  %v1010_v46 = vadd.f32 %v1009_v41, %v1008_v38  ;;  %v5875_v48 = vpop.f32.mrb[15].mxu0  ;;  %v971_v59 = vmul.f32 %v5873_v44, %v5873_v44  ;;  %v1015_v63 = vsel %vm886_vm4, %v970_v50, 0.0 }
 0x10d   : > { %v1011_v51 = vsel %vm886_vm4, %v968_v43, 0.0  ;;  %v912_v52 = vsel %vm886_vm4, %v5875_v48, 0.0  ;;  %v969_v53 = vmul.f32 %v5875_v48, %v5875_v48  ;;  %v916_v0 = vsel %vm886_vm4, %v5873_v44, 0.0 }
 0x10e   : > { %v1012_v55 = vadd.f32 %v1011_v51, %v1010_v46  ;;  %v913_v56 = vadd.f32 %v912_v52, %v911_v45  ;;  %v1017_v5 = vsel %vm886_vm4, %v971_v59, 0.0 }
 0x10f   : > { %v1013_v60 = vsel %vm886_vm4, %v969_v53, 0.0 }
 0x110   : > { %v915_v61 = vadd.f32 %v914_v58, %v913_v56  ;;  %v1014_v62 = vadd.f32 %v1013_v60, %v1012_v55 }
 0x111   : > { %v5892_v1 = vpop.f32.mrb[16].mxu0 }
 0x112   : > { %v1016_v2 = vadd.f32 %v1015_v63, %v1014_v62  ;;  %v5894_v3 = vpop.f32.mrb[17].mxu0  ;;  %v917_v4 = vadd.f32 %v916_v0, %v915_v61  ;;  %v974_v15 = vmul.f32 %v5892_v1, %v5892_v1  ;;  %v922_v23 = vsel %vm886_vm4, %v5892_v1, 0.0 }
 0x113   : > { %v918_v6 = vsel %vm886_vm4, %v5894_v3, 0.0  ;;  %v972_v8 = vmul.f32 %v5894_v3, %v5894_v3  ;;  %v5901_v10 = vpop.f32.mrb[18].mxu0 }
 0x114   : > { %v919_v11 = vadd.f32 %v918_v6, %v917_v4  ;;  %v1018_v12 = vadd.f32 %v1017_v5, %v1016_v2  ;;  %v5903_v13 = vpop.f32.mrb[19].mxu0  ;;  %v975_v24 = vmul.f32 %v5901_v10, %v5901_v10  ;;  %v1023_v31 = vsel %vm886_vm4, %v974_v15, 0.0 }
 0x115   : > { %v1019_v16 = vsel %vm886_vm4, %v972_v8, 0.0  ;;  %v920_v18 = vsel %vm886_vm4, %v5903_v13, 0.0  ;;  %v973_v19 = vmul.f32 %v5903_v13, %v5903_v13  ;;  %v924_v34 = vsel %vm886_vm4, %v5901_v10, 0.0 }
 0x116   : > { %v1020_v20 = vadd.f32 %v1019_v16, %v1018_v12  ;;  %v921_v21 = vadd.f32 %v920_v18, %v919_v11  ;;  %v1025_v41 = vsel %vm886_vm4, %v975_v24, 0.0 }
 0x117   : > { %v1021_v25 = vsel %vm886_vm4, %v973_v19, 0.0 }
 0x118   : > { %v923_v26 = vadd.f32 %v922_v23, %v921_v21  ;;  %v1022_v28 = vadd.f32 %v1021_v25, %v1020_v20 }
 0x119   : > { %v5920_v35 = vpop.f32.mrb[20].mxu0 }
 0x11a   : > { %v1024_v36 = vadd.f32 %v1023_v31, %v1022_v28  ;;  %v5922_v38 = vpop.f32.mrb[21].mxu0  ;;  %v925_v40 = vadd.f32 %v924_v34, %v923_v26  ;;  %v978_v52 = vmul.f32 %v5920_v35, %v5920_v35  ;;  %v930_v60 = vsel %vm886_vm4, %v5920_v35, 0.0 }
 0x11b   : > { %v926_v42 = vsel %vm886_vm4, %v5922_v38, 0.0  ;;  %v976_v43 = vmul.f32 %v5922_v38, %v5922_v38  ;;  %v5929_v45 = vpop.f32.mrb[22].mxu0 }
 0x11c   : > { %v927_v46 = vadd.f32 %v926_v42, %v925_v40  ;;  %v1026_v50 = vadd.f32 %v1025_v41, %v1024_v36  ;;  %v5931_v51 = vpop.f32.mrb[23].mxu0  ;;  %v979_v61 = vmul.f32 %v5929_v45, %v5929_v45  ;;  %v1031_v2 = vsel %vm886_vm4, %v978_v52, 0.0 }
 0x11d   : > { %v1027_v53 = vsel %vm886_vm4, %v976_v43, 0.0  ;;  %v928_v55 = vsel %vm886_vm4, %v5931_v51, 0.0  ;;  %v977_v56 = vmul.f32 %v5931_v51, %v5931_v51  ;;  %v932_v4 = vsel %vm886_vm4, %v5929_v45, 0.0 }
 0x11e   : > { %v1028_v58 = vadd.f32 %v1027_v53, %v1026_v50  ;;  %v929_v59 = vadd.f32 %v928_v55, %v927_v46  ;;  %v1033_v12 = vsel %vm886_vm4, %v979_v61, 0.0 }
 0x11f   : > { %v1029_v62 = vsel %vm886_vm4, %v977_v56, 0.0 }
 0x120   : > { %v931_v63 = vadd.f32 %v930_v60, %v929_v59  ;;  %v1030_v0 = vadd.f32 %v1029_v62, %v1028_v58 }
 0x121   : > { %v5948_v5 = vpop.f32.mrb[24].mxu0 }
 0x122   : > { %v1032_v6 = vadd.f32 %v1031_v2, %v1030_v0  ;;  %v5950_v8 = vpop.f32.mrb[25].mxu0  ;;  %v933_v11 = vadd.f32 %v932_v4, %v931_v63  ;;  %v982_v23 = vmul.f32 %v5948_v5, %v5948_v5  ;;  %v938_v34 = vsel %vm886_vm4, %v5948_v5, 0.0 }
 0x123   : > { %v934_v15 = vsel %vm886_vm4, %v5950_v8, 0.0  ;;  %v980_v16 = vmul.f32 %v5950_v8, %v5950_v8  ;;  %v5957_v18 = vpop.f32.mrb[26].mxu0 }
 0x124   : > { %v935_v19 = vadd.f32 %v934_v15, %v933_v11  ;;  %v1034_v20 = vadd.f32 %v1033_v12, %v1032_v6  ;;  %v5959_v21 = vpop.f32.mrb[27].mxu0  ;;  %v983_v36 = vmul.f32 %v5957_v18, %v5957_v18  ;;  %v1039_v43 = vsel %vm886_vm4, %v982_v23, 0.0 }
 0x125   : > { %v1035_v24 = vsel %vm886_vm4, %v980_v16, 0.0  ;;  %v936_v25 = vsel %vm886_vm4, %v5959_v21, 0.0  ;;  %v981_v26 = vmul.f32 %v5959_v21, %v5959_v21  ;;  %v940_v46 = vsel %vm886_vm4, %v5957_v18, 0.0 }
 0x126   : > { %v1036_v28 = vadd.f32 %v1035_v24, %v1034_v20  ;;  %v937_v31 = vadd.f32 %v936_v25, %v935_v19  ;;  %v1041_v56 = vsel %vm886_vm4, %v983_v36, 0.0 }
 0x127   : > { %v1037_v40 = vsel %vm886_vm4, %v981_v26, 0.0 }
 0x128   : > { %v939_v41 = vadd.f32 %v938_v34, %v937_v31  ;;  %v1038_v42 = vadd.f32 %v1037_v40, %v1036_v28 }
 0x129   : > { %v5976_v50 = vpop.f32.mrb[28].mxu0 }
 0x12a   : > { %v1040_v52 = vadd.f32 %v1039_v43, %v1038_v42  ;;  %v5978_v53 = vpop.f32.mrb[29].mxu0  ;;  %v941_v55 = vadd.f32 %v940_v46, %v939_v41  ;;  %v986_v0 = vmul.f32 %v5976_v50, %v5976_v50  ;;  %v946_v15 = vsel %vm886_vm4, %v5976_v50, 0.0 }
 0x12b   : > { %v942_v58 = vsel %vm886_vm4, %v5978_v53, 0.0  ;;  %v984_v59 = vmul.f32 %v5978_v53, %v5978_v53  ;;  %v5985_v60 = vpop.f32.mrb[30].mxu0 }
 0x12c   : > { %v943_v61 = vadd.f32 %v942_v58, %v941_v55  ;;  %v1042_v62 = vadd.f32 %v1041_v56, %v1040_v52  ;;  %v5987_v63 = vpop.f32.mrb[31].mxu0  ;;  %v987_v16 = vmul.f32 %v5985_v60, %v5985_v60  ;;  %v1047_v24 = vsel %vm886_vm4, %v986_v0, 0.0  ;;  %v882_v0 = vld [vmem:[%s7430_s8] sm:$0xff] }
 0x12d   : > { %v1043_v2 = vsel %vm886_vm4, %v984_v59, 0.0  ;;  %v944_v4 = vsel %vm886_vm4, %v5987_v63, 0.0  ;;  %v985_v6 = vmul.f32 %v5987_v63, %v5987_v63  ;;  %v948_v25 = vsel %vm886_vm4, %v5985_v60, 0.0 }
 0x12e   : > { %v1044_v11 = vadd.f32 %v1043_v2, %v1042_v62  ;;  %v945_v12 = vadd.f32 %v944_v4, %v943_v61  ;;  %v1049_v31 = vsel %vm886_vm4, %v987_v16, 0.0  ;;  %v883_v2 = vld [vmem:[%s7430_s8 + $0x8] sm:$0xff] }
 0x12f   : > { %v1045_v19 = vsel %vm886_vm4, %v985_v6, 0.0  ;;  %v5283_v4 = vpack.c.bf16 %v883_v2, %v882_v0  ;;  %v884_v6 = vld [vmem:[%s7430_s8 + $0x10] sm:$0xff] }
 0x130   : > { %v947_v20 = vadd.f32 %v946_v15, %v945_v12  ;;  %v1046_v23 = vadd.f32 %v1045_v19, %v1044_v11  ;;  %v885_v11 = vld [vmem:[%s7430_s8 + $0x18] sm:$0xff] }
 0x131   : > { %v5286_v12 = vpack.c.bf16 %v885_v11, %v884_v6  ;;  %v1220_v6 = vld [vmem:[%s7426_s4 + $0x1] sm:$0x1] }
 0x132   : > { %v949_v26 = vadd.f32 %v948_v25, %v947_v20  ;;  %v1048_v28 = vadd.f32 %v1047_v24, %v1046_v23 }
 0x134   : > { %v950_v34 = vrot.slane %v949_v26, 4  ;;  %v1050_v36 = vadd.f32 %v1049_v31, %v1048_v28  ;;  %v5426_v28 = vld [vmem:[%s7424_s2 + $0x10] sm:$0xff]   ;;  %v5427_v31 = vld [vmem:[%s7424_s2 + $0x18] sm:$0xff]  }
 0x136   : > { %v951_v40 = vadd.f32 %v950_v34, %v949_v26  ;;  %v1051_v41 = vrot.slane %v1050_v36, 4  ;;  %v5428_v34 = vld [vmem:[%s7424_s2] sm:$0xff]  }
 0x138   : > { %v952_v42 = vrot.slane %v951_v40, 2  ;;  %v1052_v43 = vadd.f32 %v1051_v41, %v1050_v36 }
 0x13a   : > { %v953_v46 = vadd.f32 %v952_v42, %v951_v40  ;;  %v1053_v52 = vrot.slane %v1052_v43, 2  ;;  %v1223_v42 = vlaneseq }
 0x13c   : > { %v954_v55 = vrot.slane %v953_v46, 1  ;;  %v1054_v56 = vadd.f32 %v1053_v52, %v1052_v43  ;;  %v1952_v43 = vld [vmem:[#allocation2 + $0xa0] sm:$0xf] }
 0x13d   : > { %v1972_v52 = vshrl.u32 %v1952_v43, 16 }
 0x13e   : > { %v1055_v58 = vrot.slane %v1054_v56, 1  ;;  %v955_v59 = vadd.f32 %v954_v55, %v953_v46  ;;  %v1224_v46 = vshrl.u32 %v1223_v42, 7  ;;  %v1975_v55 = vshll.u32 %v1952_v43, 16 }
 0x140   : > { %v1056_v61 = vadd.f32 %v1055_v58, %v1054_v56  ;;  %v1213_v58 = vld [vmem:[%s7426_s4] sm:$0x1]  ;;  %v6040_v0 = vrot.slane %v1975_v55, 5 }
 0x142   : > { %v1058_v62 = vsel %vm1057_vm5, %v955_v59, %v1056_v61  ;;  %v6036_v61 = vsub.s32 0, %v1224_v46  ;;  %7460 = vst [vmem:[#allocation5_spill] sm:$0xff] %v6040_v0 }
 0x143   : > { %5059 = vmatmul.mubr.msk.f32.vlgmr.msra.gmra.mrb[0].mxu1 %vm886_vm4, %v1058_v62  ;;  %v6038_v62 = vrot.slane %v1972_v52, 4 }
 0x144   : > { %5069 = vmatprep.mubr.msk.f32.mxu1 %vm5485_vm3, %v7436_v27  ;;  %5284 = vmatpush3.bf16.msra.mxu1 %v5283_v4  ;;  %7458 = vst [vmem:[#allocation3_spill] sm:$0xff] %v6036_v61  ;;  %v6042_v4 = vld [vmem:[#allocation2 + $0xa4] sm:$0x1] }
 0x145   : > { %5285 = vmatprep.subr.bf16.mxu1 %v7438_v22  ;;  %7459 = vst [vmem:[#allocation4_spill] sm:$0xff] %v6038_v62  ;;  %7461 = vst [vmem:[#allocation6_spill] sm:$0xff] %v6042_v4 }
 0x148   : > { %5287 = vmatpush3.bf16.msra.mxu1 %v5286_v12 }
 0x149   : > { %5072 = vmatprep.subr.bf16.mxu1 %v5426_v28 }
 0x216   : > { %v1128_v15 = vpop.f32.mrb[0].mxu1 }
 0x217   : > { %v1132_v16 = vmul.f32 0.00390625, %v1128_v15  ;;  %v5060_v19 = vpop.f32.mrb[1].mxu1 }
 0x219   : > { %v1133_v20 = vmul.f32 %v1132_v16, %v1132_v16 }
 0x21b   : > { %v1135_v23 = vrot.slane %v1133_v20, 7 }
 0x21d   : > { %v1137_v24 = vsub.f32 %v1132_v16, %v1135_v23 }
 0x21f   : > { %v1138_v25 = vmax.f32 %v1137_v24, 0.0 }
 0x221   : > { %v1139_v26 = vsel %vm1057_vm5, %v1132_v16, %v1138_v25 }
 0x222   : > { %5070 = vmatmul.mubr.msk.f32.vlgmr.msra.gmra.mrb[2].mxu1 %vm886_vm4, %v1139_v26 }
 0x223   : > { %5073 = vmatpush3.bf16.msra.mxu1 %v5426_v28 }
 0x224   : > { %5074 = vmatprep.subr.bf16.mxu1 %v5427_v31 }
 0x227   : > { %5075 = vmatpush3.bf16.msra.mxu1 %v5427_v31 }
 0x228   : > { %5084 = vmatprep.subr.bf16.mxu1 %v5428_v34 }
 0x2f5   : > { %v1209_v36 = vpop.f32.mrb[2].mxu1 }
 0x2f6   : > { %v1214_v40 = vadd.f32 1e-06, %v1209_v36  ;;  %v5071_v41 = vpop.f32.mrb[3].mxu1 }
 0x2f8   : > { %5462 = vrsqrt.f32 %v1214_v40 }
 0x302   : > { %v5463_v56 = vpop.eup %5462 }
 0x303   : > { %v1217_v59 = vrot.slane %v5463_v56, 1 }
 0x305   : > { %v1219_v2 = vmul.f32 %v1217_v59, %v1213_v58 }
 0x307   : > { %v1221_v11 = vmul.f32 %v1219_v2, %v1209_v36  ;;  %v1226_v12 = vrot.slane %v1219_v2, %v6036_v61 }
 0x309   : > { %v1222_v19 = vsub.f32 %v1220_v6, %v1221_v11  ;;  %v1227_v20 = vmul.f32 %v1226_v12, %v5783_v30  ;;  %v1228_v23 = vmul.f32 %v1226_v12, %v5789_v33  ;;  %v1229_v24 = vmul.f32 %v5781_v29, %v1226_v12 }
 0x30a   : > { %v1230_v25 = vmul.f32 %v5787_v32, %v1226_v12  ;;  %v1231_v26 = vmul.f32 %v1226_v12, %v5810_v49  ;;  %v1232_v28 = vmul.f32 %v1226_v12, %v5819_v57  ;;  %v1233_v31 = vmul.f32 %v5808_v47, %v1226_v12 }
 0x30b   : > { %v1262_v34 = vrot.slane %v1222_v19, %v6036_v61  ;;  %v1234_v36 = vmul.f32 %v5817_v54, %v1226_v12  ;;  %v1235_v40 = vmul.f32 %v1226_v12, %v5838_v9  ;;  %v1236_v30 = vmul.f32 %v1226_v12, %v5847_v17 }
 0x30c   : > { %v1237_v33 = vmul.f32 %v5836_v7, %v1226_v12  ;;  %v1238_v29 = vmul.f32 %v5845_v14, %v1226_v12  ;;  %v1239_v32 = vmul.f32 %v1226_v12, %v5866_v39  ;;  %v1240_v49 = vmul.f32 %v1226_v12, %v5875_v48 }
 0x30d   : > { %v1241_v57 = vmul.f32 %v5864_v37, %v1226_v12  ;;  %v1242_v47 = vmul.f32 %v5873_v44, %v1226_v12  ;;  %v1243_v41 = vmul.f32 %v1226_v12, %v5894_v3  ;;  %v1244_v54 = vmul.f32 %v1226_v12, %v5903_v13 }
 0x30e   : > { %v1245_v9 = vmul.f32 %v5892_v1, %v1226_v12  ;;  %v1246_v17 = vmul.f32 %v5901_v10, %v1226_v12  ;;  %v1247_v7 = vmul.f32 %v1226_v12, %v5922_v38  ;;  %v1248_v14 = vmul.f32 %v1226_v12, %v5931_v51 }
 0x30f   : > { %v1249_v39 = vmul.f32 %v5920_v35, %v1226_v12  ;;  %v1250_v48 = vmul.f32 %v5929_v45, %v1226_v12  ;;  %v1251_v37 = vmul.f32 %v1226_v12, %v5950_v8  ;;  %v1252_v44 = vmul.f32 %v1226_v12, %v5959_v21 }
 0x310   : > { %v1253_v3 = vmul.f32 %v5948_v5, %v1226_v12  ;;  %v1254_v13 = vmul.f32 %v5957_v18, %v1226_v12  ;;  %v1255_v1 = vmul.f32 %v1226_v12, %v5978_v53  ;;  %v1256_v10 = vmul.f32 %v1226_v12, %v5987_v63 }
 0x311   : > { %v1257_v38 = vmul.f32 %v5976_v50, %v1226_v12  ;;  %v1258_v51 = vmul.f32 %v5985_v60, %v1226_v12  ;;  %v6084_v42 = vadd.f32 %v1262_v34, %v1227_v20  ;;  %v6086_v35 = vadd.f32 %v1262_v34, %v1228_v23 }
 0x312   : > { %v6088_v45 = vadd.f32 %v1262_v34, %v1229_v24  ;;  %v6090_v8 = vadd.f32 %v1262_v34, %v1230_v25  ;;  %v6092_v21 = vadd.f32 %v1262_v34, %v1231_v26  ;;  %v6094_v5 = vadd.f32 %v1262_v34, %v1232_v28 }
 0x313   : > { %v6096_v18 = vadd.f32 %v1262_v34, %v1233_v31  ;;  %v6098_v53 = vadd.f32 %v1262_v34, %v1234_v36  ;;  %v6100_v63 = vadd.f32 %v1262_v34, %v1235_v40  ;;  %v6102_v50 = vadd.f32 %v1262_v34, %v1236_v30 }
 0x314   : > { %v6104_v60 = vadd.f32 %v1262_v34, %v1237_v33  ;;  %v6106_v43 = vadd.f32 %v1262_v34, %v1238_v29  ;;  %v6108_v46 = vadd.f32 %v1262_v34, %v1239_v32  ;;  %v6110_v52 = vadd.f32 %v1262_v34, %v1240_v49 }
 0x315   : > { %v6112_v55 = vadd.f32 %v1262_v34, %v1241_v57  ;;  %v6114_v56 = vadd.f32 %v1262_v34, %v1242_v47  ;;  %v6116_v58 = vadd.f32 %v1262_v34, %v1243_v41  ;;  %v6118_v59 = vadd.f32 %v1262_v34, %v1244_v54 }
 0x316   : > { %v6120_v2 = vadd.f32 %v1262_v34, %v1245_v9  ;;  %v6122_v6 = vadd.f32 %v1262_v34, %v1246_v17  ;;  %v6124_v11 = vadd.f32 %v1262_v34, %v1247_v7  ;;  %v6126_v12 = vadd.f32 %v1262_v34, %v1248_v14 }
 0x317   : > { %v6128_v19 = vadd.f32 %v1262_v34, %v1249_v39  ;;  %v6130_v20 = vadd.f32 %v1262_v34, %v1250_v48  ;;  %v6132_v23 = vadd.f32 %v1262_v34, %v1251_v37  ;;  %v6134_v24 = vadd.f32 %v1262_v34, %v1252_v44 }
 0x318   : > { %v6136_v25 = vadd.f32 %v1262_v34, %v1253_v3  ;;  %v6138_v26 = vadd.f32 %v1262_v34, %v1254_v13  ;;  %v6140_v28 = vadd.f32 %v1262_v34, %v1255_v1  ;;  %v6142_v31 = vadd.f32 %v1262_v34, %v1256_v10 }
 0x319   : > { %v6144_v36 = vadd.f32 %v1262_v34, %v1257_v38  ;;  %v6146_v40 = vadd.f32 %v1262_v34, %v1258_v51  ;;  %v1295_v30 = vmax.f32 %v6084_v42, 0.0  ;;  %v1296_v33 = vmax.f32 %v6086_v35, 0.0 }
 0x31a   : > { %v1297_v29 = vmax.f32 %v6088_v45, 0.0  ;;  %v1298_v32 = vmax.f32 %v6090_v8, 0.0  ;;  %v1299_v49 = vmax.f32 %v6092_v21, 0.0  ;;  %v1300_v57 = vmax.f32 %v6094_v5, 0.0 }
 0x31b   : > { %v1301_v47 = vmax.f32 %v6096_v18, 0.0  ;;  %v1302_v41 = vmax.f32 %v6098_v53, 0.0  ;;  %v1303_v54 = vmax.f32 %v6100_v63, 0.0  ;;  %v1304_v34 = vmax.f32 %v6102_v50, 0.0 }
 0x31c   : > { %v1305_v9 = vmax.f32 %v6104_v60, 0.0  ;;  %v1306_v17 = vmax.f32 %v6106_v43, 0.0  ;;  %v1307_v7 = vmax.f32 %v6108_v46, 0.0  ;;  %v1308_v14 = vmax.f32 %v6110_v52, 0.0 }
 0x31d   : > { %v1309_v39 = vmax.f32 %v6112_v55, 0.0  ;;  %v1310_v48 = vmax.f32 %v6114_v56, 0.0  ;;  %v1311_v37 = vmax.f32 %v6116_v58, 0.0  ;;  %v1312_v44 = vmax.f32 %v6118_v59, 0.0 }
 0x31e   : > { %v1313_v3 = vmax.f32 %v6120_v2, 0.0  ;;  %v1314_v13 = vmax.f32 %v6122_v6, 0.0  ;;  %v1315_v1 = vmax.f32 %v6124_v11, 0.0  ;;  %v1316_v10 = vmax.f32 %v6126_v12, 0.0 }
 0x31f   : > { %v1317_v38 = vmax.f32 %v6128_v19, 0.0  ;;  %v1318_v51 = vmax.f32 %v6130_v20, 0.0  ;;  %v1319_v42 = vmax.f32 %v6132_v23, 0.0  ;;  %v1320_v35 = vmax.f32 %v6134_v24, 0.0 }
 0x320   : > { %v1321_v45 = vmax.f32 %v6136_v25, 0.0  ;;  %v1322_v8 = vmax.f32 %v6138_v26, 0.0  ;;  %v1323_v21 = vmax.f32 %v6140_v28, 0.0  ;;  %v1324_v5 = vmax.f32 %v6142_v31, 0.0 }
 0x321   : > { %v1325_v18 = vmax.f32 %v6144_v36, 0.0  ;;  %v1326_v53 = vmax.f32 %v6146_v40, 0.0  ;;  %v4817_v63 = vpack.c.bf16 %v1295_v30, %v1295_v30  ;;  %v4818_v50 = vpack.c.bf16 %v1296_v33, %v1296_v33 }
 0x322   : > { %v4819_v60 = vpack.c.bf16 %v1297_v29, %v1297_v29  ;;  %v4820_v43 = vpack.c.bf16 %v1298_v32, %v1298_v32  ;;  %v4821_v46 = vpack.c.bf16 %v1299_v49, %v1299_v49  ;;  %v4822_v52 = vpack.c.bf16 %v1300_v57, %v1300_v57 }
 0x323   : > { %v6180_v55 = vpack.c.bf16 %v1301_v47, %v1301_v47  ;;  %v6182_v56 = vpack.c.bf16 %v1302_v41, %v1302_v41  ;;  %v6184_v58 = vpack.c.bf16 %v1303_v54, %v1303_v54  ;;  %v6186_v59 = vpack.c.bf16 %v1304_v34, %v1304_v34 }
 0x324   : > { %v6188_v2 = vpack.c.bf16 %v1305_v9, %v1305_v9  ;;  %v6190_v6 = vpack.c.bf16 %v1306_v17, %v1306_v17  ;;  %v6192_v11 = vpack.c.bf16 %v1307_v7, %v1307_v7  ;;  %v6194_v12 = vpack.c.bf16 %v1308_v14, %v1308_v14 }
 0x325   : > { %v6196_v19 = vpack.c.bf16 %v1309_v39, %v1309_v39  ;;  %v6198_v20 = vpack.c.bf16 %v1310_v48, %v1310_v48  ;;  %v6200_v23 = vpack.c.bf16 %v1311_v37, %v1311_v37  ;;  %v6202_v24 = vpack.c.bf16 %v1312_v44, %v1312_v44 }
 0x326   : > { %v6204_v25 = vpack.c.bf16 %v1313_v3, %v1313_v3  ;;  %v6206_v26 = vpack.c.bf16 %v1314_v13, %v1314_v13  ;;  %v6208_v28 = vpack.c.bf16 %v1315_v1, %v1315_v1  ;;  %v6210_v31 = vpack.c.bf16 %v1316_v10, %v1316_v10 }
 0x327   : > { %v6212_v36 = vpack.c.bf16 %v1317_v38, %v1317_v38  ;;  %v6214_v40 = vpack.c.bf16 %v1318_v51, %v1318_v51  ;;  %v6216_v30 = vpack.c.bf16 %v1319_v42, %v1319_v42  ;;  %v6218_v33 = vpack.c.bf16 %v1320_v35, %v1320_v35 }
 0x328   : > { %v6220_v29 = vpack.c.bf16 %v1321_v45, %v1321_v45  ;;  %v6222_v32 = vpack.c.bf16 %v1322_v8, %v1322_v8  ;;  %v6224_v49 = vpack.c.bf16 %v1323_v21, %v1323_v21  ;;  %v6226_v57 = vpack.c.bf16 %v1324_v5, %v1324_v5 }
 0x329   : > { %v6228_v47 = vpack.c.bf16 %v1325_v18, %v1325_v18  ;;  %v6230_v41 = vpack.c.bf16 %v1326_v53, %v1326_v53  ;;  %v1424_v54 = vshrl.u32 %v4817_v63, 16  ;;  %v1427_v34 = vshll.u32 %v4817_v63, 16 }
 0x32a   : > { %v1432_v9 = vshrl.u32 %v4818_v50, 16  ;;  %v1435_v17 = vshll.u32 %v4818_v50, 16  ;;  %v1440_v7 = vshrl.u32 %v4819_v60, 16  ;;  %v1443_v14 = vshll.u32 %v4819_v60, 16 }
 0x32b   : > { %v6232_v39 = vrot.slane %v1424_v54, 7  ;;  %v1448_v48 = vshrl.u32 %v4820_v43, 16  ;;  %v1451_v37 = vshll.u32 %v4820_v43, 16  ;;  %v1456_v44 = vshrl.u32 %v4821_v46, 16 }
 0x32c   : > { %v6234_v3 = vrot.slane %v1432_v9, 7  ;;  %v6236_v13 = vrot.slane %v1440_v7, 7  ;;  %v1459_v1 = vshll.u32 %v4821_v46, 16  ;;  %v1464_v10 = vshrl.u32 %v4822_v52, 16 }
 0x32d   : > { %v6239_v38 = vor.u32 %v1427_v34, %v6232_v39  ;;  %v6242_v42 = vrot.slane %v1448_v48, 7  ;;  %v6244_v35 = vrot.slane %v1456_v44, 7  ;;  %v1467_v43 = vshll.u32 %v4822_v52, 16 }
 0x32e   : > { %v6247_v45 = vor.u32 %v1435_v17, %v6234_v3  ;;  %v6251_v21 = vor.u32 %v1443_v14, %v6236_v13  ;;  %v6262_v60 = vrot.slane %v1464_v10, 7  ;;  %v1472_v46 = vshrl.u32 %v6180_v55, 16 }
 0x32f   : > { %v6255_v18 = vor.u32 %v1451_v37, %v6242_v42  ;;  %v6259_v63 = vor.u32 %v1459_v1, %v6244_v35  ;;  %v1475_v54 = vshll.u32 %v6180_v55, 16  ;;  %v1480_v34 = vshrl.u32 %v6182_v56, 16 }
 0x330   : > { %v1483_v9 = vshll.u32 %v6182_v56, 16  ;;  %v1488_v17 = vshrl.u32 %v6184_v58, 16  ;;  %v1491_v7 = vshll.u32 %v6184_v58, 16  ;;  %v6271_v14 = vor.u32 %v1467_v43, %v6262_v60 }
 0x331   : > { %v6274_v37 = vrot.slane %v1472_v46, 7  ;;  %v1496_v52 = vshrl.u32 %v6186_v59, 16  ;;  %v6277_v44 = vrot.slane %v1480_v34, 7  ;;  %v1499_v1 = vshll.u32 %v6186_v59, 16 }
 0x332   : > { %v6279_v55 = vrot.slane %v1488_v17, 7  ;;  %v1504_v56 = vshrl.u32 %v6188_v2, 16  ;;  %v1507_v46 = vshll.u32 %v6188_v2, 16  ;;  %v1515_v2 = vshll.u32 %v6190_v6, 16 }
 0x333   : > { %v6284_v10 = vor.u32 %v1475_v54, %v6274_v37  ;;  %v6287_v43 = vrot.slane %v1496_v52, 7  ;;  %v6291_v27 = vor.u32 %v1483_v9, %v6277_v44  ;;  %v1512_v52 = vshrl.u32 %v6190_v6, 16 }
 0x334   : > { %v6295_v17 = vor.u32 %v1491_v7, %v6279_v55  ;;  %v6302_v15 = vrot.slane %v1504_v56, 7  ;;  %v1520_v9 = vshrl.u32 %v6192_v11, 16  ;;  %v1523_v16 = vshll.u32 %v6192_v11, 16 }
 0x335   : > { %v6299_v22 = vor.u32 %v1499_v1, %v6287_v43  ;;  %v1528_v7 = vshrl.u32 %v6194_v12, 16  ;;  %v6313_v59 = vrot.slane %v1512_v52, 7  ;;  %v1531_v56 = vshll.u32 %v6194_v12, 16 }
 0x336   : > { %v6310_v34 = vor.u32 %v1507_v46, %v6302_v15  ;;  %v6316_v54 = vrot.slane %v1520_v9, 7  ;;  %v1536_v6 = vshrl.u32 %v6196_v19, 16  ;;  %v1539_v48 = vshll.u32 %v6196_v19, 16 }
 0x337   : > { %v6318_v58 = vrot.slane %v1528_v7, 7  ;;  %v6323_v11 = vor.u32 %v1515_v2, %v6313_v59  ;;  %v1544_v50 = vshrl.u32 %v6198_v20, 16  ;;  %v1547_v52 = vshll.u32 %v6198_v20, 16 }
 0x338   : > { %v6329_v1 = vor.u32 %v1523_v16, %v6316_v54  ;;  %v6336_v19 = vrot.slane %v1536_v6, 7  ;;  %v1552_v46 = vshrl.u32 %v6200_v23, 16  ;;  %v1555_v53 = vshll.u32 %v6200_v23, 16 }
 0x339   : > { %v6333_v9 = vor.u32 %v1531_v56, %v6318_v58  ;;  %v6338_v2 = vrot.slane %v1544_v50, 7  ;;  %v1560_v20 = vshrl.u32 %v6202_v24, 16  ;;  %v1563_v16 = vshll.u32 %v6202_v24, 16 }
 0x33a   : > { %v1568_v5 = vshrl.u32 %v6204_v25, 16  ;;  %v1571_v12 = vshll.u32 %v6204_v25, 16  ;;  %v6347_v56 = vor.u32 %v1539_v48, %v6336_v19  ;;  %v6354_v8 = vrot.slane %v1552_v46, 7 }
 0x33b   : > { %v6351_v50 = vor.u32 %v1547_v52, %v6338_v2  ;;  %v6356_v23 = vrot.slane %v1560_v20, 7  ;;  %v1576_v24 = vshrl.u32 %v6206_v26, 16  ;;  %v1579_v25 = vshll.u32 %v6206_v26, 16 }
 0x33c   : > { %7462 = vst [vmem:[#allocation7_spill] sm:$0xff] %v6354_v8  ;;  %v6358_v51 = vrot.slane %v1568_v5, 7  ;;  %v1584_v48 = vshrl.u32 %v6208_v28, 16  ;;  %v1587_v6 = vshll.u32 %v6208_v28, 16  ;;  %v1592_v52 = vshrl.u32 %v6210_v31, 16 }
 0x33d   : > { %7463 = vst [vmem:[#allocation8_spill] sm:$0xff] %v6356_v23  ;;  %v6366_v7 = vor.u32 %v1555_v53, %v6354_v8  ;;  %v6370_v5 = vor.u32 %v1563_v16, %v6356_v23  ;;  %v6377_v62 = vrot.slane %v1576_v24, 7  ;;  %v1595_v53 = vshll.u32 %v6210_v31, 16  ;;  %v1777_v8 = vld [vmem:[#allocation2 + $0x2c] sm:$0x1] }
 0x33e   : > { %7464 = vst [vmem:[#allocation9_spill] sm:$0xff] %v6358_v51  ;;  %v6374_v61 = vor.u32 %v1571_v12, %v6358_v51  ;;  %v6379_v28 = vrot.slane %v1584_v48, 7  ;;  %v6381_v0 = vrot.slane %v1592_v52, 7  ;;  %v1600_v46 = vshrl.u32 %v6212_v36, 16  ;;  %v1759_v51 = vld [vmem:[#allocation2 + $0x14] sm:$0x1] }
 0x33f   : > { %7465 = vst [vmem:[#allocation10_spill] sm:$0xff] %v6366_v7  ;;  %7466 = vst [vmem:[#allocation11_spill] sm:$0xff] %v6370_v5  ;;  %v1603_v16 = vshll.u32 %v6212_v36, 16  ;;  %v6387_v4 = vor.u32 %v1579_v25, %v6377_v62  ;;  %v1608_v26 = vshrl.u32 %v6214_v40, 16  ;;  %v1611_v36 = vshll.u32 %v6214_v40, 16 }
 0x340   : > { %7467 = vst [vmem:[#allocation12_spill] sm:$0xff] %v6374_v61  ;;  %7468 = vst [vmem:[#allocation13_spill] sm:$0xff] %v6377_v62  ;;  %v6391_v20 = vor.u32 %v1587_v6, %v6379_v28  ;;  %v6395_v48 = vor.u32 %v1595_v53, %v6381_v0  ;;  %v6398_v31 = vrot.slane %v1600_v46, 7  ;;  %v1616_v25 = vshrl.u32 %v6216_v30, 16  ;;  %v1747_v53 = vld [vmem:[#allocation2 + $0x8] sm:$0xf] }
 0x341   : > { %7469 = vst [vmem:[#allocation14_spill] sm:$0xff] %v6379_v28  ;;  %7470 = vst [vmem:[#allocation15_spill] sm:$0xff] %v6381_v0  ;;  %v1619_v12 = vshll.u32 %v6216_v30, 16  ;;  %v1624_v6 = vshrl.u32 %v6218_v33, 16  ;;  %v6409_v24 = vrot.slane %v1608_v26, 7  ;;  %v1627_v46 = vshll.u32 %v6218_v33, 16 }
 0x342   : > { %7471 = vst [vmem:[#allocation16_spill] sm:$0xff] %v6387_v4  ;;  %7472 = vst [vmem:[#allocation17_spill] sm:$0xff] %v6391_v20  ;;  %v6406_v20 = vor.u32 %v1603_v16, %v6398_v31  ;;  %v6412_v52 = vrot.slane %v1616_v25, 7  ;;  %v1632_v40 = vshrl.u32 %v6220_v29, 16  ;;  %v1643_v26 = vshll.u32 %v6222_v32, 16 }
 0x343   : > { %7473 = vst [vmem:[#allocation18_spill] sm:$0xff] %v6395_v48  ;;  %7474 = vst [vmem:[#allocation19_spill] sm:$0xff] %v6398_v31  ;;  %v6414_v0 = vrot.slane %v1624_v6, 7  ;;  %v1635_v48 = vshll.u32 %v6220_v29, 16  ;;  %v6419_v30 = vor.u32 %v1611_v36, %v6409_v24  ;;  %v1753_v16 = vld [vmem:[#allocation2 + $0xc] sm:$0x1] }
 0x344   : > { %7475 = vst [vmem:[#allocation20_spill] sm:$0xff] %v6406_v20  ;;  %7476 = vst [vmem:[#allocation21_spill] sm:$0xff] %v6409_v24  ;;  %v1640_v20 = vshrl.u32 %v6222_v32, 16  ;;  %v6425_v33 = vor.u32 %v1619_v12, %v6412_v52  ;;  %v6438_v24 = vrot.slane %v1632_v40, 7  ;;  %v1648_v12 = vshrl.u32 %v6224_v49, 16 }
 0x345   : > { %7477 = vst [vmem:[#allocation22_spill] sm:$0xff] %v6412_v52  ;;  %7478 = vst [vmem:[#allocation23_spill] sm:$0xff] %v6414_v0  ;;  %v6429_v6 = vor.u32 %v1627_v46, %v6414_v0  ;;  %v1651_v25 = vshll.u32 %v6224_v49, 16  ;;  %v1756_v29 = vld [vmem:[#allocation2 + $0x10] sm:$0xf]  ;;  %v1656_v0 = vshrl.u32 %v6226_v57, 16 }
 0x346   : > { %7479 = vst [vmem:[#allocation24_spill] sm:$0xff] %v6419_v30  ;;  %7480 = vst [vmem:[#allocation25_spill] sm:$0xff] %v6425_v33  ;;  %v6440_v32 = vrot.slane %v1640_v20, 7  ;;  %v1664_v40 = vshrl.u32 %v6228_v47, 16  ;;  %v1667_v20 = vshll.u32 %v6228_v47, 16  ;;  %v6455_v49 = vor.u32 %v1635_v48, %v6438_v24 }
 0x347   : > { %7481 = vst [vmem:[#allocation26_spill] sm:$0xff] %v6429_v6  ;;  %7484 = vst [vmem:[#allocation27_spill] sm:$0xff] %v6438_v24  ;;  %v1659_v6 = vshll.u32 %v6226_v57, 16  ;;  %v1762_v52 = vld [vmem:[#allocation2 + $0x18] sm:$0xf]  ;;  %v6462_v57 = vrot.slane %v1648_v12, 7 }
 0x348   : > { %7485 = vst [vmem:[#allocation28_spill] sm:$0xff] %v6440_v32  ;;  %v1765_v33 = vld [vmem:[#allocation2 + $0x1c] sm:$0x1]  ;;  %v1768_v30 = vld [vmem:[#allocation2 + $0x20] sm:$0xf]  ;;  %7488 = vst [vmem:[#allocation29_spill] sm:$0xff] %v6455_v49  ;;  %v6459_v62 = vor.u32 %v1643_v26, %v6440_v32  ;;  %v1748_v26 = vsel %vm6434_vm8, %v6239_v38, %v1747_v53 }
 0x349   : > { %v1771_v31 = vld [vmem:[#allocation2 + $0x24] sm:$0x1]  ;;  %v6464_v61 = vrot.slane %v1656_v0, 7  ;;  %v6466_v47 = vrot.slane %v1664_v40, 7  ;;  %v1672_v23 = vshrl.u32 %v6230_v41, 16  ;;  %v1675_v28 = vshll.u32 %v6230_v41, 16 }
 0x34a   : > { %7489 = vst [vmem:[#allocation30_spill] sm:$0xff] %v6459_v62  ;;  %v6469_v5 = vld [vmem:[#allocation2 + $0x38] sm:$0xf]  ;;  %v1789_v48 = vld [vmem:[#allocation2 + $0x3c] sm:$0x1]  ;;  %v7491_v12 = vrot.slane %v6232_v39, 4  ;;  %v1757_v40 = vsel %vm6434_vm8, %v6247_v45, %v1756_v29  ;;  %v6485_v41 = vor.u32 %v1651_v25, %v6462_v57 }
 0x34b   : > { %7490 = vst [vmem:[#allocation31_spill] sm:$0xff] %v6466_v47  ;;  %v1774_v49 = vld [vmem:[#allocation2 + $0x28] sm:$0xf]  ;;  %v6482_v4 = vld [vmem:[#allocation2 + $0x40] sm:$0xf]  ;;  %v6489_v38 = vor.u32 %v1659_v6, %v6464_v61  ;;  %v7494_v6 = vrot.slane %v6234_v3, 4  ;;  %v1769_v3 = vsel %vm6434_vm8, %v6255_v18, %v1768_v30 }
 0x34c   : > { %v1754_v0 = vsel %vm6446_vm9, %v7491_v12, %v1753_v16  ;;  %v1795_v32 = vld [vmem:[#allocation2 + $0x44] sm:$0x1]  ;;  %v1780_v62 = vld [vmem:[#allocation2 + $0x30] sm:$0xf]  ;;  %v1783_v24 = vld [vmem:[#allocation2 + $0x34] sm:$0x1]  ;;  %v6495_v12 = vor.u32 %v1667_v20, %v6466_v47  ;;  %v1763_v20 = vsel %vm6434_vm8, %v6251_v21, %v1762_v52 }
 0x34d   : > { %7492 = vst [vmem:[#allocation32_spill] sm:$0xff] %v6485_v41  ;;  %1749 = vst [vmem:[#allocation2 + $0x8] sm:$0xf] %v1748_v26  ;;  %v6492_v53 = vld [vmem:[#allocation2 + $0x68] sm:$0xf]  ;;  %v6498_v41 = vrot.slane %v1672_v23, 7  ;;  %v1760_v39 = vsel %vm6446_vm9, %v7494_v6, %v1759_v51 }
 0x34e   : > { %1755 = vst [vmem:[#allocation2 + $0xc] sm:$0x1] %v1754_v0  ;;  %1758 = vst [vmem:[#allocation2 + $0x10] sm:$0xf] %v1757_v40  ;;  %v1813_v45 = vld [vmem:[#allocation2 + $0x6c] sm:$0x1] }
 0x34f   : > { %v1798_v16 = vld [vmem:[#allocation2 + $0x58] sm:$0xf]  ;;  %v1801_v29 = vld [vmem:[#allocation2 + $0x5c] sm:$0x1]  ;;  %7493 = vst [vmem:[#allocation33_spill] sm:$0xff] %v6495_v12  ;;  %v7495_v25 = vrot.slane %v6236_v13, 4  ;;  %v6527_v13 = vor.u32 %v1675_v28, %v6498_v41 }
 0x350   : > { %v6504_v26 = vld [vmem:[#allocation2 + $0x70] sm:$0xf]  ;;  %v6506_v0 = vld [vmem:[#allocation2 + $0x74] sm:$0x1]  ;;  %v1804_v40 = vld [vmem:[#allocation2 + $0x60] sm:$0xf] }
 0x351   : > { %v1807_v7 = vld [vmem:[#allocation2 + $0x64] sm:$0x1]  ;;  %1761 = vst [vmem:[#allocation2 + $0x14] sm:$0x1] %v1760_v39  ;;  %v1766_v23 = vsel %vm6446_vm9, %v7495_v25, %v1765_v33  ;;  %v7496_v51 = vrot.slane %v6242_v42, 4  ;;  %v1678_v52 = vrot.slane %v6498_v41, 4  ;;  %v1775_v42 = vsel %vm6434_vm8, %v6259_v63, %v1774_v49 }
 0x352   : > { %v6522_v47 = vld [vmem:[#allocation2 + $0x88] sm:$0xf]  ;;  %v6524_v39 = vld [vmem:[#allocation2 + $0x8c] sm:$0x1]  ;;  %v1822_v12 = vld [vmem:[#allocation2 + $0x78] sm:$0xf] }
 0x353   : > { %v1772_v6 = vsel %vm6446_vm9, %v7496_v51, %v1771_v31  ;;  %v1825_v21 = vld [vmem:[#allocation2 + $0x7c] sm:$0x1]  ;;  %1764 = vst [vmem:[#allocation2 + $0x18] sm:$0xf] %v1763_v20  ;;  %1767 = vst [vmem:[#allocation2 + $0x1c] sm:$0x1] %v1766_v23  ;;  %v1781_v20 = vsel %vm6434_vm8, %v6271_v14, %v1780_v62  ;;  %v1793_v14 = vsel %vm6434_vm8, %v6291_v27, %v6482_v4 }
 0x354   : > { %1770 = vst [vmem:[#allocation2 + $0x20] sm:$0xf] %v1769_v3  ;;  %1773 = vst [vmem:[#allocation2 + $0x24] sm:$0x1] %v1772_v6  ;;  %v7497_v18 = vrot.slane %v6244_v35, 4  ;;  %v7498_v23 = vrot.slane %v6262_v60, 4  ;;  %v1805_v4 = vsel %vm6434_vm8, %v6299_v22, %v1804_v40 }
 0x355   : > { %v6537_v30 = vld [vmem:[#allocation2 + $0x90] sm:$0xf]  ;;  %v6539_v33 = vld [vmem:[#allocation2 + $0x94] sm:$0x1]  ;;  %v1828_v28 = vld [vmem:[#allocation2 + $0x80] sm:$0xf] }
 0x356   : > { %v1778_v31 = vsel %vm6446_vm9, %v7497_v18, %v1777_v8  ;;  %v1831_v25 = vld [vmem:[#allocation2 + $0x84] sm:$0x1]  ;;  %1776 = vst [vmem:[#allocation2 + $0x28] sm:$0xf] %v1775_v42  ;;  %v1784_v35 = vsel %vm6446_vm9, %v7498_v23, %v1783_v24  ;;  %v1787_v8 = vsel %vm6434_vm8, %v6284_v10, %v6469_v5  ;;  %v7499_v63 = vrot.slane %v6274_v37, 4 }
 0x357   : > { %1779 = vst [vmem:[#allocation2 + $0x2c] sm:$0x1] %v1778_v31  ;;  %v6556_v3 = vld [vmem:[#allocation2 + $0xb8] sm:$0xf]  ;;  %v6558_v51 = vld [vmem:[#allocation2 + $0xbc] sm:$0x1]  ;;  %v1799_v5 = vsel %vm6434_vm8, %v6295_v17, %v1798_v16  ;;  %v1811_v17 = vsel %vm6434_vm8, %v6310_v34, %v6492_v53 }
 0x358   : > { %v1790_v49 = vsel %vm6446_vm9, %v7499_v63, %v1789_v48  ;;  %v6560_v62 = vld [vmem:[#allocation2 + $0xa8] sm:$0xf]  ;;  %v1849_v60 = vld [vmem:[#allocation2 + $0xac] sm:$0x1]  ;;  %1782 = vst [vmem:[#allocation2 + $0x30] sm:$0xf] %v1781_v20 }
 0x359   : > { %1785 = vst [vmem:[#allocation2 + $0x34] sm:$0x1] %v1784_v35  ;;  %1788 = vst [vmem:[#allocation2 + $0x38] sm:$0xf] %v1787_v8  ;;  %v7500_v37 = vrot.slane %v6277_v44, 4  ;;  %v7501_v24 = vrot.slane %v6279_v55, 4 }
 0x35a   : > { %1791 = vst [vmem:[#allocation2 + $0x3c] sm:$0x1] %v1790_v49  ;;  %v6577_v6 = vld [vmem:[#allocation2 + $0xc0] sm:$0xf]  ;;  %v6579_v42 = vld [vmem:[#allocation2 + $0xc4] sm:$0x1] }
 0x35b   : > { %v1796_v10 = vsel %vm6446_vm9, %v7500_v37, %v1795_v32  ;;  %v1802_v48 = vsel %vm6446_vm9, %v7501_v24, %v1801_v29  ;;  %v1852_v18 = vld [vmem:[#allocation2 + $0xb0] sm:$0xf]  ;;  %v1855_v27 = vld [vmem:[#allocation2 + $0xb4] sm:$0x1]  ;;  %1794 = vst [vmem:[#allocation2 + $0x40] sm:$0xf] %v1793_v14 }
 0x35c   : > { %1797 = vst [vmem:[#allocation2 + $0x44] sm:$0x1] %v1796_v10  ;;  %1800 = vst [vmem:[#allocation2 + $0x58] sm:$0xf] %v1799_v5  ;;  %v7502_v44 = vrot.slane %v6287_v43, 4  ;;  %v7503_v32 = vrot.slane %v6302_v15, 4  ;;  %v1817_v43 = vsel %vm6434_vm8, %v6323_v11, %v6504_v26 }
 0x35d   : > { %1803 = vst [vmem:[#allocation2 + $0x5c] sm:$0x1] %v1802_v48  ;;  %v6596_v29 = vld [vmem:[#allocation2 + $0xd8] sm:$0xf]  ;;  %v6598_v31 = vld [vmem:[#allocation2 + $0xdc] sm:$0x1] }
 0x35e   : > { %v1808_v55 = vsel %vm6446_vm9, %v7502_v44, %v1807_v7  ;;  %v1814_v16 = vsel %vm6446_vm9, %v7503_v32, %v1813_v45  ;;  %v1870_v22 = vld [vmem:[#allocation2 + $0xc8] sm:$0xf]  ;;  %v1873_v40 = vld [vmem:[#allocation2 + $0xcc] sm:$0x1]  ;;  %1806 = vst [vmem:[#allocation2 + $0x60] sm:$0xf] %v1805_v4  ;;  %v1823_v7 = vsel %vm6434_vm8, %v6329_v1, %v1822_v12  ;;  %v1835_v12 = vsel %vm6434_vm8, %v6347_v56, %v6522_v47 }
 0x35f   : > { %1809 = vst [vmem:[#allocation2 + $0x64] sm:$0x1] %v1808_v55  ;;  %1812 = vst [vmem:[#allocation2 + $0x68] sm:$0xf] %v1811_v17  ;;  %v7504_v15 = vrot.slane %v6313_v59, 4  ;;  %v7505_v53 = vrot.slane %v6316_v54, 4  ;;  %v1829_v59 = vsel %vm6434_vm8, %v6333_v9, %v1828_v28  ;;  %v1841_v56 = vsel %vm6434_vm8, %v6351_v50, %v6537_v30 }
 0x360   : > { %1815 = vst [vmem:[#allocation2 + $0x6c] sm:$0x1] %v1814_v16  ;;  %v6616_v20 = vld [vmem:[#allocation2 + $0xe0] sm:$0xf]  ;;  %v6618_v23 = vld [vmem:[#allocation2 + $0xe4] sm:$0x1] }
 0x361   : > { %v1820_v34 = vsel %vm6446_vm9, %v7504_v15, %v6506_v0  ;;  %v1826_v45 = vsel %vm6446_vm9, %v7505_v53, %v1825_v21  ;;  %v1876_v11 = vld [vmem:[#allocation2 + $0xd0] sm:$0xf]  ;;  %1818 = vst [vmem:[#allocation2 + $0x70] sm:$0xf] %v1817_v43  ;;  %1824 = vst [vmem:[#allocation2 + $0x78] sm:$0xf] %v1823_v7 }
 0x362   : > { %1821 = vst [vmem:[#allocation2 + $0x74] sm:$0x1] %v1820_v34  ;;  %1827 = vst [vmem:[#allocation2 + $0x7c] sm:$0x1] %v1826_v45  ;;  %v7506_v1 = vrot.slane %v6318_v58, 4  ;;  %v7507_v26 = vrot.slane %v6336_v19, 4 }
 0x363   : > { %v1879_v21 = vld [vmem:[#allocation2 + $0xd4] sm:$0x1]  ;;  %v6636_v9 = vld [vmem:[#allocation2 + $0x108] sm:$0xf]  ;;  %v6638_v58 = vld [vmem:[#allocation2 + $0x10c] sm:$0x1] }
 0x364   : > { %v1832_v54 = vsel %vm6446_vm9, %v7506_v1, %v1831_v25  ;;  %v1838_v0 = vsel %vm6446_vm9, %v7507_v26, %v6524_v39  ;;  %1830 = vst [vmem:[#allocation2 + $0x80] sm:$0xf] %v1829_v59  ;;  %1836 = vst [vmem:[#allocation2 + $0x88] sm:$0xf] %v1835_v12  ;;  %v7508_v19 = vrot.slane %v6338_v2, 4  ;;  %v7509_v39 = vld [vmem:[#allocation10_spill] sm:$0xff] }
 0x365   : > { %1833 = vst [vmem:[#allocation2 + $0x84] sm:$0x1] %v1832_v54  ;;  %1839 = vst [vmem:[#allocation2 + $0x8c] sm:$0x1] %v1838_v0  ;;  %v1847_v28 = vsel %vm6434_vm8, %v7509_v39, %v6560_v62  ;;  %v7510_v25 = vld [vmem:[#allocation7_spill] sm:$0xff]  ;;  %v7513_v30 = vld [vmem:[#allocation8_spill] sm:$0xff] }
 0x366   : > { %v1844_v47 = vsel %vm6446_vm9, %v7508_v19, %v6539_v33  ;;  %v7511_v35 = vrot.slane %v7510_v25, 4  ;;  %v1894_v63 = vld [vmem:[#allocation2 + $0xf8] sm:$0xf]  ;;  %v1897_v49 = vld [vmem:[#allocation2 + $0xfc] sm:$0x1]  ;;  %v7512_v2 = vld [vmem:[#allocation11_spill] sm:$0xff] }
 0x367   : > { %v1912_v14 = vld [vmem:[#allocation2 + $0x110] sm:$0xf]  ;;  %1842 = vst [vmem:[#allocation2 + $0x90] sm:$0xf] %v1841_v56  ;;  %1845 = vst [vmem:[#allocation2 + $0x94] sm:$0x1] %v1844_v47  ;;  %v1853_v50 = vsel %vm6434_vm8, %v7512_v2, %v1852_v18 }
 0x368   : > { %v1850_v8 = vsel %vm6446_vm9, %v7511_v35, %v1849_v60  ;;  %1848 = vst [vmem:[#allocation2 + $0xa8] sm:$0xf] %v1847_v28  ;;  %v7514_v33 = vrot.slane %v7513_v30, 4  ;;  %v7515_v37 = vld [vmem:[#allocation12_spill] sm:$0xff]  ;;  %v7516_v10 = vld [vmem:[#allocation9_spill] sm:$0xff]  ;;  %v7522_v16 = vld [vmem:[#allocation14_spill] sm:$0xff] }
 0x369   : > { %1851 = vst [vmem:[#allocation2 + $0xac] sm:$0x1] %v1850_v8  ;;  %v1859_v60 = vsel %vm6434_vm8, %v7515_v37, %v6556_v3  ;;  %v7517_v5 = vrot.slane %v7516_v10, 4  ;;  %v1915_v48 = vld [vmem:[#allocation2 + $0x114] sm:$0x1]  ;;  %v7518_v18 = vld [vmem:[#allocation16_spill] sm:$0xff] }
 0x36a   : > { %v1856_v62 = vsel %vm6446_vm9, %v7514_v33, %v1855_v27  ;;  %v1900_v4 = vld [vmem:[#allocation2 + $0x100] sm:$0xf]  ;;  %v1903_v44 = vld [vmem:[#allocation2 + $0x104] sm:$0x1]  ;;  %1854 = vst [vmem:[#allocation2 + $0xb0] sm:$0xf] %v1853_v50  ;;  %v1865_v27 = vsel %vm6434_vm8, %v7518_v18, %v6577_v6 }
 0x36b   : > { %v1862_v24 = vsel %vm6446_vm9, %v7517_v5, %v6558_v51  ;;  %1857 = vst [vmem:[#allocation2 + $0xb4] sm:$0x1] %v1856_v62  ;;  %1860 = vst [vmem:[#allocation2 + $0xb8] sm:$0xf] %v1859_v60  ;;  %v7519_v3 = vld [vmem:[#allocation13_spill] sm:$0xff]  ;;  %v7523_v43 = vrot.slane %v7522_v16, 4 }
 0x36c   : > { %1863 = vst [vmem:[#allocation2 + $0xbc] sm:$0x1] %v1862_v24  ;;  %v7520_v55 = vrot.slane %v7519_v3, 4  ;;  %v7521_v32 = vld [vmem:[#allocation17_spill] sm:$0xff]  ;;  %v1930_v34 = vld [vmem:[#allocation2 + $0x128] sm:$0xf] }
 0x36d   : > { %v1871_v51 = vsel %vm6434_vm8, %v7521_v32, %v1870_v22  ;;  %v1874_v15 = vsel %vm6446_vm9, %v7523_v43, %v1873_v40  ;;  %v1918_v7 = vld [vmem:[#allocation2 + $0x118] sm:$0xf]  ;;  %v1921_v53 = vld [vmem:[#allocation2 + $0x11c] sm:$0x1]  ;;  %1866 = vst [vmem:[#allocation2 + $0xc0] sm:$0xf] %v1865_v27 }
 0x36e   : > { %v1868_v17 = vsel %vm6446_vm9, %v7520_v55, %v6579_v42  ;;  %1872 = vst [vmem:[#allocation2 + $0xc8] sm:$0xf] %v1871_v51  ;;  %1875 = vst [vmem:[#allocation2 + $0xcc] sm:$0x1] %v1874_v15  ;;  %v7524_v6 = vld [vmem:[#allocation18_spill] sm:$0xff]  ;;  %v7525_v45 = vld [vmem:[#allocation15_spill] sm:$0xff] }
 0x36f   : > { %1869 = vst [vmem:[#allocation2 + $0xc4] sm:$0x1] %v1868_v17  ;;  %v1877_v42 = vsel %vm6434_vm8, %v7524_v6, %v1876_v11  ;;  %v7526_v59 = vrot.slane %v7525_v45, 4  ;;  %v7527_v1 = vld [vmem:[#allocation20_spill] sm:$0xff]  ;;  %v7528_v54 = vld [vmem:[#allocation19_spill] sm:$0xff]  ;;  %v7533_v28 = vld [vmem:[#allocation25_spill] sm:$0xff] }
 0x370   : > { %v1883_v40 = vsel %vm6434_vm8, %v7527_v1, %v6596_v29  ;;  %v7529_v12 = vrot.slane %v7528_v54, 4  ;;  %v1933_v0 = vld [vmem:[#allocation2 + $0x12c] sm:$0x1]  ;;  %v1924_v56 = vld [vmem:[#allocation2 + $0x120] sm:$0xf]  ;;  %v7531_v29 = vld [vmem:[#allocation21_spill] sm:$0xff] }
 0x371   : > { %v1880_v22 = vsel %vm6446_vm9, %v7526_v59, %v1879_v21  ;;  %v1927_v19 = vld [vmem:[#allocation2 + $0x124] sm:$0x1]  ;;  %1878 = vst [vmem:[#allocation2 + $0xd0] sm:$0xf] %v1877_v42  ;;  %1884 = vst [vmem:[#allocation2 + $0xd8] sm:$0xf] %v1883_v40 }
 0x372   : > { %v1886_v26 = vsel %vm6446_vm9, %v7529_v12, %v6598_v31  ;;  %1881 = vst [vmem:[#allocation2 + $0xd4] sm:$0x1] %v1880_v22  ;;  %v7530_v11 = vld [vmem:[#allocation24_spill] sm:$0xff]  ;;  %v7532_v47 = vrot.slane %v7531_v29, 4  ;;  %v1895_v31 = vsel %vm6434_vm8, %v7533_v28, %v1894_v63  ;;  %v7534_v25 = vld [vmem:[#allocation22_spill] sm:$0xff]  ;;  %v7539_v62 = vld [vmem:[#allocation29_spill] sm:$0xff] }
 0x373   : > { %1887 = vst [vmem:[#allocation2 + $0xdc] sm:$0x1] %v1886_v26  ;;  %v1889_v21 = vsel %vm6434_vm8, %v7530_v11, %v6616_v20  ;;  %v7535_v35 = vrot.slane %v7534_v25, 4  ;;  %v1936_v2 = vld [vmem:[#allocation2 + $0x130] sm:$0xf]  ;;  %v7536_v20 = vld [vmem:[#allocation26_spill] sm:$0xff] }
 0x374   : > { %v1892_v39 = vsel %vm6446_vm9, %v7532_v47, %v6618_v23  ;;  %v1939_v50 = vld [vmem:[#allocation2 + $0x134] sm:$0x1]  ;;  %1890 = vst [vmem:[#allocation2 + $0xe0] sm:$0xf] %v1889_v21  ;;  %1896 = vst [vmem:[#allocation2 + $0xf8] sm:$0xf] %v1895_v31  ;;  %v1901_v30 = vsel %vm6434_vm8, %v7536_v20, %v1900_v4 }
 0x375   : > { %v1898_v8 = vsel %vm6446_vm9, %v7535_v35, %v1897_v49  ;;  %1893 = vst [vmem:[#allocation2 + $0xe4] sm:$0x1] %v1892_v39  ;;  %v7537_v23 = vld [vmem:[#allocation23_spill] sm:$0xff]  ;;  %v1907_v49 = vsel %vm6434_vm8, %v7539_v62, %v6636_v9  ;;  %1902 = vst [vmem:[#allocation2 + $0x100] sm:$0xf] %v1901_v30  ;;  %v7542_v5 = vld [vmem:[#allocation30_spill] sm:$0xff] }
 0x376   : > { %1899 = vst [vmem:[#allocation2 + $0xfc] sm:$0x1] %v1898_v8  ;;  %v7538_v33 = vrot.slane %v7537_v23, 4  ;;  %v7540_v37 = vld [vmem:[#allocation27_spill] sm:$0xff]  ;;  %1908 = vst [vmem:[#allocation2 + $0x108] sm:$0xf] %v1907_v49  ;;  %v1913_v24 = vsel %vm6434_vm8, %v7542_v5, %v1912_v14  ;;  %v1925_v14 = vsel %vm6434_vm8, %v6489_v38, %v1924_v56  ;;  %v1940_v38 = vsel %vm6446_vm9, %v1678_v52, %v1939_v50 }
 0x377   : > { %v7541_v60 = vrot.slane %v7540_v37, 4  ;;  %v7543_v4 = vld [vmem:[#allocation28_spill] sm:$0xff]  ;;  %v7546_v3 = vrot.slane %v6462_v57, 4  ;;  %1914 = vst [vmem:[#allocation2 + $0x110] sm:$0xf] %v1913_v24  ;;  %v7547_v55 = vrot.slane %v6464_v61, 4  ;;  %v1937_v61 = vsel %vm6434_vm8, %v6527_v13, %v1936_v2 }
 0x378   : > { %v1904_v63 = vsel %vm6446_vm9, %v7538_v33, %v1903_v44  ;;  %v7544_v44 = vrot.slane %v7543_v4, 4  ;;  %v7545_v9 = vld [vmem:[#allocation32_spill] sm:$0xff]  ;;  %v7548_v17 = vld [vmem:[#allocation33_spill] sm:$0xff]  ;;  %v7549_v32 = vld [vmem:[#allocation31_spill] sm:$0xff]  ;;  %1926 = vst [vmem:[#allocation2 + $0x120] sm:$0xf] %v1925_v14 }
 0x379   : > { %v1910_v10 = vsel %vm6446_vm9, %v7541_v60, %v6638_v58  ;;  %1905 = vst [vmem:[#allocation2 + $0x104] sm:$0x1] %v1904_v63  ;;  %v1919_v27 = vsel %vm6434_vm8, %v7545_v9, %v1918_v7  ;;  %v1922_v58 = vsel %vm6446_vm9, %v7546_v3, %v1921_v53  ;;  %v1931_v57 = vsel %vm6434_vm8, %v7548_v17, %v1930_v34  ;;  %v1954_v43 = vld [vmem:[#allocation2 + $0xa8] sm:$0xf]  ;;  %v1955_v15 = vld [vmem:[#allocation2 + $0xac] sm:$0x1] }
 0x37a   : > { %1911 = vst [vmem:[#allocation2 + $0x10c] sm:$0x1] %v1910_v10  ;;  %v1916_v18 = vsel %vm6446_vm9, %v7544_v44, %v1915_v48  ;;  %1920 = vst [vmem:[#allocation2 + $0x118] sm:$0xf] %v1919_v27  ;;  %v1928_v48 = vsel %vm6446_vm9, %v7547_v55, %v1927_v19  ;;  %v7550_v51 = vrot.slane %v7549_v32, 4  ;;  %v7551_v34 = vld [vmem:[#allocation6_spill] sm:$0xff] }
 0x37b   : > { %1917 = vst [vmem:[#allocation2 + $0x114] sm:$0x1] %v1916_v18  ;;  %1923 = vst [vmem:[#allocation2 + $0x11c] sm:$0x1] %v1922_v58  ;;  %v7552_v7 = vshll.u32 %v7551_v34, 16  ;;  %v7553_v6 = vld [vmem:[#allocation5_spill] sm:$0xff] }
 0x37c   : > { %v1934_v16 = vsel %vm6446_vm9, %v7550_v51, %v1933_v0  ;;  %1929 = vst [vmem:[#allocation2 + $0x124] sm:$0x1] %v1928_v48  ;;  %1932 = vst [vmem:[#allocation2 + $0x128] sm:$0xf] %v1931_v57  ;;  %v7554_v42 = vld [vmem:[#allocation4_spill] sm:$0xff]  ;;  %v1986_v22 = vshrl.u32 %v1954_v43, 16 }
 0x37d   : > { %1935 = vst [vmem:[#allocation2 + $0x12c] sm:$0x1] %v1934_v16  ;;  %v1983_v53 = vrot.slane %v7552_v7, 5  ;;  %1938 = vst [vmem:[#allocation2 + $0x130] sm:$0xf] %v1937_v61  ;;  %v7555_v45 = vor.u32 %v7553_v6, %v7554_v42  ;;  %v1989_v1 = vshll.u32 %v1954_v43, 16 }
 0x37e   : > { %1941 = vst [vmem:[#allocation2 + $0x134] sm:$0x1] %v1940_v38  ;;  %v1995_v36 = vshll.u32 %v1955_v15, 16  ;;  %v1956_v13 = vld [vmem:[#allocation2 + $0xb0] sm:$0xf]  ;;  %v1988_v40 = vrot.slane %v1986_v22, 4 }
 0x37f   : > { %v1979_v59 = vrot.slane %v7555_v45, 4  ;;  %v1957_v41 = vld [vmem:[#allocation2 + $0xb4] sm:$0x1]  ;;  %v1958_v52 = vld [vmem:[#allocation2 + $0xb8] sm:$0xf]  ;;  %v1991_v54 = vrot.slane %v1989_v1, 5 }
 0x380   : > { %v1959_v12 = vld [vmem:[#allocation2 + $0xbc] sm:$0x1]  ;;  %v2000_v26 = vshrl.u32 %v1956_v13, 16  ;;  %v2003_v0 = vshll.u32 %v1956_v13, 16  ;;  %v2009_v56 = vshll.u32 %v1957_v41, 16  ;;  %v2014_v19 = vshrl.u32 %v1958_v52, 16 }
 0x381   : > { %v2017_v11 = vshll.u32 %v1958_v52, 16  ;;  %v1960_v21 = vld [vmem:[#allocation2 + $0xc0] sm:$0xf]  ;;  %v1984_v29 = vsel %vm6779_vm12, %v1979_v59, %v1983_v53  ;;  %v1992_v47 = vor.u32 %v1991_v54, %v1988_v40  ;;  %v1997_v39 = vrot.slane %v1995_v36, 5  ;;  %v1961_v31 = vld [vmem:[#allocation2 + $0xc4] sm:$0x1] }
 0x382   : > { %v2002_v28 = vrot.slane %v2000_v26, 4  ;;  %v1962_v25 = vld [vmem:[#allocation2 + $0xc8] sm:$0xf]  ;;  %v2005_v35 = vrot.slane %v2003_v0, 5  ;;  %v2016_v8 = vrot.slane %v2014_v19, 4  ;;  %v2023_v50 = vshll.u32 %v1959_v12, 16 }
 0x383   : > { %v2019_v2 = vrot.slane %v2017_v11, 5  ;;  %v1993_v20 = vrot.slane %v1992_v47, 4  ;;  %v2011_v30 = vrot.slane %v2009_v56, 5  ;;  %v2028_v23 = vshrl.u32 %v1960_v21, 16  ;;  %v1963_v49 = vld [vmem:[#allocation2 + $0xcc] sm:$0x1] }
 0x384   : > { %v2031_v33 = vshll.u32 %v1960_v21, 16  ;;  %v2006_v63 = vor.u32 %v2005_v35, %v2002_v28  ;;  %v2037_v37 = vshll.u32 %v1961_v31, 16  ;;  %v2042_v60 = vshrl.u32 %v1962_v25, 16  ;;  %v1964_v44 = vld [vmem:[#allocation2 + $0xd0] sm:$0xf]  ;;  %v5429_v7 = vld [vmem:[%s7424_s2 + $0x8] sm:$0xff]  }
 0x385   : > { %v2020_v62 = vor.u32 %v2019_v2, %v2016_v8  ;;  %v1998_v10 = vsel %vm6779_vm12, %v1993_v20, %v1997_v39  ;;  %v2030_v5 = vrot.slane %v2028_v23, 4  ;;  %v2045_v4 = vshll.u32 %v1962_v25, 16  ;;  %v1966_v17 = vld [vmem:[#allocation2 + $0xd8] sm:$0xf]  ;;  %v1965_v51 = vld [vmem:[#allocation2 + $0xd4] sm:$0x1] }
 0x386   : > { %v2033_v24 = vrot.slane %v2031_v33, 5  ;;  %v4698_v18 = vcombine.low %v1984_v29, %v1998_v10  ;;  %v2007_v9 = vrot.slane %v2006_v63, 4  ;;  %v2025_v3 = vrot.slane %v2023_v50, 5  ;;  %v1967_v6 = vld [vmem:[#allocation2 + $0xdc] sm:$0x1]  ;;  %v5470_v41 = vld [vmem:[%s7424_s2] sm:$0xff]  }
 0x387   : > { %v2021_v27 = vrot.slane %v2020_v62, 4  ;;  %v2044_v14 = vrot.slane %v2042_v60, 4  ;;  %v2047_v55 = vrot.slane %v2045_v4, 5  ;;  %v2051_v48 = vshll.u32 %v1963_v49, 16  ;;  %v1943_v54 = vld [vmem:[#allocation2 + $0xf0] sm:$0xf] }
 0x388   : > { %v2034_v58 = vor.u32 %v2033_v24, %v2030_v5  ;;  %5076 = vmatprep.mubr.msk.bf16.mxu1 %vm886_vm4, %v4698_v18  ;;  %v2012_v57 = vsel %vm6779_vm12, %v2007_v9, %v2011_v30  ;;  %v2056_v16 = vshrl.u32 %v1964_v44, 16  ;;  %v2059_v61 = vshll.u32 %v1964_v44, 16  ;;  %v5431_v56 = vld [vmem:[%s7424_s2 + $0x20] sm:$0xff]   ;;  %v1944_v47 = vld [vmem:[#allocation2 + $0xf8] sm:$0xf] }
 0x389   : > { %v2026_v32 = vsel %vm6779_vm12, %v2021_v27, %v2025_v3  ;;  %v2039_v15 = vrot.slane %v2037_v37, 5  ;;  %v2048_v34 = vor.u32 %v2047_v55, %v2044_v14  ;;  %v2053_v53 = vrot.slane %v2051_v48, 5  ;;  %v1945_v33 = vld [vmem:[#allocation2 + $0x100] sm:$0xf]  ;;  %v2083_v63 = vld [vmem:[#allocation2 + $0xf4] sm:$0x1] }
 0x38a   : > { %v4699_v38 = vcombine.low %v2012_v57, %v2026_v32  ;;  %v2035_v43 = vrot.slane %v2034_v58, 4  ;;  %v2058_v42 = vrot.slane %v2056_v16, 4  ;;  %v2061_v45 = vrot.slane %v2059_v61, 5  ;;  %v1946_v49 = vld [vmem:[#allocation2 + $0x108] sm:$0xf] }
 0x38b   : > { %v2070_v59 = vshrl.u32 %v1966_v17, 16  ;;  %v2049_v1 = vrot.slane %v2048_v34, 4  ;;  %v2065_v36 = vshll.u32 %v1965_v51, 16  ;;  %v2073_v13 = vshll.u32 %v1966_v17, 16  ;;  %v1947_v10 = vld [vmem:[#allocation2 + $0x110] sm:$0xf] }
 0x38c   : > { %5077 = vmatmul.mubr.msk.bf16.vlgmr.msra.gmra.mrb[4].mxu1 %vm886_vm4, %v4699_v38  ;;  %v2040_v22 = vsel %vm6779_vm12, %v2035_v43, %v2039_v15  ;;  %v2062_v52 = vor.u32 %v2061_v45, %v2058_v42  ;;  %v2079_v0 = vshll.u32 %v1967_v6, 16  ;;  %v2092_v39 = vshrl.u32 %v1943_v54, 16  ;;  %v1948_v24 = vld [vmem:[#allocation2 + $0x118] sm:$0xf]  ;;  %v2084_v14 = vld [vmem:[#allocation2 + $0xfc] sm:$0x1] }
 0x38d   : > { %5085 = vmatpush3.bf16.msra.mxu1 %v5470_v41  ;;  %v2072_v40 = vrot.slane %v2070_v59, 4  ;;  %v2054_v12 = vsel %vm6779_vm12, %v2049_v1, %v2053_v53  ;;  %v2075_v26 = vrot.slane %v2073_v13, 5  ;;  %v2067_v21 = vrot.slane %v2065_v36, 5  ;;  %v1949_v17 = vld [vmem:[#allocation2 + $0x120] sm:$0xf]  ;;  %v5434_v16 = vld [vmem:[%s7424_s2 + $0x28] sm:$0xff]  }
 0x38e   : > { %5086 = vmatprep.subr.bf16.mxu1 %v5429_v7  ;;  %v4700_v19 = vcombine.low %v2040_v22, %v2054_v12  ;;  %v2063_v11 = vrot.slane %v2062_v52, 4  ;;  %v2095_v28 = vshll.u32 %v1943_v54, 16  ;;  %v2081_v35 = vrot.slane %v2079_v0, 5  ;;  %v2085_v12 = vld [vmem:[#allocation2 + $0x104] sm:$0x1] }
 0x38f   : > { %v2076_v29 = vor.u32 %v2075_v26, %v2072_v40  ;;  %v2106_v8 = vshrl.u32 %v1944_v47, 16  ;;  %v2109_v2 = vshll.u32 %v1944_v47, 16  ;;  %v2094_v20 = vrot.slane %v2092_v39, 4  ;;  %v2086_v26 = vld [vmem:[#allocation2 + $0x10c] sm:$0x1] }
 0x390   : > { %5080 = vmatprep.mubr.msk.bf16.mxu1 %vm886_vm4, %v4700_v19  ;;  %v2068_v31 = vsel %vm6779_vm12, %v2063_v11, %v2067_v21  ;;  %v2097_v30 = vrot.slane %v2095_v28, 5  ;;  %v4708_v62 = vcombine.low %v1943_v54, %v1944_v47  ;;  %v2120_v5 = vshrl.u32 %v1945_v33, 16  ;;  %v5436_v54 = vld [vmem:[%s7424_s2 + $0x30] sm:$0xff]  }
 0x391   : > { %5087 = vmatpush3.bf16.msra.mxu1 %v5429_v7  ;;  %v2077_v25 = vrot.slane %v2076_v29, 4  ;;  %v2108_v37 = vrot.slane %v2106_v8, 4  ;;  %v2111_v60 = vrot.slane %v2109_v2, 5  ;;  %v2101_v44 = vshll.u32 %v2083_v63, 16  ;;  %v1950_v7 = vld [vmem:[#allocation2 + $0x128] sm:$0xf] }
 0x392   : > { %5096 = vmatprep.subr.bf16.mxu1 %v5431_v56  ;;  %v2098_v4 = vor.u32 %v2097_v30, %v2094_v20  ;;  %v2123_v18 = vshll.u32 %v1945_v33, 16  ;;  %v2134_v9 = vshrl.u32 %v1946_v49, 16  ;;  %v2137_v27 = vshll.u32 %v1946_v49, 16  ;;  %v2087_v29 = vld [vmem:[#allocation2 + $0x114] sm:$0x1] }
 0x393   : > { %v2082_v50 = vsel %vm6779_vm12, %v2077_v25, %v2081_v35  ;;  %v2148_v3 = vshrl.u32 %v1947_v10, 16  ;;  %v2151_v58 = vshll.u32 %v1947_v10, 16  ;;  %v2162_v55 = vshrl.u32 %v1948_v24, 16 }
 0x394   : > { %v4701_v23 = vcombine.low %v2068_v31, %v2082_v50  ;;  %v2165_v48 = vshll.u32 %v1948_v24, 16  ;;  %v2112_v57 = vor.u32 %v2111_v60, %v2108_v37  ;;  %v2122_v32 = vrot.slane %v2120_v5, 4  ;;  %v2089_v37 = vld [vmem:[#allocation2 + $0x124] sm:$0x1]  ;;  %v2090_v60 = vld [vmem:[#allocation2 + $0x12c] sm:$0x1] }
 0x395   : > { %v4709_v51 = vcombine.low %v1945_v33, %v1946_v49  ;;  %v2099_v61 = vrot.slane %v2098_v4, 4  ;;  %v2103_v38 = vrot.slane %v2101_v44, 5  ;;  %v2125_v43 = vrot.slane %v2123_v18, 5 }
 0x396   : > { %5081 = vmatmul.mubr.msk.bf16.gmra.mrb[8].mxu1 %vm886_vm4, %v4701_v23  ;;  %v2136_v15 = vrot.slane %v2134_v9, 4  ;;  %v2139_v34 = vrot.slane %v2137_v27, 5  ;;  %v2115_v53 = vshll.u32 %v2084_v14, 16  ;;  %v2150_v6 = vrot.slane %v2148_v3, 4 }
 0x397   : > { %5088 = vmatprep.mubr.msk.bf16.mxu1 %vm886_vm4, %v4708_v62  ;;  %v2153_v42 = vrot.slane %v2151_v58, 5  ;;  %v4710_v45 = vcombine.low %v1947_v10, %v1948_v24  ;;  %v2176_v59 = vshrl.u32 %v1949_v17, 16  ;;  %v2164_v22 = vrot.slane %v2162_v55, 4 }
 0x398   : > { %v2167_v1 = vrot.slane %v2165_v48, 5  ;;  %v2179_v36 = vshll.u32 %v1949_v17, 16  ;;  %v2113_v13 = vrot.slane %v2112_v57, 4  ;;  %v2190_v41 = vshrl.u32 %v1950_v7, 16 }
 0x399   : > { %v2193_v52 = vshll.u32 %v1950_v7, 16  ;;  %v2117_v40 = vrot.slane %v2115_v53, 5  ;;  %v2178_v0 = vrot.slane %v2176_v59, 4  ;;  %v2104_v19 = vsel %vm6779_vm12, %v2099_v61, %v2103_v38  ;;  %v2212_v38 = vld [vmem:[#allocation2 + $0x8] sm:$0xf] }
 0x39a   : > { %v2126_v11 = vor.u32 %v2125_v43, %v2122_v32  ;;  %v2140_v21 = vor.u32 %v2139_v34, %v2136_v15  ;;  %v2181_v47 = vrot.slane %v2179_v36, 5  ;;  %v2154_v28 = vor.u32 %v2153_v42, %v2150_v6  ;;  %v5437_v32 = vld [vmem:[%s7424_s2 + $0x38] sm:$0xff]   ;;  %v2214_v43 = vld [vmem:[#allocation2 + $0x10] sm:$0xf]  ;;  %v6849_v36 = vld [vmem:[#allocation2 + $0x68] sm:$0xf] }
 0x39b   : > { %v2118_v39 = vsel %vm6779_vm12, %v2113_v13, %v2117_v40  ;;  %v2168_v31 = vor.u32 %v2167_v1, %v2164_v22  ;;  %v2192_v25 = vrot.slane %v2190_v41, 4  ;;  %v2195_v35 = vrot.slane %v2193_v52, 5  ;;  %v2204_v59 = vld [vmem:[#allocation2 + $0x58] sm:$0xf]  ;;  %v2205_v22 = vld [vmem:[#allocation2 + $0x60] sm:$0xf] }
 0x39c   : > { %v2129_v8 = vshll.u32 %v2085_v12, 16  ;;  %v2143_v2 = vshll.u32 %v2086_v26, 16  ;;  %v4711_v50 = vcombine.low %v1949_v17, %v1950_v7  ;;  %v2157_v20 = vshll.u32 %v2087_v29, 16  ;;  %v6847_v7 = vld [vmem:[%s7424_s2 + $0x40] sm:$0xff]   ;;  %v2216_v13 = vld [vmem:[#allocation2 + $0x18] sm:$0xf] }
 0x39d   : > { %v4718_v23 = vcombine.low %v2104_v19, %v2118_v39  ;;  %v2127_v33 = vrot.slane %v2126_v11, 4  ;;  %v2141_v63 = vrot.slane %v2140_v21, 4  ;;  %v2155_v62 = vrot.slane %v2154_v28, 4  ;;  %v6852_v41 = vld [vmem:[#allocation2 + $0x70] sm:$0xf] }
 0x39e   : > { %5089 = vmatmul.mubr.msk.bf16.vlgmr.msra.gmra.mrb[4].mxu1 %vm886_vm4, %v4709_v51  ;;  %v2169_v49 = vrot.slane %v2168_v31, 4  ;;  %v2131_v10 = vrot.slane %v2129_v8, 5  ;;  %v2145_v5 = vrot.slane %v2143_v2, 5  ;;  %v2182_v24 = vor.u32 %v2181_v47, %v2178_v0  ;;  %v2213_v52 = vld [vmem:[#allocation2 + $0xc] sm:$0x1] }
 0x39f   : > { %5097 = vmatpush3.bf16.msra.mxu1 %v5431_v56  ;;  %5092 = vmatprep.mubr.msk.bf16.mxu1 %vm886_vm4, %v4710_v45  ;;  %v2088_v56 = vld [vmem:[#allocation2 + $0x11c] sm:$0x1]  ;;  %v2196_v4 = vor.u32 %v2195_v35, %v2192_v25  ;;  %v2159_v44 = vrot.slane %v2157_v20, 5  ;;  %v2185_v3 = vshll.u32 %v2089_v37, 16  ;;  %v2199_v58 = vshll.u32 %v2090_v60, 16 }
 0x3a0   : > { %5098 = vmatprep.subr.bf16.mxu1 %v5434_v16  ;;  %v2171_v30 = vshll.u32 %v2088_v56, 16  ;;  %v2132_v9 = vsel %vm6779_vm12, %v2127_v33, %v2131_v10  ;;  %v2146_v27 = vsel %vm6779_vm12, %v2141_v63, %v2145_v5  ;;  %v2183_v48 = vrot.slane %v2182_v24, 4  ;;  %v2215_v40 = vld [vmem:[#allocation2 + $0x14] sm:$0x1]  ;;  %v2218_v21 = vld [vmem:[#allocation2 + $0x20] sm:$0xf] }
 0x3a1   : > { %v2160_v14 = vsel %vm6779_vm12, %v2155_v62, %v2159_v44  ;;  %v2197_v17 = vrot.slane %v2196_v4, 4  ;;  %v4719_v57 = vcombine.low %v2132_v9, %v2146_v27  ;;  %v2201_v61 = vrot.slane %v2199_v58, 5  ;;  %v2220_v29 = vld [vmem:[#allocation2 + $0x28] sm:$0xf]  ;;  %v6855_v47 = vld [vmem:[#allocation2 + $0x78] sm:$0xf] }
 0x3a2   : > { %v2173_v18 = vrot.slane %v2171_v30, 5  ;;  %v2229_v53 = vshrl.u32 %v2212_v38, 16  ;;  %v2232_v6 = vshll.u32 %v2212_v38, 16  ;;  %v2243_v42 = vshrl.u32 %v2214_v43, 16  ;;  %v6857_v39 = vld [vmem:[#allocation2 + $0x80] sm:$0xf] }
 0x3a3   : > { %5099 = vmatpush3.bf16.msra.mxu1 %v5434_v16  ;;  %v2187_v16 = vrot.slane %v2185_v3, 5  ;;  %v2202_v34 = vsel %vm6779_vm12, %v2197_v17, %v2201_v61  ;;  %v2246_v45 = vshll.u32 %v2214_v43, 16  ;;  %v2349_v19 = vshrl.u32 %v2204_v59, 16  ;;  %v2222_v8 = vld [vmem:[#allocation2 + $0x30] sm:$0xf] }
 0x3a4   : > { %5108 = vmatprep.subr.bf16.mxu1 %v5436_v54  ;;  %v2174_v55 = vsel %vm6779_vm12, %v2169_v49, %v2173_v18  ;;  %v2234_v12 = vrot.slane %v2232_v6, 5  ;;  %v2245_v26 = vrot.slane %v2243_v42, 4  ;;  %v4728_v11 = vcombine.low %v2204_v59, %v2205_v22  ;;  %v5442_v18 = vld [vmem:[%s7424_s2 + $0x48] sm:$0xff]  }
 0x3a5   : > { %v4720_v51 = vcombine.low %v2160_v14, %v2174_v55  ;;  %v2188_v15 = vsel %vm6779_vm12, %v2183_v48, %v2187_v16  ;;  %v2248_v0 = vrot.slane %v2246_v45, 5  ;;  %v2352_v56 = vshll.u32 %v2204_v59, 16  ;;  %v2221_v45 = vld [vmem:[#allocation2 + $0x2c] sm:$0x1] }
 0x3a6   : > { %5093 = vmatmul.mubr.msk.bf16.gmra.mrb[8].mxu1 %vm886_vm4, %v4711_v50  ;;  %v4721_v1 = vcombine.low %v2188_v15, %v2202_v34  ;;  %v2363_v28 = vshrl.u32 %v2205_v22, 16  ;;  %v4729_v31 = vcombine.low %v6849_v36, %v6852_v41  ;;  %v2257_v25 = vshrl.u32 %v2216_v13, 16  ;;  %v2226_v15 = vld [vmem:[#allocation2 + $0x40] sm:$0xf] }
 0x3a7   : > { %5100 = vmatprep.mubr.msk.bf16.mxu1 %vm886_vm4, %v4718_v23  ;;  %v2260_v35 = vshll.u32 %v2216_v13, 16  ;;  %v2249_v50 = vor.u32 %v2248_v0, %v2245_v26  ;;  %v2271_v20 = vshrl.u32 %v2218_v21, 16  ;;  %v2274_v30 = vshll.u32 %v2218_v21, 16 }
 0x3a8   : > { %v6862_v23 = vrot.slane %v2349_v19, 4  ;;  %v4730_v33 = vcombine.low %v6855_v47, %v6857_v39  ;;  %v2238_v63 = vshll.u32 %v2213_v52, 16  ;;  %v2252_v62 = vshll.u32 %v2215_v40, 16  ;;  %v2223_v40 = vld [vmem:[#allocation2 + $0x34] sm:$0x1] }
 0x3a9   : > { %v2285_v49 = vshrl.u32 %v2220_v29, 16  ;;  %v2288_v37 = vshll.u32 %v2220_v29, 16  ;;  %v2299_v60 = vshrl.u32 %v2222_v8, 16  ;;  %v2302_v10 = vshll.u32 %v2222_v8, 16 }
 0x3aa   : > { %v6866_v5 = vrot.slane %v2352_v56, 5  ;;  %v2366_v24 = vshll.u32 %v2205_v22, 16  ;;  %v2259_v4 = vrot.slane %v2257_v25, 4  ;;  %v2262_v44 = vrot.slane %v2260_v35, 5  ;;  %v6882_v22 = vld [vmem:[#allocation2 + $0x88] sm:$0xf] }
 0x3ab   : > { %v2250_v27 = vrot.slane %v2249_v50, 4  ;;  %v2273_v3 = vrot.slane %v2271_v20, 4  ;;  %v2276_v58 = vrot.slane %v2274_v30, 5  ;;  %v2377_v14 = vshrl.u32 %v6849_v36, 16 }
 0x3ac   : > { %v2380_v55 = vshll.u32 %v6849_v36, 16  ;;  %v2240_v48 = vrot.slane %v2238_v63, 5  ;;  %v2254_v17 = vrot.slane %v2252_v62, 5  ;;  %v2287_v16 = vrot.slane %v2285_v49, 4 }
 0x3ad   : > { %v2290_v61 = vrot.slane %v2288_v37, 5  ;;  %v2301_v38 = vrot.slane %v2299_v60, 4  ;;  %v2304_v43 = vrot.slane %v2302_v10, 5  ;;  %v6874_v34 = vrot.slane %v2363_v28, 4 }
 0x3ae   : > { %5101 = vmatmul.mubr.msk.bf16.vlgmr.msra.gmra.mrb[4].mxu1 %vm886_vm4, %v4719_v57  ;;  %v2224_v57 = vld [vmem:[#allocation2 + $0x38] sm:$0xf]  ;;  %v2391_v6 = vshrl.u32 %v6852_v41, 16  ;;  %v2263_v42 = vor.u32 %v2262_v44, %v2259_v4  ;;  %v2394_v59 = vshll.u32 %v6852_v41, 16  ;;  %v2255_v13 = vsel %vm6779_vm12, %v2250_v27, %v2254_v17  ;;  %v2225_v44 = vld [vmem:[#allocation2 + $0x3c] sm:$0x1] }
 0x3af   : > { %5109 = vmatpush3.bf16.msra.mxu1 %v5436_v54  ;;  %5104 = vmatprep.mubr.msk.bf16.mxu1 %vm886_vm4, %v4720_v51  ;;  %v2231_v54 = vrot.slane %v2229_v53, 4  ;;  %v2219_v51 = vld [vmem:[#allocation2 + $0x24] sm:$0x1]  ;;  %v6876_v53 = vrot.slane %v2366_v24, 5  ;;  %v2277_v52 = vor.u32 %v2276_v58, %v2273_v3  ;;  %v2316_v41 = vshll.u32 %v2224_v57, 16 }
 0x3b0   : > { %5110 = vmatprep.subr.bf16.mxu1 %v5437_v32  ;;  %v2330_v26 = vshll.u32 %v2226_v15, 16  ;;  %v6895_v0 = vrot.slane %v2377_v14, 4  ;;  %v6897_v19 = vrot.slane %v2380_v55, 5  ;;  %v2305_v21 = vor.u32 %v2304_v43, %v2301_v38  ;;  %v2227_v58 = vld [vmem:[#allocation2 + $0x44] sm:$0x1] }
 0x3b1   : > { %v2235_v2 = vor.u32 %v2234_v12, %v2231_v54  ;;  %v2313_v54 = vshrl.u32 %v2224_v57, 16  ;;  %v2327_v12 = vshrl.u32 %v2226_v15, 16  ;;  %v2264_v56 = vrot.slane %v2263_v42, 4  ;;  %v2340_v17 = vld [vmem:[#allocation2 + $0x5c] sm:$0x1] }
 0x3b2   : > { %v2278_v35 = vrot.slane %v2277_v52, 4  ;;  %v2294_v8 = vshll.u32 %v2221_v45, 16  ;;  %v2318_v20 = vrot.slane %v2316_v41, 5  ;;  %v6902_v63 = vrot.slane %v2391_v6, 4  ;;  %v2341_v57 = vld [vmem:[#allocation2 + $0x64] sm:$0x1] }
 0x3b3   : > { %5111 = vmatpush3.bf16.msra.mxu1 %v5437_v32  ;;  %v2236_v9 = vrot.slane %v2235_v2, 4  ;;  %v2217_v32 = vld [vmem:[#allocation2 + $0x1c] sm:$0x1]  ;;  %v2308_v2 = vshll.u32 %v2223_v40, 16  ;;  %v2315_v50 = vrot.slane %v2313_v54, 4  ;;  %v2329_v30 = vrot.slane %v2327_v12, 4 }
 0x3b4   : > { %5120 = vmatprep.subr.bf16.mxu1 %v6847_v7  ;;  %v2266_v28 = vshll.u32 %v2217_v32, 16  ;;  %v2405_v62 = vshrl.u32 %v6855_v47, 16  ;;  %v2306_v37 = vrot.slane %v2305_v21, 4  ;;  %v6906_v60 = vrot.slane %v2394_v59, 5  ;;  %v5445_v45 = vld [vmem:[%s7424_s2 + $0x58] sm:$0xff]  }
 0x3b5   : > { %v2241_v36 = vsel %vm6779_vm12, %v2236_v9, %v2240_v48  ;;  %v2408_v10 = vshll.u32 %v6855_v47, 16  ;;  %v2422_v9 = vshll.u32 %v6857_v39, 16  ;;  %v2296_v27 = vrot.slane %v2294_v8, 5  ;;  %v2342_v21 = vld [vmem:[#allocation2 + $0x6c] sm:$0x1] }
 0x3b6   : > { %5105 = vmatmul.mubr.msk.bf16.gmra.mrb[8].mxu1 %vm886_vm4, %v4721_v1  ;;  %v6884_v1 = vld [vmem:[#allocation2 + $0x90] sm:$0xf]  ;;  %v4738_v25 = vcombine.low %v2241_v36, %v2255_v13  ;;  %v2268_v24 = vrot.slane %v2266_v28, 5  ;;  %v2310_v3 = vrot.slane %v2308_v2, 5  ;;  %v2319_v48 = vor.u32 %v2318_v20, %v2315_v50  ;;  %v2344_v2 = vld [vmem:[#allocation2 + $0x7c] sm:$0x1] }
 0x3b7   : > { %5112 = vmatprep.mubr.msk.bf16.mxu1 %vm886_vm4, %v4728_v11  ;;  %v2291_v11 = vor.u32 %v2290_v61, %v2287_v16  ;;  %v4731_v29 = vcombine.low %v6882_v22, %v6884_v1  ;;  %v2369_v16 = vor.u32 %v6876_v53, %v6874_v34  ;;  %v2407_v61 = vrot.slane %v2405_v62, 4  ;;  %v2345_v50 = vld [vmem:[#allocation2 + $0x84] sm:$0x1] }
 0x3b8   : > { %v2269_v14 = vsel %vm6779_vm12, %v2264_v56, %v2268_v24  ;;  %v2433_v38 = vshrl.u32 %v6882_v22, 16  ;;  %v2322_v43 = vshll.u32 %v2225_v44, 16  ;;  %v2336_v15 = vshll.u32 %v2227_v58, 16 }
 0x3b9   : > { %v2292_v49 = vrot.slane %v2291_v11, 4  ;;  %v2436_v6 = vshll.u32 %v6882_v22, 16  ;;  %v2358_v59 = vshll.u32 %v2340_v17, 16  ;;  %v2372_v36 = vshll.u32 %v2341_v57, 16  ;;  %v6933_v22 = vld [vmem:[%s7424_s2 + $0x60] sm:$0xff]  }
 0x3ba   : > { %v2410_v13 = vrot.slane %v2408_v10, 5  ;;  %v2424_v34 = vrot.slane %v2422_v9, 5  ;;  %v2370_v54 = vrot.slane %v2369_v16, 4  ;;  %v2447_v41 = vshrl.u32 %v6884_v1, 16 }
 0x3bb   : > { %v2297_v32 = vsel %vm6779_vm12, %v2292_v49, %v2296_v27  ;;  %v2450_v12 = vshll.u32 %v6884_v1, 16  ;;  %v2338_v11 = vrot.slane %v2336_v15, 5  ;;  %v2438_v56 = vrot.slane %v2436_v6, 5  ;;  %v2346_v27 = vld [vmem:[#allocation2 + $0x8c] sm:$0x1] }
 0x3bc   : > { %v2360_v28 = vrot.slane %v2358_v59, 5  ;;  %v2383_v1 = vor.u32 %v6897_v19, %v6895_v0  ;;  %v2449_v49 = vrot.slane %v2447_v41, 4  ;;  %v2386_v10 = vshll.u32 %v2342_v21, 16  ;;  %v5447_v6 = vld [vmem:[%s7424_s2 + $0x68] sm:$0xff]   ;;  %v2461_v41 = vld [vmem:[#allocation2 + $0xf8] sm:$0xf] }
 0x3bd   : > { %v2414_v0 = vshll.u32 %v2344_v2, 16  ;;  %v2428_v19 = vshll.u32 %v2345_v50, 16  ;;  %v2610_v2 = vshll.u32 %v2461_v41, 16 }
 0x3be   : > { %5113 = vmatmul.mubr.msk.bf16.vlgmr.msra.gmra.mrb[4].mxu1 %vm886_vm4, %v4729_v31  ;;  %v2280_v31 = vshll.u32 %v2219_v51, 16  ;;  %v2311_v51 = vsel %vm6779_vm12, %v2306_v37, %v2310_v3  ;;  %v2452_v37 = vrot.slane %v2450_v12, 5  ;;  %v2347_v3 = vld [vmem:[#allocation2 + $0x94] sm:$0x1]  ;;  %v2388_v58 = vrot.slane %v2386_v10, 5 }
 0x3bf   : > { %5121 = vmatpush3.bf16.msra.mxu1 %v6847_v7  ;;  %5116 = vmatprep.mubr.msk.bf16.mxu1 %vm886_vm4, %v4730_v33  ;;  %v6893_v7 = vld [vmem:[%s7424_s2 + $0x50] sm:$0xff]   ;;  %v2332_v33 = vrot.slane %v2330_v26, 5  ;;  %v4740_v52 = vcombine.low %v2297_v32, %v2311_v51  ;;  %v2324_v26 = vrot.slane %v2322_v43, 5  ;;  %v2430_v17 = vrot.slane %v2428_v19, 5 }
 0x3c0   : > { %5122 = vmatprep.subr.bf16.mxu1 %v5442_v18  ;;  %v2282_v4 = vrot.slane %v2280_v31, 5  ;;  %v2374_v31 = vrot.slane %v2372_v36, 5  ;;  %v2442_v51 = vshll.u32 %v2346_v27, 16  ;;  %v2470_v36 = vld [vmem:[#allocation2 + $0xa8] sm:$0xf] }
 0x3c1   : > { %v2333_v47 = vor.u32 %v2332_v33, %v2329_v30  ;;  %v2411_v33 = vor.u32 %v2410_v13, %v2407_v61  ;;  %v2472_v13 = vld [vmem:[#allocation2 + $0xb0] sm:$0xf] }
 0x3c2   : > { %v2283_v55 = vsel %vm6779_vm12, %v2278_v35, %v2282_v4  ;;  %v2375_v30 = vsel %vm6779_vm12, %v2370_v54, %v2374_v31  ;;  %v2504_v54 = vshll.u32 %v2472_v13, 16 }
 0x3c3   : > { %5123 = vmatpush3.bf16.msra.mxu1 %v5442_v18  ;;  %v2419_v18 = vshrl.u32 %v6857_v39, 16  ;;  %v2355_v39 = vor.u32 %v6866_v5, %v6862_v23  ;;  %v4739_v42 = vcombine.low %v2269_v14, %v2283_v55  ;;  %v2320_v23 = vrot.slane %v2319_v48, 4 }
 0x3c4   : > { %5132 = vmatprep.subr.bf16.mxu1 %v6893_v7  ;;  %v2334_v5 = vrot.slane %v2333_v47, 4  ;;  %v2453_v48 = vor.u32 %v2452_v37, %v2449_v49  ;;  %v2416_v47 = vrot.slane %v2414_v0, 5  ;;  %v3744_v0 = vld [vmem:[%s7429_s7 + $0x8] sm:$0xff] }
 0x3c5   : > { %v2421_v40 = vrot.slane %v2419_v18, 4  ;;  %v2356_v53 = vrot.slane %v2355_v39, 4  ;;  %v2325_v35 = vsel %vm6779_vm12, %v2320_v23, %v2324_v26  ;;  %v2412_v18 = vrot.slane %v2411_v33, 4  ;;  %v2480_v33 = vld [vmem:[#allocation2 + $0xd0] sm:$0xf] }
 0x3c6   : > { %5117 = vmatmul.mubr.msk.bf16.gmra.mrb[8].mxu1 %vm886_vm4, %v4731_v29  ;;  %v2435_v29 = vrot.slane %v2433_v38, 4  ;;  %v2339_v8 = vsel %vm6779_vm12, %v2334_v5, %v2338_v11  ;;  %v2456_v39 = vshll.u32 %v2347_v3, 16  ;;  %v2454_v43 = vrot.slane %v2453_v48, 4  ;;  %v6975_v5 = vld [vmem:[%s7424_s2 + $0x70] sm:$0xff]  }
 0x3c7   : > { %5124 = vmatprep.mubr.msk.bf16.mxu1 %vm886_vm4, %v4738_v25  ;;  %v2343_v25 = vld [vmem:[#allocation2 + $0x74] sm:$0x1]  ;;  %v2361_v20 = vsel %vm6779_vm12, %v2356_v53, %v2360_v28  ;;  %v2425_v62 = vor.u32 %v2424_v34, %v2421_v40  ;;  %v4741_v4 = vcombine.low %v2325_v35, %v2339_v8  ;;  %v2417_v16 = vsel %vm6779_vm12, %v2412_v18, %v2416_v47  ;;  %v6982_v35 = vld [vmem:[#allocation2 + $0x108] sm:$0xf]  ;;  %v2471_v8 = vld [vmem:[#allocation2 + $0xac] sm:$0x1] }
 0x3c8   : > { %v2400_v24 = vshll.u32 %v2343_v25, 16  ;;  %v2439_v55 = vor.u32 %v2438_v56, %v2435_v29  ;;  %v2458_v59 = vrot.slane %v2456_v39, 5  ;;  %v2487_v40 = vshrl.u32 %v2470_v36, 16  ;;  %v2474_v56 = vld [vmem:[#allocation2 + $0xb8] sm:$0xf] }
 0x3c9   : > { %v2426_v9 = vrot.slane %v2425_v62, 4  ;;  %v2490_v34 = vshll.u32 %v2470_v36, 16  ;;  %v2501_v53 = vshrl.u32 %v2472_v13, 16  ;;  %v2506_v29 = vrot.slane %v2504_v54, 5  ;;  %v2476_v25 = vld [vmem:[#allocation2 + $0xc0] sm:$0xf] }
 0x3ca   : > { %v2402_v14 = vrot.slane %v2400_v24, 5  ;;  %v2440_v38 = vrot.slane %v2439_v55, 4  ;;  %v2459_v23 = vsel %vm6779_vm12, %v2454_v43, %v2458_v59  ;;  %v2489_v26 = vrot.slane %v2487_v40, 4  ;;  %v6986_v62 = vld [vmem:[#allocation2 + $0x110] sm:$0xf] }
 0x3cb   : > { %v2431_v61 = vsel %vm6779_vm12, %v2426_v9, %v2430_v17  ;;  %v2492_v11 = vrot.slane %v2490_v34, 5  ;;  %v2503_v21 = vrot.slane %v2501_v53, 4  ;;  %v2607_v28 = vshrl.u32 %v2461_v41, 16  ;;  %v6999_v9 = vld [vmem:[#allocation2 + $0x120] sm:$0xf] }
 0x3cc   : > { %v2529_v10 = vshrl.u32 %v2476_v25, 16  ;;  %v2532_v24 = vshll.u32 %v2476_v25, 16  ;;  %v4759_v55 = vcombine.low %v6982_v35, %v6986_v62  ;;  %v7558_v40 = vmov 0.0|0.0  }
 0x3cd   : > { %v2493_v49 = vor.u32 %v2492_v11, %v2489_v26  ;;  %v2507_v37 = vor.u32 %v2506_v29, %v2503_v21  ;;  %v6994_v19 = vrot.slane %v2607_v28, 4  ;;  %v2635_v54 = vshrl.u32 %v6982_v35, 16  ;;  %v2475_v11 = vld [vmem:[#allocation2 + $0xbc] sm:$0x1]  ;;  %v2477_v21 = vld [vmem:[#allocation2 + $0xc4] sm:$0x1] }
 0x3ce   : > { %5125 = vmatmul.mubr.msk.bf16.vlgmr.msra.gmra.mrb[4].mxu1 %vm886_vm4, %v4739_v42  ;;  %v4750_v42 = vcombine.low %v2417_v16, %v2431_v61  ;;  %v2531_v39 = vrot.slane %v2529_v10, 4  ;;  %v2534_v16 = vrot.slane %v2532_v24, 5  ;;  %v7006_v61 = vrot.slane %v2610_v2, 5  ;;  %v2479_v28 = vld [vmem:[#allocation2 + $0xcc] sm:$0x1] }
 0x3cf   : > { %5133 = vmatpush3.bf16.msra.mxu1 %v6893_v7  ;;  %5128 = vmatprep.mubr.msk.bf16.mxu1 %vm886_vm4, %v4740_v52  ;;  %v2397_v7 = vor.u32 %v6906_v60, %v6902_v63  ;;  %v4748_v63 = vcombine.low %v2361_v20, %v2375_v30  ;;  %v2384_v60 = vrot.slane %v2383_v1, 4  ;;  %v2473_v1 = vld [vmem:[#allocation2 + $0xb4] sm:$0x1]  ;;  %v2515_v20 = vshrl.u32 %v2474_v56, 16 }
 0x3d0   : > { %5134 = vmatprep.subr.bf16.mxu1 %v5445_v45  ;;  %v2518_v30 = vshll.u32 %v2474_v56, 16  ;;  %v2510_v18 = vshll.u32 %v2473_v1, 16  ;;  %v2535_v56 = vor.u32 %v2534_v16, %v2531_v39  ;;  %v2649_v1 = vshrl.u32 %v6986_v62, 16  ;;  %v2485_v16 = vld [vmem:[#allocation2 + $0xe4] sm:$0x1] }
 0x3d1   : > { %v2398_v44 = vrot.slane %v2397_v7, 4  ;;  %v2389_v57 = vsel %vm6779_vm12, %v2384_v60, %v2388_v58  ;;  %v2478_v7 = vld [vmem:[#allocation2 + $0xc8] sm:$0xf]  ;;  %v6997_v60 = vld [vmem:[#allocation2 + $0x118] sm:$0xf]  ;;  %v2557_v58 = vshrl.u32 %v2480_v33, 16 }
 0x3d2   : > { %v2543_v27 = vshrl.u32 %v2478_v7, 16  ;;  %v2546_v3 = vshll.u32 %v2478_v7, 16  ;;  %v2517_v48 = vrot.slane %v2515_v20, 4  ;;  %v2520_v47 = vrot.slane %v2518_v30, 5 }
 0x3d3   : > { %5135 = vmatpush3.bf16.msra.mxu1 %v5445_v45  ;;  %v2403_v32 = vsel %vm6779_vm12, %v2398_v44, %v2402_v14  ;;  %v2444_v45 = vrot.slane %v2442_v51, 5  ;;  %v2496_v44 = vshll.u32 %v2471_v8, 16  ;;  %v2560_v14 = vshll.u32 %v2480_v33, 16 }
 0x3d4   : > { %5144 = vmatprep.subr.bf16.mxu1 %v6933_v22  ;;  %v4749_v15 = vcombine.low %v2389_v57, %v2403_v32  ;;  %v5452_v57 = vld [vmem:[%s7424_s2 + $0x78] sm:$0xff]   ;;  %v2494_v32 = vrot.slane %v2493_v49, 4  ;;  %v2508_v51 = vrot.slane %v2507_v37, 4  ;;  %v2545_v59 = vrot.slane %v2543_v27, 4 }
 0x3d5   : > { %v2445_v52 = vsel %vm6779_vm12, %v2440_v38, %v2444_v45  ;;  %v4760_v38 = vcombine.low %v6997_v60, %v6999_v9  ;;  %v2498_v43 = vrot.slane %v2496_v44, 5  ;;  %v7016_v45 = vld [vmem:[%s7424_s2 + $0x80] sm:$0xff]   ;;  %v2548_v36 = vrot.slane %v2546_v3, 5 }
 0x3d6   : > { %5129 = vmatmul.mubr.msk.bf16.gmra.mrb[8].mxu1 %vm886_vm4, %v4741_v4  ;;  %v4751_v12 = vcombine.low %v2445_v52, %v2459_v23  ;;  %v3743_v4 = vld [vmem:[%s7429_s7] sm:$0xff]  ;;  %v2559_v13 = vrot.slane %v2557_v58, 4  ;;  %v2562_v52 = vrot.slane %v2560_v14, 5  ;;  %v2521_v29 = vor.u32 %v2520_v47, %v2517_v48 }
 0x3d7   : > { %5136 = vmatprep.mubr.msk.bf16.mxu1 %vm886_vm4, %v4748_v63  ;;  %v5289_v17 = vpack.c.bf16 %v3744_v0, %v3743_v4  ;;  %v2484_v23 = vld [vmem:[#allocation2 + $0xe0] sm:$0xf]  ;;  %v2652_v7 = vshll.u32 %v6986_v62, 16  ;;  %v2549_v2 = vor.u32 %v2548_v36, %v2545_v59  ;;  %v2524_v30 = vshll.u32 %v2475_v11, 16  ;;  %v2599_v59 = vld [vmem:[#allocation2 + $0x104] sm:$0x1] }
 0x3d8   : > { %v2588_v8 = vshll.u32 %v2484_v23, 16  ;;  %v2538_v33 = vshll.u32 %v2477_v21, 16  ;;  %v2552_v49 = vshll.u32 %v2479_v28, 16  ;;  %v2522_v10 = vrot.slane %v2521_v29, 4  ;;  %v5455_v21 = vld [vmem:[%s7424_s2 + $0x88] sm:$0xff]  }
 0x3d9   : > { %5290 = vmatpush3.bf16.msra.mxu0 %v5289_v17  ;;  %v2536_v24 = vrot.slane %v2535_v56, 4  ;;  %v7038_v62 = vrot.slane %v2635_v54, 4  ;;  %v2550_v3 = vrot.slane %v2549_v2, 4  ;;  %v2663_v14 = vshrl.u32 %v6997_v60, 16  ;;  %v2483_v17 = vld [vmem:[#allocation2 + $0xdc] sm:$0x1] }
 0x3da   : > { %5291 = vmatprep.subr.bf16.mxu0 %v7558_v40  ;;  %v2526_v48 = vrot.slane %v2524_v30, 5  ;;  %v2540_v47 = vrot.slane %v2538_v33, 5  ;;  %v2654_v54 = vrot.slane %v2652_v7, 5  ;;  %v2630_v56 = vshll.u32 %v2599_v59, 16  ;;  %v2600_v2 = vld [vmem:[#allocation2 + $0x10c] sm:$0x1] }
 0x3dc   : > { %v2632_v33 = vrot.slane %v2630_v56, 5 }
 0x3de   : > { %5137 = vmatmul.mubr.msk.bf16.vlgmr.msra.gmra.mrb[4].mxu1 %vm886_vm4, %v4749_v15  ;;  %v2512_v15 = vrot.slane %v2510_v18, 5  ;;  %v2590_v18 = vrot.slane %v2588_v8, 5 }
 0x3df   : > { %5145 = vmatpush3.bf16.msra.mxu1 %v6933_v22  ;;  %5140 = vmatprep.mubr.msk.bf16.mxu1 %vm886_vm4, %v4750_v42  ;;  %v6977_v22 = vld [vmem:[#allocation2 + $0x100] sm:$0xf]  ;;  %v7011_v42 = vld [vmem:[#allocation2 + $0x128] sm:$0xf] }
 0x3e0   : > { %5146 = vmatprep.subr.bf16.mxu1 %v5447_v6  ;;  %v4758_v31 = vcombine.low %v2461_v41, %v6977_v22  ;;  %v2621_v50 = vshrl.u32 %v6977_v22, 16  ;;  %v2624_v63 = vshll.u32 %v6977_v22, 16  ;;  %v2638_v41 = vshll.u32 %v6982_v35, 16  ;;  %v7027_v22 = vld [vmem:[#allocation2 + $0x130] sm:$0xf] }
 0x3e1   : > { %v2513_v26 = vsel %vm6779_vm12, %v2508_v51, %v2512_v15  ;;  %v4761_v20 = vcombine.low %v7011_v42, %v7027_v22  ;;  %v2554_v51 = vrot.slane %v2552_v49, 5  ;;  %v2694_v8 = vshll.u32 %v7011_v42, 16  ;;  %v2601_v49 = vld [vmem:[#allocation2 + $0x114] sm:$0x1] }
 0x3e2   : > { %v7019_v34 = vrot.slane %v2621_v50, 4  ;;  %v7021_v53 = vrot.slane %v2624_v63, 5  ;;  %v2563_v50 = vor.u32 %v2562_v52, %v2559_v13  ;;  %v7040_v27 = vrot.slane %v2638_v41, 5 }
 0x3e3   : > { %5147 = vmatpush3.bf16.msra.mxu1 %v5447_v6  ;;  %v2482_v6 = vld [vmem:[#allocation2 + $0xd8] sm:$0xf]  ;;  %v2555_v36 = vsel %vm6779_vm12, %v2550_v3, %v2554_v51  ;;  %v2580_v41 = vshll.u32 %v2483_v17, 16  ;;  %v2696_v3 = vrot.slane %v2694_v8, 5 }
 0x3e4   : > { %5156 = vmatprep.subr.bf16.mxu1 %v6975_v5  ;;  %v2571_v25 = vshrl.u32 %v2482_v6, 16  ;;  %v2574_v35 = vshll.u32 %v2482_v6, 16  ;;  %v2564_v58 = vrot.slane %v2563_v50, 4  ;;  %v2598_v6 = vld [vmem:[#allocation2 + $0xfc] sm:$0x1]  ;;  %v2627_v52 = vor.u32 %v7021_v53, %v7019_v34 }
 0x3e5   : > { %v2616_v29 = vshll.u32 %v2598_v6, 16  ;;  %v2705_v50 = vshrl.u32 %v7027_v22, 16  ;;  %v2605_v6 = vld [vmem:[#allocation2 + $0x134] sm:$0x1] }
 0x3e6   : > { %5141 = vmatmul.mubr.msk.bf16.gmra.mrb[8].mxu1 %vm886_vm4, %v4751_v12  ;;  %v2499_v12 = vsel %vm6779_vm12, %v2494_v32, %v2498_v43  ;;  %v2573_v0 = vrot.slane %v2571_v25, 4  ;;  %v2576_v63 = vrot.slane %v2574_v35, 5  ;;  %v2680_v32 = vshll.u32 %v6999_v9, 16 }
 0x3e7   : > { %5148 = vmatprep.mubr.msk.bf16.mxu1 %vm886_vm4, %v4758_v31  ;;  %v2481_v31 = vld [vmem:[#allocation2 + $0xd4] sm:$0x1]  ;;  %v4768_v37 = vcombine.low %v2499_v12, %v2513_v26  ;;  %v2541_v43 = vsel %vm6779_vm12, %v2536_v24, %v2540_v47  ;;  %v2594_v12 = vshll.u32 %v2485_v16, 16  ;;  %v2665_v26 = vrot.slane %v2663_v14, 4  ;;  %v2602_v24 = vld [vmem:[#allocation2 + $0x11c] sm:$0x1] }
 0x3e8   : > { %v2566_v4 = vshll.u32 %v2481_v31, 16  ;;  %v2577_v15 = vor.u32 %v2576_v63, %v2573_v0  ;;  %v2628_v53 = vrot.slane %v2627_v52, 4  ;;  %v2618_v30 = vrot.slane %v2616_v29, 5 }
 0x3e9   : > { %v2596_v7 = vrot.slane %v2594_v12, 5  ;;  %v2658_v14 = vshll.u32 %v2601_v49, 16  ;;  %v2672_v47 = vshll.u32 %v2602_v24, 16 }
 0x3ea   : > { %v2568_v39 = vrot.slane %v2566_v4, 5  ;;  %v2578_v25 = vrot.slane %v2577_v15, 4  ;;  %v2603_v4 = vld [vmem:[#allocation2 + $0x124] sm:$0x1] }
 0x3ec   : > { %v2569_v13 = vsel %vm6779_vm12, %v2564_v58, %v2568_v39  ;;  %v2644_v58 = vshll.u32 %v2600_v2, 16 }
 0x3ed   : > { %v4770_v31 = vcombine.low %v2555_v36, %v2569_v13 }
 0x3ee   : > { %5149 = vmatmul.mubr.msk.bf16.vlgmr.msra.gmra.mrb[4].mxu1 %vm886_vm4, %v4759_v55  ;;  %v2666_v55 = vshll.u32 %v6997_v60, 16  ;;  %v2646_v16 = vrot.slane %v2644_v58, 5 }
 0x3ef   : > { %5157 = vmatpush3.bf16.msra.mxu1 %v6975_v5  ;;  %5152 = vmatprep.mubr.msk.bf16.mxu1 %vm886_vm4, %v4760_v38  ;;  %v2585_v5 = vshrl.u32 %v2484_v23, 16  ;;  %v2527_v38 = vsel %vm6779_vm12, %v2522_v10, %v2526_v48  ;;  %v2651_v23 = vrot.slane %v2649_v1, 4  ;;  %v2582_v1 = vrot.slane %v2580_v41, 5 }
 0x3f0   : > { %5158 = vmatprep.subr.bf16.mxu1 %v5452_v57  ;;  %v4769_v11 = vcombine.low %v2527_v38, %v2541_v43  ;;  %v2668_v28 = vrot.slane %v2666_v55, 5  ;;  %v2707_v55 = vrot.slane %v2705_v50, 4  ;;  %v2660_v38 = vrot.slane %v2658_v14, 5 }
 0x3f1   : > { %v2587_v44 = vrot.slane %v2585_v5, 4  ;;  %v2691_v5 = vshrl.u32 %v7011_v42, 16  ;;  %v2655_v10 = vor.u32 %v2654_v54, %v2651_v23  ;;  %v2674_v43 = vrot.slane %v2672_v47, 5 }
 0x3f2   : > { %v2669_v63 = vor.u32 %v2668_v28, %v2665_v26  ;;  %v2714_v41 = vshll.u32 %v2605_v6, 16 }
 0x3f3   : > { %5159 = vmatpush3.bf16.msra.mxu1 %v5452_v57  ;;  %v2677_v57 = vshrl.u32 %v6999_v9, 16  ;;  %v2591_v60 = vor.u32 %v2590_v18, %v2587_v44  ;;  %v2613_v9 = vor.u32 %v7006_v61, %v6994_v19  ;;  %v2682_v61 = vrot.slane %v2680_v32, 5 }
 0x3f4   : > { %5168 = vmatprep.subr.bf16.mxu1 %v7016_v45  ;;  %v2693_v18 = vrot.slane %v2691_v5, 4  ;;  %v2656_v32 = vrot.slane %v2655_v10, 4  ;;  %v2670_v51 = vrot.slane %v2669_v63, 4  ;;  %v2716_v56 = vrot.slane %v2714_v41, 5 }
 0x3f5   : > { %v2592_v35 = vrot.slane %v2591_v60, 4  ;;  %v2679_v19 = vrot.slane %v2677_v57, 4  ;;  %v2614_v34 = vrot.slane %v2613_v9, 4  ;;  %v2604_v60 = vld [vmem:[#allocation2 + $0x12c] sm:$0x1] }
 0x3f6   : > { %5153 = vmatmul.mubr.msk.bf16.gmra.mrb[8].mxu1 %vm886_vm4, %v4761_v20  ;;  %v2708_v20 = vshll.u32 %v7027_v22, 16  ;;  %v2633_v22 = vsel %vm6779_vm12, %v2628_v53, %v2632_v33  ;;  %v2661_v36 = vsel %vm6779_vm12, %v2656_v32, %v2660_v38  ;;  %v2697_v13 = vor.u32 %v2696_v3, %v2693_v18 }
 0x3f7   : > { %5160 = vmatprep.mubr.msk.bf16.mxu1 %vm886_vm4, %v4768_v37  ;;  %v2583_v37 = vsel %vm6779_vm12, %v2578_v25, %v2582_v1  ;;  %v2597_v42 = vsel %vm6779_vm12, %v2592_v35, %v2596_v7  ;;  %v2619_v0 = vsel %vm6779_vm12, %v2614_v34, %v2618_v30  ;;  %v2683_v44 = vor.u32 %v2682_v61, %v2679_v19  ;;  %v3745_v35 = vld [vmem:[%s7429_s7 + $0x10] sm:$0xff]  ;;  %v3746_v19 = vld [vmem:[%s7429_s7 + $0x18] sm:$0xff] }
 0x3f8   : > { %v4771_v48 = vcombine.low %v2583_v37, %v2597_v42  ;;  %v4778_v17 = vcombine.low %v2619_v0, %v2633_v22  ;;  %v2675_v52 = vsel %vm6779_vm12, %v2670_v51, %v2674_v43  ;;  %v2700_v54 = vshll.u32 %v2604_v60, 16 }
 0x3f9   : > { %v2684_v39 = vrot.slane %v2683_v44, 4  ;;  %v5292_v61 = vpack.c.bf16 %v3746_v19, %v3745_v35  ;;  %v3747_v35 = vld [vmem:[%s7430_s8] sm:$0xff]  ;;  %v3748_v19 = vld [vmem:[%s7430_s8 + $0x8] sm:$0xff] }
 0x3fa   : > { %v2702_v29 = vrot.slane %v2700_v54, 5 }
 0x3fb   : > { %5293 = vmatpush3.bf16.msra.mxu0 %v5292_v61  ;;  %v3749_v61 = vld [vmem:[%s7430_s8 + $0x10] sm:$0xff] }
 0x3fc   : > { %5294 = vmatprep.subr.bf16.mxu0 %v7558_v40 }
 0x3fe   : > { %5161 = vmatmul.mubr.msk.bf16.vlgmr.msra.gmra.mrb[4].mxu1 %vm886_vm4, %v4769_v11  ;;  %v2698_v11 = vrot.slane %v2697_v13, 4 }
 0x3ff   : > { %5169 = vmatpush3.bf16.msra.mxu1 %v7016_v45  ;;  %5164 = vmatprep.mubr.msk.bf16.mxu1 %vm886_vm4, %v4770_v31  ;;  %v2641_v45 = vor.u32 %v7040_v27, %v7038_v62  ;;  %v2686_v62 = vshll.u32 %v2603_v4, 16  ;;  %v2710_v27 = vrot.slane %v2708_v20, 5 }
 0x400   : > { %5170 = vmatprep.subr.bf16.mxu1 %v5455_v21  ;;  %v2703_v28 = vsel %vm6779_vm12, %v2698_v11, %v2702_v29 }
 0x401   : > { %v2642_v57 = vrot.slane %v2641_v45, 4  ;;  %v2688_v15 = vrot.slane %v2686_v62, 5  ;;  %v2711_v9 = vor.u32 %v2710_v27, %v2707_v55 }
 0x403   : > { %5171 = vmatpush3.bf16.msra.mxu1 %v5455_v21  ;;  %v2647_v59 = vsel %vm6779_vm12, %v2642_v57, %v2646_v16  ;;  %v2689_v23 = vsel %vm6779_vm12, %v2684_v39, %v2688_v15  ;;  %v2712_v21 = vrot.slane %v2711_v9, 4 }
 0x404   : > { %v4779_v12 = vcombine.low %v2647_v59, %v2661_v36  ;;  %v4780_v26 = vcombine.low %v2675_v52, %v2689_v23 }
 0x405   : > { %v2717_v31 = vsel %vm6779_vm12, %v2712_v21, %v2716_v56 }
 0x406   : > { %5165 = vmatmul.mubr.msk.bf16.gmra.mrb[8].mxu1 %vm886_vm4, %v4771_v48  ;;  %v4781_v25 = vcombine.low %v2703_v28, %v2717_v31 }
 0x407   : > { %5172 = vmatprep.mubr.msk.bf16.mxu1 %vm886_vm4, %v4778_v17 }
 0x40e   : > { %5173 = vmatmul.mubr.msk.bf16.vlgmr.msra.gmra.mrb[4].mxu1 %vm886_vm4, %v4779_v12 }
 0x40f   : > { %5176 = vmatprep.mubr.msk.bf16.mxu1 %vm886_vm4, %v4780_v26 }
 0x416   : > { %5177 = vmatmul.mubr.msk.bf16.gmra.mrb[8].mxu1 %vm886_vm4, %v4781_v25  ;;  %v7559_v25 = vmov 0.0  }
 0x4e1   : > { %v7104_v34 = vpop.f32.mrb[4].mxu1 }
 0x4e2   : > { %v7106_v53 = vpop.f32.mrb[5].mxu1  ;;  %v3774_v1 = vmul.f32 %v7104_v34, %v7104_v34  ;;  %v3754_v30 = vsel %vm886_vm4, %v7104_v34, 0.0 }
 0x4e3   : > { %v3772_v46 = vmul.f32 %v7106_v53, %v7106_v53  ;;  %v7110_v5 = vpop.f32.mrb[6].mxu1  ;;  %v3751_v7 = vsel %vm886_vm4, %v7106_v53, 0.0 }
 0x4e4   : > { %v7112_v8 = vpop.f32.mrb[7].mxu1  ;;  %v3775_v49 = vmul.f32 %v7110_v5, %v7110_v5  ;;  %v3783_v10 = vsel %vm886_vm4, %v3774_v1, 0.0  ;;  %v3756_v24 = vsel %vm886_vm4, %v7110_v5, 0.0  ;;  %v3750_v1 = vld [vmem:[%s7430_s8 + $0x18] sm:$0xff] }
 0x4e5   : > { %v3752_v2 = vsel %vm886_vm4, %v7112_v8, 0.0  ;;  %v3773_v50 = vmul.f32 %v7112_v8, %v7112_v8  ;;  %v3780_v33 = vsel %vm886_vm4, %v3772_v46, 0.0  ;;  %v5295_v46 = vpack.c.bf16 %v3748_v19, %v3747_v35  ;;  %v4099_v19 = vld [vmem:[%s7431_s9 + $0x20] sm:$0xff] }
 0x4e6   : > { %v3753_v20 = vadd.f32 %v3752_v2, %v3751_v7  ;;  %v3785_v44 = vsel %vm886_vm4, %v3775_v49, 0.0  ;;  %v5298_v7 = vpack.c.bf16 %v3750_v1, %v3749_v61  ;;  %v4100_v61 = vld [vmem:[%s7431_s9 + $0x28] sm:$0xff]  ;;  %v4101_v1 = vld [vmem:[%s7431_s9 + $0x30] sm:$0xff] }
 0x4e7   : > { %v3781_v37 = vsel %vm886_vm4, %v3773_v50, 0.0 }
 0x4e8   : > { %v3755_v42 = vadd.f32 %v3754_v30, %v3753_v20  ;;  %v3782_v45 = vadd.f32 %v3781_v37, %v3780_v33 }
 0x4e9   : > { %v7131_v4 = vpop.f32.mrb[8].mxu1 }
 0x4ea   : > { %v3784_v0 = vadd.f32 %v3783_v10, %v3782_v45  ;;  %v7133_v22 = vpop.f32.mrb[9].mxu1  ;;  %v3757_v63 = vadd.f32 %v3756_v24, %v3755_v42  ;;  %v3778_v47 = vmul.f32 %v7131_v4, %v7131_v4  ;;  %v3762_v51 = vsel %vm886_vm4, %v7131_v4, 0.0  ;;  %v5456_v45 = vld [vmem:[%s7425_s3] sm:$0xff]   ;;  %v5457_v10 = vld [vmem:[%s7425_s3 + $0x8] sm:$0xff]  }
 0x4eb   : > { %v3758_v18 = vsel %vm886_vm4, %v7133_v22, 0.0  ;;  %v3776_v3 = vmul.f32 %v7133_v22, %v7133_v22  ;;  %v7140_v58 = vpop.f32.mrb[10].mxu1 }
 0x4ec   : > { %v3759_v14 = vadd.f32 %v3758_v18, %v3757_v63  ;;  %v3786_v55 = vadd.f32 %v3785_v44, %v3784_v0  ;;  %v7142_v48 = vpop.f32.mrb[11].mxu1  ;;  %v3779_v39 = vmul.f32 %v7140_v58, %v7140_v58  ;;  %v3791_v15 = vsel %vm886_vm4, %v3778_v47, 0.0  ;;  %v3956_v18 = vld [vmem:[%s7427_s5] sm:$0x1] }
 0x4ed   : > { %v3787_v62 = vsel %vm886_vm4, %v3776_v3, 0.0  ;;  %v3760_v27 = vsel %vm886_vm4, %v7142_v48, 0.0  ;;  %v3777_v17 = vmul.f32 %v7142_v48, %v7142_v48  ;;  %v3764_v60 = vsel %vm886_vm4, %v7140_v58, 0.0 }
 0x4ee   : > { %v3788_v57 = vadd.f32 %v3787_v62, %v3786_v55  ;;  %v3761_v32 = vadd.f32 %v3760_v27, %v3759_v14  ;;  %v3793_v36 = vsel %vm886_vm4, %v3779_v39, 0.0  ;;  %v3963_v55 = vld [vmem:[%s7427_s5 + $0x1] sm:$0x1] }
 0x4ef   : > { %v3789_v16 = vsel %vm886_vm4, %v3777_v17, 0.0  ;;  %v7560_v62 = vld [vmem:[#allocation3_spill] sm:$0xff] }
 0x4f0   : > { %v3763_v38 = vadd.f32 %v3762_v51, %v3761_v32  ;;  %v3790_v43 = vadd.f32 %v3789_v16, %v3788_v57 }
 0x4f2   : > { %v3765_v6 = vadd.f32 %v3764_v60, %v3763_v38  ;;  %v3792_v59 = vadd.f32 %v3791_v15, %v3790_v43 }
 0x4f4   : > { %v3766_v13 = vrot.slane %v3765_v6, 4  ;;  %v3794_v9 = vadd.f32 %v3793_v36, %v3792_v59 }
 0x4f6   : > { %v3767_v52 = vadd.f32 %v3766_v13, %v3765_v6  ;;  %v3795_v23 = vrot.slane %v3794_v9, 4 }
 0x4f8   : > { %v3768_v54 = vrot.slane %v3767_v52, 2  ;;  %v3796_v41 = vadd.f32 %v3795_v23, %v3794_v9 }
 0x4fa   : > { %v3769_v12 = vadd.f32 %v3768_v54, %v3767_v52  ;;  %v3797_v26 = vrot.slane %v3796_v41, 2 }
 0x4fc   : > { %v3770_v11 = vrot.slane %v3769_v12, 1  ;;  %v3798_v21 = vadd.f32 %v3797_v26, %v3796_v41 }
 0x4fe   : > { %v3799_v29 = vrot.slane %v3798_v21, 1  ;;  %v3771_v56 = vadd.f32 %v3770_v11, %v3769_v12 }
 0x500   : > { %v3800_v28 = vadd.f32 %v3799_v29, %v3798_v21  ;;  %v4095_v21 = vld [vmem:[%s7431_s9] sm:$0xff]  ;;  %v4096_v29 = vld [vmem:[%s7431_s9 + $0x8] sm:$0xff] }
 0x502   : > { %v3801_v31 = vsel %vm1057_vm5, %v3771_v56, %v3800_v28  ;;  %v5301_v56 = vpack.c.bf16 %v4096_v29, %v4095_v21  ;;  %v4097_v28 = vld [vmem:[%s7431_s9 + $0x10] sm:$0xff] }
 0x503   : > { %5189 = vmatmul.mubr.msk.f32.vlgmr.msra.gmra.mrb[32].mxu0 %vm886_vm4, %v3801_v31  ;;  %v4098_v31 = vld [vmem:[%s7431_s9 + $0x18] sm:$0xff] }
 0x504   : > { %5199 = vmatprep.mubr.msk.f32.mxu0 %vm5485_vm3, %v7559_v25  ;;  %5296 = vmatpush3.bf16.msra.mxu0 %v5295_v46  ;;  %v5304_v35 = vpack.c.bf16 %v4098_v31, %v4097_v28  ;;  %v5307_v46 = vpack.c.bf16 %v4100_v61, %v4099_v19  ;;  %v4111_v19 = vld [vmem:[%s7432_s10] sm:$0xff]  ;;  %v4112_v61 = vld [vmem:[%s7432_s10 + $0x8] sm:$0xff] }
 0x505   : > { %5297 = vmatprep.subr.bf16.mxu0 %v7558_v40 }
 0x508   : > { %5299 = vmatpush3.bf16.msra.mxu0 %v5298_v7  ;;  %v4102_v7 = vld [vmem:[%s7431_s9 + $0x38] sm:$0xff] }
 0x509   : > { %5202 = vmatprep.subr.bf16.mxu0 %v5456_v45 }
 0x5d6   : > { %v3871_v2 = vpop.f32.mrb[32].mxu0 }
 0x5d7   : > { %v3875_v50 = vmul.f32 0.015625, %v3871_v2  ;;  %v5190_v20 = vpop.f32.mrb[33].mxu0  ;;  %v4103_v2 = vld [vmem:[%s7431_s9 + $0x40] sm:$0xff] }
 0x5d8   : > { %v4104_v20 = vld [vmem:[%s7431_s9 + $0x48] sm:$0xff] }
 0x5d9   : > { %v3876_v30 = vmul.f32 %v3875_v50, %v3875_v50 }
 0x5db   : > { %v3878_v33 = vrot.slane %v3876_v30, 7  ;;  %v5313_v30 = vpack.c.bf16 %v4104_v20, %v4103_v2 }
 0x5dd   : > { %v3880_v49 = vsub.f32 %v3875_v50, %v3878_v33  ;;  %v4105_v33 = vld [vmem:[%s7431_s9 + $0x50] sm:$0xff] }
 0x5df   : > { %v3881_v37 = vmax.f32 %v3880_v49, 0.0  ;;  %v4106_v49 = vld [vmem:[%s7431_s9 + $0x58] sm:$0xff] }
 0x5e1   : > { %v3882_v42 = vsel %vm1057_vm5, %v3875_v50, %v3881_v37  ;;  %v5310_v50 = vpack.c.bf16 %v4102_v7, %v4101_v1  ;;  %v5316_v37 = vpack.c.bf16 %v4106_v49, %v4105_v33  ;;  %v5325_v1 = vpack.c.bf16 %v4112_v61, %v4111_v19  ;;  %v4114_v7 = vld [vmem:[%s7432_s10 + $0x18] sm:$0xff] }
 0x5e2   : > { %5200 = vmatmul.mubr.msk.f32.vlgmr.msra.gmra.mrb[34].mxu0 %vm886_vm4, %v3882_v42  ;;  %v4107_v42 = vld [vmem:[%s7431_s9 + $0x60] sm:$0xff] }
 0x5e3   : > { %5203 = vmatpush3.bf16.msra.mxu0 %v5456_v45  ;;  %v4108_v45 = vld [vmem:[%s7431_s9 + $0x68] sm:$0xff] }
 0x5e4   : > { %5204 = vmatprep.subr.bf16.mxu0 %v5457_v10 }
 0x5e7   : > { %5205 = vmatpush3.bf16.msra.mxu0 %v5457_v10  ;;  %v5319_v10 = vpack.c.bf16 %v4108_v45, %v4107_v42  ;;  %v5459_v45 = vld [vmem:[%s7433_s11 + $0x8] sm:$0xff]  }
 0x5e8   : > { %5300 = vmatprep.subr.bf16.mxu0 %v7558_v40 }
 0x6b5   : > { %v3952_v24 = vpop.f32.mrb[34].mxu0 }
 0x6b6   : > { %v3957_v0 = vadd.f32 1e-06, %v3952_v24  ;;  %v5201_v63 = vpop.f32.mrb[35].mxu0 }
 0x6b8   : > { %5464 = vrsqrt.f32 %v3957_v0  ;;  %v4110_v0 = vld [vmem:[%s7431_s9 + $0x78] sm:$0xff] }
 0x6c2   : > { %v5465_v44 = vpop.eup %5464 }
 0x6c3   : > { %v3960_v3 = vrot.slane %v5465_v44, 1 }
 0x6c5   : > { %v3962_v14 = vmul.f32 %v3960_v3, %v3956_v18 }
 0x6c7   : > { %v3964_v47 = vmul.f32 %v3962_v14, %v3952_v24  ;;  %v3969_v27 = vrot.slane %v3962_v14, %v7560_v62  ;;  %v4109_v24 = vld [vmem:[%s7431_s9 + $0x70] sm:$0xff] }
 0x6c8   : > { %v5322_v63 = vpack.c.bf16 %v4110_v0, %v4109_v24  ;;  %v5460_v24 = vld [vmem:[%s7433_s11 + $0x10] sm:$0xff]   ;;  %v5461_v0 = vld [vmem:[%s7433_s11 + $0x18] sm:$0xff]  }
 0x6c9   : > { %v3965_v17 = vsub.f32 %v3963_v55, %v3964_v47  ;;  %v3970_v57 = vmul.f32 %v3969_v27, %v7106_v53  ;;  %v3971_v32 = vmul.f32 %v3969_v27, %v7112_v8  ;;  %v3972_v51 = vmul.f32 %v7104_v34, %v3969_v27 }
 0x6ca   : > { %v3973_v39 = vmul.f32 %v7110_v5, %v3969_v27  ;;  %v3974_v16 = vmul.f32 %v3969_v27, %v7133_v22  ;;  %v3975_v38 = vmul.f32 %v3969_v27, %v7142_v48  ;;  %v3976_v43 = vmul.f32 %v7131_v4, %v3969_v27 }
 0x6cb   : > { %v3981_v15 = vrot.slane %v3965_v17, %v7560_v62  ;;  %v3977_v60 = vmul.f32 %v7140_v58, %v3969_v27 }
 0x6cd   : > { %v3982_v6 = vadd.f32 %v3981_v15, %v3970_v57  ;;  %v3983_v59 = vadd.f32 %v3981_v15, %v3971_v32  ;;  %v3984_v36 = vadd.f32 %v3981_v15, %v3972_v51  ;;  %v3985_v53 = vadd.f32 %v3981_v15, %v3973_v39 }
 0x6ce   : > { %v3986_v13 = vadd.f32 %v3981_v15, %v3974_v16  ;;  %v3987_v8 = vadd.f32 %v3981_v15, %v3975_v38  ;;  %v3988_v9 = vadd.f32 %v3981_v15, %v3976_v43  ;;  %v3989_v34 = vadd.f32 %v3981_v15, %v3977_v60 }
 0x6cf   : > { %v3990_v52 = vmax.f32 %v3982_v6, 0.0  ;;  %v3991_v5 = vmax.f32 %v3983_v59, 0.0  ;;  %v3992_v23 = vmax.f32 %v3984_v36, 0.0  ;;  %v3993_v22 = vmax.f32 %v3985_v53, 0.0 }
 0x6d0   : > { %v3994_v54 = vmax.f32 %v3986_v13, 0.0  ;;  %v3995_v48 = vmax.f32 %v3987_v8, 0.0  ;;  %v3996_v41 = vmax.f32 %v3988_v9, 0.0  ;;  %v3997_v4 = vmax.f32 %v3989_v34, 0.0 }
 0x6d1   : > { %v3998_v12 = vpack.c.bf16 %v3991_v5, %v3990_v52  ;;  %v3999_v26 = vpack.c.bf16 %v3993_v22, %v3992_v23 }
 0x6d2   : > { %v4000_v11 = vpack.c.bf16 %v3995_v48, %v3994_v54  ;;  %v4001_v58 = vpack.c.bf16 %v3997_v4, %v3996_v41 }
 0x6d3   : > { %5206 = vmatprep.mubr.msk.bf16.mxu0 %vm886_vm4, %v3998_v12 }
 0x6d4   : > { %5207 = vmatmul.mubr.msk.bf16.vlgmr.msra.gmra.mrb[36].mxu0 %vm886_vm4, %v3999_v26 }
 0x6d5   : > { %5210 = vmatprep.mubr.msk.bf16.mxu0 %vm886_vm4, %v4000_v11  ;;  %5302 = vmatpush3.bf16.msra.mxu0 %v5301_v56 }
 0x6d6   : > { %5303 = vmatprep.subr.bf16.mxu0 %v7558_v40 }
 0x6d9   : > { %5305 = vmatpush3.bf16.msra.mxu0 %v5304_v35 }
 0x6da   : > { %5306 = vmatprep.subr.bf16.mxu0 %v7558_v40 }
 0x6dc   : > { %5211 = vmatmul.mubr.msk.bf16.gmra.mrb[40].mxu0 %vm886_vm4, %v4001_v58 }
 0x6dd   : > { %5246 = vmatprep.mubr.msk.f32.mxu0 %vm5485_vm3, %v7559_v25  ;;  %5308 = vmatpush3.bf16.msra.mxu0 %v5307_v46  ;;  %v4113_v46 = vld [vmem:[%s7432_s10 + $0x10] sm:$0xff] }
 0x6de   : > { %5309 = vmatprep.subr.bf16.mxu0 %v7558_v40  ;;  %v5328_v2 = vpack.c.bf16 %v4114_v7, %v4113_v46 }
 0x6e1   : > { %5311 = vmatpush3.bf16.msra.mxu0 %v5310_v50 }
 0x6e2   : > { %5312 = vmatprep.subr.bf16.mxu0 %v7558_v40 }
 0x6e5   : > { %5314 = vmatpush3.bf16.msra.mxu0 %v5313_v30 }
 0x6e6   : > { %5315 = vmatprep.subr.bf16.mxu0 %v7558_v40 }
 0x6e9   : > { %5317 = vmatpush3.bf16.msra.mxu0 %v5316_v37 }
 0x6ea   : > { %5318 = vmatprep.subr.bf16.mxu0 %v7558_v40 }
 0x6ed   : > { %5320 = vmatpush3.bf16.msra.mxu0 %v5319_v10  ;;  %v5471_v10 = vld [vmem:[%s5585_s19] sm:$0xff]  }
 0x6ee   : > { %5321 = vmatprep.subr.bf16.mxu0 %v7558_v40 }
 0x6f1   : > { %5323 = vmatpush3.bf16.msra.mxu0 %v5322_v63  ;;  %v5472_v63 = vld [vmem:[%s5585_s19 + $0x8] sm:$0xff]  }
 0x6f2   : > { %5324 = vmatprep.subr.bf16.mxu0 %v7558_v40 }
 0x7a7   : > { %v7264_v44 = vpop.f32.mrb[36].mxu0 }
 0x7a8   : > { %v7266_v18 = vpop.f32.mrb[37].mxu0  ;;  %v4130_v17 = vmul.f32 %v7264_v44, %v7264_v44 }
 0x7a9   : > { %v7268_v3 = vpop.f32.mrb[38].mxu0  ;;  %v4128_v55 = vmul.f32 %v7266_v18, %v7266_v18 }
 0x7aa   : > { %v7270_v14 = vpop.f32.mrb[39].mxu0  ;;  %v4131_v51 = vmul.f32 %v7268_v3, %v7268_v3 }
 0x7ab   : > { %v4115_v47 = vadd.f32 %v7270_v14, %v7266_v18  ;;  %v4129_v27 = vmul.f32 %v7270_v14, %v7270_v14 }
 0x7ad   : > { %v4116_v57 = vadd.f32 %v7264_v44, %v4115_v47  ;;  %v4136_v32 = vadd.f32 %v4129_v27, %v4128_v55  ;;  %v5473_v55 = vld [vmem:[%s5585_s19 + $0x10] sm:$0xff]   ;;  %v5474_v47 = vld [vmem:[%s5585_s19 + $0x18] sm:$0xff]  }
 0x7af   : > { %v4137_v39 = vadd.f32 %v4136_v32, %v4130_v17  ;;  %v7283_v16 = vpop.f32.mrb[40].mxu0  ;;  %v4117_v38 = vadd.f32 %v7268_v3, %v4116_v57 }
 0x7b0   : > { %v7286_v43 = vpop.f32.mrb[41].mxu0  ;;  %v4134_v9 = vmul.f32 %v7283_v16, %v7283_v16 }
 0x7b1   : > { %v4118_v15 = vadd.f32 %v4117_v38, %v7286_v43  ;;  %v4132_v60 = vmul.f32 %v7286_v43, %v7286_v43  ;;  %v4138_v6 = vadd.f32 %v4137_v39, %v4131_v51  ;;  %v7291_v59 = vpop.f32.mrb[42].mxu0  ;;  %v4301_v51 = vld [vmem:[%s7428_s6] sm:$0x1] }
 0x7b2   : > { %v7293_v36 = vpop.f32.mrb[43].mxu0  ;;  %v4135_v5 = vmul.f32 %v7291_v59, %v7291_v59 }
 0x7b3   : > { %v4139_v53 = vadd.f32 %v4138_v6, %v4132_v60  ;;  %v4119_v13 = vadd.f32 %v4118_v15, %v7293_v36  ;;  %v4133_v8 = vmul.f32 %v7293_v36, %v7293_v36  ;;  %v4308_v60 = vld [vmem:[%s7428_s6 + $0x1] sm:$0x1] }
 0x7b5   : > { %v4120_v34 = vadd.f32 %v7283_v16, %v4119_v13  ;;  %v4140_v52 = vadd.f32 %v4139_v53, %v4133_v8 }
 0x7b7   : > { %v4121_v23 = vadd.f32 %v7291_v59, %v4120_v34  ;;  %v4141_v22 = vadd.f32 %v4140_v52, %v4134_v9 }
 0x7b9   : > { %v4122_v54 = vrot.slane %v4121_v23, 4  ;;  %v4142_v48 = vadd.f32 %v4141_v22, %v4135_v5 }
 0x7bb   : > { %v4123_v41 = vadd.f32 %v4122_v54, %v4121_v23  ;;  %v4143_v4 = vrot.slane %v4142_v48, 4 }
 0x7bd   : > { %v4124_v12 = vrot.slane %v4123_v41, 2  ;;  %v4144_v26 = vadd.f32 %v4143_v4, %v4142_v48 }
 0x7bf   : > { %v4125_v11 = vadd.f32 %v4124_v12, %v4123_v41  ;;  %v4145_v58 = vrot.slane %v4144_v26, 2 }
 0x7c1   : > { %v4126_v21 = vrot.slane %v4125_v11, 1  ;;  %v4146_v29 = vadd.f32 %v4145_v58, %v4144_v26 }
 0x7c3   : > { %v4147_v56 = vrot.slane %v4146_v29, 1  ;;  %v4127_v28 = vadd.f32 %v4126_v21, %v4125_v11 }
 0x7c5   : > { %v4148_v31 = vadd.f32 %v4147_v56, %v4146_v29 }
 0x7c7   : > { %v4149_v35 = vsel %vm1057_vm5, %v4127_v28, %v4148_v31 }
 0x7c8   : > { %5247 = vmatmul.mubr.f32.vlgmr.msra.gmra.mrb[44].mxu0 %v4149_v35 }
 0x7c9   : > { %5257 = vmatprep.mubr.msk.f32.mxu0 %vm5485_vm3, %v7559_v25  ;;  %5326 = vmatpush3.bf16.msra.mxu0 %v5325_v1  ;;  %v5458_v25 = vld [vmem:[%s7433_s11] sm:$0xff]  }
 0x7ca   : > { %5327 = vmatprep.subr.bf16.mxu0 %v7558_v40 }
 0x7cd   : > { %5329 = vmatpush3.bf16.msra.mxu0 %v5328_v2 }
 0x7ce   : > { %5260 = vmatprep.subr.bf16.mxu0 %v5458_v25 }
 0x89b   : > { %v4216_v50 = vpop.f32.mrb[44].mxu0 }
 0x89c   : > { %v4220_v20 = vmul.f32 0.00390625, %v4216_v50  ;;  %v5248_v30 = vpop.f32.mrb[45].mxu0 }
 0x89e   : > { %v4221_v33 = vmul.f32 %v4220_v20, %v4220_v20 }
 0x8a0   : > { %v4223_v49 = vrot.slane %v4221_v33, 7 }
 0x8a2   : > { %v4225_v37 = vsub.f32 %v4220_v20, %v4223_v49 }
 0x8a4   : > { %v4226_v42 = vmax.f32 %v4225_v37, 0.0 }
 0x8a6   : > { %v4227_v40 = vsel %vm1057_vm5, %v4220_v20, %v4226_v42 }
 0x8a7   : > { %5258 = vmatmul.mubr.msk.f32.vlgmr.msra.gmra.mrb[46].mxu0 %vm886_vm4, %v4227_v40 }
 0x8a8   : > { %5261 = vmatpush3.bf16.msra.mxu0 %v5458_v25  ;;  %5268 = vmatprep.mubr.msk.bf16.mxu0 %vm668_vm0, %v5471_v10 }
 0x8a9   : > { %5262 = vmatprep.subr.bf16.mxu0 %v5459_v45 }
 0x8ac   : > { %5263 = vmatpush3.bf16.msra.mxu0 %v5459_v45 }
 0x8ad   : > { %5264 = vmatprep.subr.bf16.mxu0 %v5460_v24 }
 0x8b0   : > { %5265 = vmatpush3.bf16.msra.mxu0 %v5460_v24 }
 0x8b1   : > { %5266 = vmatprep.subr.bf16.mxu0 %v5461_v0 }
 0x8b4   : > { %5267 = vmatpush3.bf16.msra.mxu0 %v5461_v0 }
 0x8b7   : > { %5269 = vmatmul.mubr.msk.bf16.vlgmr.msra.gmra.mrb[48].mxu0 %vm668_vm0, %v5472_v63 }
 0x8b8   : > { %5272 = vmatprep.mubr.msk.bf16.mxu0 %vm668_vm0, %v5473_v55 }
 0x8bf   : > { %5273 = vmatmul.mubr.msk.bf16.gmra.mrb[52].mxu0 %vm668_vm0, %v5474_v47 }
 0x97a   : > { %v4297_v27 = vpop.f32.mrb[46].mxu0 }
 0x97b   : > { %v4302_v17 = vadd.f32 1e-06, %v4297_v27  ;;  %v5259_v57 = vpop.f32.mrb[47].mxu0 }
 0x97d   : > { %5466 = vrsqrt.f32 %v4302_v17 }
 0x987   : > { %v5467_v32 = vpop.eup %5466 }
 0x988   : > { %v4305_v39 = vrot.slane %v5467_v32, 1 }
 0x98a   : > { %v4307_v38 = vmul.f32 %v4305_v39, %v4301_v51  ;;  %v7345_v15 = vpop.f32.mrb[48].mxu0 }
 0x98b   : > { %v7350_v6 = vpop.f32.mrb[49].mxu0  ;;  %v4447_v9 = vmul.f32 %v7345_v15, %v7345_v15 }
 0x98c   : > { %v4309_v53 = vmul.f32 %v4307_v38, %v4297_v27  ;;  %v4314_v13 = vrot.slane %v4307_v38, %v7560_v62  ;;  %v7353_v8 = vpop.f32.mrb[50].mxu0  ;;  %v4445_v34 = vmul.f32 %v7350_v6, %v7350_v6 }
 0x98d   : > { %v7359_v52 = vpop.f32.mrb[51].mxu0  ;;  %v4448_v29 = vmul.f32 %v7353_v8, %v7353_v8 }
 0x98e   : > { %v4310_v5 = vsub.f32 %v4308_v60, %v4309_v53  ;;  %v4432_v23 = vadd.f32 %v7359_v52, %v7350_v6  ;;  %v4446_v22 = vmul.f32 %v7359_v52, %v7359_v52  ;;  %v4315_v54 = vmul.f32 %v4314_v13, %v7266_v18 }
 0x98f   : > { %v4316_v48 = vmul.f32 %v4314_v13, %v7270_v14  ;;  %v4317_v41 = vmul.f32 %v7264_v44, %v4314_v13  ;;  %v4318_v4 = vmul.f32 %v7268_v3, %v4314_v13  ;;  %v4319_v12 = vmul.f32 %v4314_v13, %v7286_v43 }
 0x990   : > { %v4326_v26 = vrot.slane %v4310_v5, %v7560_v62  ;;  %v4433_v11 = vadd.f32 %v7345_v15, %v4432_v23  ;;  %v4453_v58 = vadd.f32 %v4446_v22, %v4445_v34  ;;  %v4320_v21 = vmul.f32 %v4314_v13, %v7293_v36 }
 0x991   : > { %v4321_v18 = vmul.f32 %v7283_v16, %v4314_v13  ;;  %v4322_v14 = vmul.f32 %v7291_v59, %v4314_v13 }
 0x992   : > { %v4454_v56 = vadd.f32 %v4453_v58, %v4447_v9  ;;  %v5274_v44 = vpop.f32.mrb[52].mxu0  ;;  %v4434_v3 = vadd.f32 %v7353_v8, %v4433_v11  ;;  %v7378_v28 = vadd.f32 %v4326_v26, %v4315_v54  ;;  %v7380_v43 = vadd.f32 %v4326_v26, %v4316_v48  ;;  %v4474_v54 = vld [vmem:[%s7434_s12] sm:$0x1] }
 0x993   : > { %v4417_v31 = vpop.f32.mrb[53].mxu0  ;;  %v7382_v35 = vadd.f32 %v4326_v26, %v4317_v41  ;;  %v7384_v19 = vadd.f32 %v4326_v26, %v4318_v4  ;;  %v7386_v36 = vadd.f32 %v4326_v26, %v4319_v12  ;;  %v7388_v59 = vadd.f32 %v4326_v26, %v4320_v21  ;;  %v4481_v4 = vld [vmem:[%s7434_s12 + $0x1] sm:$0x1] }
 0x994   : > { %v4435_v61 = vadd.f32 %v4434_v3, %v4417_v31  ;;  %v4449_v46 = vmul.f32 %v4417_v31, %v4417_v31  ;;  %v4455_v16 = vadd.f32 %v4454_v56, %v4448_v29  ;;  %v5275_v1 = vpop.f32.mrb[54].mxu0  ;;  %v7390_v7 = vadd.f32 %v4326_v26, %v4321_v18 }
 0x995   : > { %v7392_v2 = vadd.f32 %v4326_v26, %v4322_v14  ;;  %v4420_v25 = vpop.f32.mrb[55].mxu0  ;;  %v4451_v33 = vmul.f32 %v5274_v44, %v5274_v44  ;;  %v4452_v42 = vmul.f32 %v5275_v1, %v5275_v1 }
 0x996   : > { %v4456_v50 = vadd.f32 %v4455_v16, %v4449_v46  ;;  %v4436_v20 = vadd.f32 %v4435_v61, %v4420_v25  ;;  %v4450_v30 = vmul.f32 %v4420_v25, %v4420_v25 }
 0x998   : > { %v4437_v49 = vadd.f32 %v5274_v44, %v4436_v20  ;;  %v4457_v37 = vadd.f32 %v4456_v50, %v4450_v30 }
 0x99a   : > { %v4438_v45 = vadd.f32 %v5275_v1, %v4437_v49  ;;  %v4458_v40 = vadd.f32 %v4457_v37, %v4451_v33 }
 0x99c   : > { %v4439_v10 = vrot.slane %v4438_v45, 4  ;;  %v4459_v24 = vadd.f32 %v4458_v40, %v4452_v42 }
 0x99e   : > { %v4440_v0 = vadd.f32 %v4439_v10, %v4438_v45  ;;  %v4460_v63 = vrot.slane %v4459_v24, 4 }
 0x9a0   : > { %v4441_v55 = vrot.slane %v4440_v0, 2  ;;  %v4461_v47 = vadd.f32 %v4460_v63, %v4459_v24 }
 0x9a2   : > { %v4442_v27 = vadd.f32 %v4441_v55, %v4440_v0  ;;  %v4462_v17 = vrot.slane %v4461_v47, 2 }
 0x9a4   : > { %v4443_v57 = vrot.slane %v4442_v27, 1  ;;  %v4463_v32 = vadd.f32 %v4462_v17, %v4461_v47 }
 0x9a6   : > { %v4464_v51 = vrot.slane %v4463_v32, 1  ;;  %v4444_v39 = vadd.f32 %v4443_v57, %v4442_v27 }
 0x9a8   : > { %v4465_v38 = vadd.f32 %v4464_v51, %v4463_v32 }
 0x9aa   : > { %v4466_v60 = vsel %vm1057_vm5, %v4444_v39, %v4465_v38 }
 0x9ab   : > { %v4467_v53 = vmul.f32 0.015625, %v4466_v60 }
 0x9ad   : > { %v4468_v13 = vmul.f32 %v4467_v53, %v4467_v53 }
 0x9af   : > { %v4470_v9 = vrot.slane %v4468_v13, 7 }
 0x9b1   : > { %v4472_v34 = vsub.f32 %v4467_v53, %v4470_v9 }
 0x9b3   : > { %v4473_v5 = vmax.f32 %v4472_v34, 0.0 }
 0x9b5   : > { %v4475_v23 = vadd.f32 1e-05, %v4473_v5 }
 0x9b7   : > { %5468 = vrsqrt.f32 %v4475_v23 }
 0x9c1   : > { %v5469_v22 = vpop.eup %5468 }
 0x9c2   : > { %v4478_v48 = vrot.slane %v5469_v22, 1 }
 0x9c4   : > { %v4480_v41 = vmul.f32 %v4478_v48, %v4474_v54 }
 0x9c6   : > { %v4482_v12 = vmul.f32 %v4480_v41, %v4467_v53  ;;  %v4487_v26 = vrot.slane %v4480_v41, %v7560_v62 }
 0x9c8   : > { %v4483_v11 = vsub.f32 %v4481_v4, %v4482_v12  ;;  %v4488_v58 = vmul.f32 %v4487_v26, %v7350_v6  ;;  %v4489_v21 = vmul.f32 %v4487_v26, %v7359_v52  ;;  %v4490_v29 = vmul.f32 %v7345_v15, %v4487_v26 }
 0x9c9   : > { %v4491_v18 = vmul.f32 %v7353_v8, %v4487_v26  ;;  %v4492_v14 = vmul.f32 %v4487_v26, %v4417_v31  ;;  %v4493_v56 = vmul.f32 %v4487_v26, %v4420_v25  ;;  %v4494_v3 = vmul.f32 %v5274_v44, %v4487_v26 }
 0x9ca   : > { %v4495_v61 = vmul.f32 %v5275_v1, %v4487_v26  ;;  %v4499_v46 = vrot.slane %v4483_v11, %v7560_v62 }
 0x9cc   : > { %v4500_v16 = vadd.f32 %v4499_v46, %v4488_v58  ;;  %v4501_v50 = vadd.f32 %v4499_v46, %v4489_v21  ;;  %v4502_v20 = vadd.f32 %v4499_v46, %v4490_v29  ;;  %v4503_v30 = vadd.f32 %v4499_v46, %v4491_v18 }
 0x9cd   : > { %v4504_v33 = vadd.f32 %v4499_v46, %v4492_v14  ;;  %v4505_v49 = vadd.f32 %v4499_v46, %v4493_v56  ;;  %v4506_v6 = vadd.f32 %v4499_v46, %v4494_v3  ;;  %v4507_v37 = vadd.f32 %v4499_v46, %v4495_v61 }
 0x9ce   : > { %v4508_v52 = vadd.f32 %v4500_v16, %v7378_v28  ;;  %v4509_v15 = vadd.f32 %v4501_v50, %v7380_v43  ;;  %v4510_v8 = vadd.f32 %v4502_v20, %v7382_v35  ;;  %v4511_v44 = vadd.f32 %v4503_v30, %v7384_v19 }
 0x9cf   : > { %v4512_v31 = vadd.f32 %v4504_v33, %v7386_v36  ;;  %v4513_v62 = vadd.f32 %v4505_v49, %v7388_v59  ;;  %v4514_v1 = vadd.f32 %v4506_v6, %v7390_v7  ;;  %v4515_v25 = vadd.f32 %v4507_v37, %v7392_v2 }
 0x9d0   : > { %v4516_v42 = vmax.f32 %v4508_v52, 0.0  ;;  %v4517_v45 = vmax.f32 %v4509_v15, 0.0  ;;  %v4518_v40 = vmax.f32 %v4510_v8, 0.0  ;;  %v4519_v10 = vmax.f32 %v4511_v44, 0.0 }
 0x9d1   : > { %v4520_v28 = vmax.f32 %v4512_v31, 0.0  ;;  %v4521_v43 = vmax.f32 %v4513_v62, 0.0  ;;  %v4522_v35 = vmax.f32 %v4514_v1, 0.0  ;;  %v4523_v19 = vmax.f32 %v4515_v25, 0.0 }
 0x9d2   : > { %v4860_v24 = vpack.c.bf16 %v4517_v45, %v4516_v42  ;;  %v4865_v36 = vpack.c.bf16 %v4519_v10, %v4518_v40 }
 0x9d3   : > { %v4870_v0 = vpack.c.bf16 %v4521_v43, %v4520_v28  ;;  %v4875_v59 = vpack.c.bf16 %v4523_v19, %v4522_v35 }
 0x9d4   : > { %4861 = vst [vmem:[%s440_s21] sm:$0xff] %v4860_v24   ;;  %4877 = vst [vmem:[%s440_s21 + $0x8] sm:$0xff] %v4865_v36  }
 0x9d5   : > { %4878 = vst [vmem:[%s440_s21 + $0x10] sm:$0xff] %v4870_v0   ;;  %4879 = vst [vmem:[%s440_s21 + $0x18] sm:$0xff] %v4875_v59  }
 0x9d6 PF: > { %s23_s25 = sadd.s32 1, %s5481_s25  }
 0x9d7   : > { %p20_p4 = scmp.ge.s32.totalorder %s23_s25, 4  }
 0x9d9   :  { %22 = sbr.rel (!%p20_p4) target bundleno = 1 (0x1), region = 108 }

</bundles_post_ra>
